<compile_context>
chip_gen: v7x
topology: tpu7x:2x2x1
jax: 0.10.0
libtpu: 0.0.40
codegen_flags: <defaults>
</compile_context>

<pallas_src>
import jax
import jax.numpy as jnp
from jax.experimental import pallas as pl
from jax.experimental.pallas import tpu as pltpu


def _double_lstm_kernel(
        tcr_x_ref, tcr_len_ref, pep_x_ref, pep_len_ref,
        t_wih0, t_whh0, t_b0, t_wih1, t_whh1, t_b1,
        p_wih0, p_whh0, p_b0, p_wih1, p_whh1, p_b1,
        w1t_ref, w1p_ref, bh_ref, wo_ref, bo_ref,
        out_ref,
        tcr_g0, pep_g0):
    """Fused forward: two 2-layer LSTM stacks + MLP head.

    tcr_x_ref / pep_x_ref: (T*Bp, E) bf16, time-major rows (row = t*Bp + b).
    *_len_ref:             (Bp, 1) int32 sequence lengths.
    wih*/whh*:             (in, 4H) / (H, 4H) bf16, PyTorch gate order i,f,g,o.
    b*:                    (1, 4H) f32 (b_ih + b_hh combined).
    w1t/w1p:               (H, H) bf16 halves of hidden_layer weight.
    bh:                    (1, H) f32; wo: (1, H) f32; bo: (1, 1) f32.
    out_ref:               (Bp, 1) f32 sigmoid probabilities.
    tcr_g0/pep_g0:         (T*Bp, 4H) f32 VMEM scratch for hoisted projections.
    """
    Bp = out_ref.shape[0]
    H = t_whh0.shape[0]

    def lstm_gates(gates, c):
        i = jax.nn.sigmoid(gates[:, 0 * H:1 * H])
        f = jax.nn.sigmoid(gates[:, 1 * H:2 * H])
        g = jnp.tanh(gates[:, 2 * H:3 * H])
        o = jax.nn.sigmoid(gates[:, 3 * H:4 * H])
        c_new = f * c + i * g
        h_new = o * jnp.tanh(c_new)
        return h_new, c_new

    def run_stack(x_ref, len_ref, g0_ref, wih0, whh0, b0, wih1, whh1, b1):
        T = x_ref.shape[0] // Bp
        # Hoisted layer-0 input projection: single big matmul for all timesteps.
        g0_ref[...] = (jnp.dot(x_ref[...], wih0[...],
                               preferred_element_type=jnp.float32) + b0[...])
        lens = len_ref[...]                                    # (Bp, 1) i32

        def step(t, carry):
            h1, c1, h2, c2, acc = carry
            row = pl.multiple_of(t * Bp, Bp)                   # 8-aligned start
            gates1 = (g0_ref[pl.ds(row, Bp), :]
                      + jnp.dot(h1.astype(jnp.bfloat16), whh0[...],
                                preferred_element_type=jnp.float32))
            h1, c1 = lstm_gates(gates1, c1)
            # TODO(synk): nn.LSTM inter-layer dropout is train-only; eval = identity.
            gates2 = (jnp.dot(h1.astype(jnp.bfloat16), wih1[...],
                              preferred_element_type=jnp.float32)
                      + jnp.dot(h2.astype(jnp.bfloat16), whh1[...],
                                preferred_element_type=jnp.float32)
                      + b1[...])
            h2, c2 = lstm_gates(gates2, c2)
            # Select layer-2 hidden state at t == len-1 (packed-sequence gather).
            acc = jnp.where(lens == t + 1, h2, acc)
            return (h1, c1, h2, c2, acc)

        z = jnp.zeros((Bp, H), jnp.float32)
        carry = jax.lax.fori_loop(0, T, step, (z, z, z, z, z), unroll=True)
        return carry[4]

    tcr_last = run_stack(tcr_x_ref, tcr_len_ref, tcr_g0,
                         t_wih0, t_whh0, t_b0, t_wih1, t_whh1, t_b1)
    pep_last = run_stack(pep_x_ref, pep_len_ref, pep_g0,
                         p_wih0, p_whh0, p_b0, p_wih1, p_whh1, p_b1)

    # MLP head: concat-free hidden layer -> LeakyReLU(0.01) -> output -> sigmoid.
    hid = (jnp.dot(tcr_last.astype(jnp.bfloat16), w1t_ref[...],
                   preferred_element_type=jnp.float32)
           + jnp.dot(pep_last.astype(jnp.bfloat16), w1p_ref[...],
                     preferred_element_type=jnp.float32)
           + bh_ref[...])
    hid = jnp.where(hid >= 0.0, hid, 0.01 * hid)               # LeakyReLU
    # TODO(synk): nn.Dropout after the hidden layer is train-only; eval = identity.
    logit = jnp.sum(hid * wo_ref[...], axis=1, keepdims=True) + bo_ref[...]
    out_ref[...] = jax.nn.sigmoid(logit)


def double_lstm_classifier_forward(params, tcrs, tcr_lens, peps, pep_lens):
    B, T_tcr = tcrs.shape
    _, T_pep = peps.shape
    E = params["tcr_emb"].shape[1]
    H = params["w_hidden_tcr"].shape[0]
    Bp = ((B + 7) // 8) * 8          # pad batch to f32 sublane multiple (>= 8)

    def prep(tok, lens, emb):
        pad = Bp - B
        tok_p = jnp.pad(tok, ((0, pad), (0, 0)))               # pad token id 0
        lens_p = jnp.pad(lens.astype(jnp.int32), (0, pad), constant_values=1)
        T = tok.shape[1]
        # Gather with transposed ids -> time-major (T, Bp, E) directly, then
        # flatten to (T*Bp, E) (contiguous reshape, no float transpose).
        x = emb[tok_p.T].astype(jnp.bfloat16).reshape(T * Bp, E)
        return x, lens_p.reshape(Bp, 1)

    tcr_x, tcr_len2d = prep(tcrs, tcr_lens, params["tcr_emb"])
    pep_x, pep_len2d = prep(peps, pep_lens, params["pep_emb"])

    vmem = pl.BlockSpec(memory_space=pltpu.MemorySpace.VMEM)
    out = pl.pallas_call(
        _double_lstm_kernel,
        out_shape=jax.ShapeDtypeStruct((Bp, 1), jnp.float32),
        in_specs=[vmem] * 21,
        out_specs=vmem,
        scratch_shapes=[pltpu.VMEM((T_tcr * Bp, 4 * H), jnp.float32),
                        pltpu.VMEM((T_pep * Bp, 4 * H), jnp.float32)],
        # TODO(synk): on v7x the two independent stacks could run on the two
        # TensorCores via a size-2 "parallel" grid axis; kept single-core here.
    )(tcr_x, tcr_len2d, pep_x, pep_len2d,
      *params["tcr_l0"], *params["tcr_l1"],
      *params["pep_l0"], *params["pep_l1"],
      params["w_hidden_tcr"], params["w_hidden_pep"], params["b_hidden"],
      params["w_out_row"], params["b_out"])
    return out[:B]                                             # (B, 1) probs


def init_params(key, embedding_dim, lstm_dim):
    """Deterministic synthetic parameters matching the module's shapes."""
    E, H = embedding_dim, lstm_dim
    keys = jax.random.split(key, 12)

    def normal(k, shape, scale=0.1, dtype=jnp.float32):
        return (scale * jax.random.normal(k, shape, dtype=jnp.float32)).astype(dtype)

    tcr_emb = normal(keys[0], (21, E)).at[0].set(0.0)          # padding_idx=0
    pep_emb = normal(keys[1], (21, E)).at[0].set(0.0)

    def lstm_layer(k, in_dim):
        k1, k2, k3, k4 = jax.random.split(k, 4)
        wih = normal(k1, (in_dim, 4 * H), dtype=jnp.bfloat16)  # (in, 4H) transposed
        whh = normal(k2, (H, 4 * H), dtype=jnp.bfloat16)       # (H, 4H) transposed
        b = normal(k3, (1, 4 * H)) + normal(k4, (1, 4 * H))    # b_ih + b_hh, f32
        return wih, whh, b

    return dict(
        tcr_emb=tcr_emb, pep_emb=pep_emb,
        tcr_l0=lstm_layer(keys[2], E), tcr_l1=lstm_layer(keys[3], H),
        pep_l0=lstm_layer(keys[4], E), pep_l1=lstm_layer(keys[5], H),
        w_hidden_tcr=normal(keys[6], (H, H), dtype=jnp.bfloat16),   # top half
        w_hidden_pep=normal(keys[7], (H, H), dtype=jnp.bfloat16),   # bottom half
        b_hidden=normal(keys[8], (1, H)),
        w_out_row=normal(keys[9], (1, H)),                     # output weight row
        b_out=normal(keys[10], (1, 1)),
    )


if __name__ == "__main__":
    B, T_TCR, T_PEP, E, H = 2, 10, 8, 16, 32

    key = jax.random.PRNGKey(0)
    k_params, k_tcr, k_pep, k_tl, k_pl = jax.random.split(key, 5)

    params = init_params(k_params, E, H)

    tcr_lens = jax.random.randint(k_tl, (B,), 3, T_TCR + 1, dtype=jnp.int32)
    pep_lens = jax.random.randint(k_pl, (B,), 3, T_PEP + 1, dtype=jnp.int32)
    tcrs = jax.random.randint(k_tcr, (B, T_TCR), 1, 21, dtype=jnp.int32)
    peps = jax.random.randint(k_pep, (B, T_PEP), 1, 21, dtype=jnp.int32)
    # zero-pad token ids past each sequence length (matches padding_idx=0 usage)
    tcrs = jnp.where(jnp.arange(T_TCR)[None, :] < tcr_lens[:, None], tcrs, 0)
    peps = jnp.where(jnp.arange(T_PEP)[None, :] < pep_lens[:, None], peps, 0)

    forward = jax.jit(double_lstm_classifier_forward)
    out = forward(params, tcrs, tcr_lens, peps, pep_lens)
    out = jax.block_until_ready(out)
    assert out.shape == (B, 1)
    assert bool(jnp.all((out >= 0.0) & (out <= 1.0)))
    print("KERNEL_OK")
</pallas_src>

<mosaic_0001>
module attributes {stable_mosaic.version = 11 : i64} {
  func.func @_double_lstm_kernel(%arg0: memref<80x16xbf16, #tpu.memory_space<vmem>>, %arg1: memref<8x1xi32, #tpu.memory_space<vmem>>, %arg2: memref<64x16xbf16, #tpu.memory_space<vmem>>, %arg3: memref<8x1xi32, #tpu.memory_space<vmem>>, %arg4: memref<16x128xbf16, #tpu.memory_space<vmem>>, %arg5: memref<32x128xbf16, #tpu.memory_space<vmem>>, %arg6: memref<1x128xf32, #tpu.memory_space<vmem>>, %arg7: memref<32x128xbf16, #tpu.memory_space<vmem>>, %arg8: memref<32x128xbf16, #tpu.memory_space<vmem>>, %arg9: memref<1x128xf32, #tpu.memory_space<vmem>>, %arg10: memref<16x128xbf16, #tpu.memory_space<vmem>>, %arg11: memref<32x128xbf16, #tpu.memory_space<vmem>>, %arg12: memref<1x128xf32, #tpu.memory_space<vmem>>, %arg13: memref<32x128xbf16, #tpu.memory_space<vmem>>, %arg14: memref<32x128xbf16, #tpu.memory_space<vmem>>, %arg15: memref<1x128xf32, #tpu.memory_space<vmem>>, %arg16: memref<32x32xbf16, #tpu.memory_space<vmem>>, %arg17: memref<32x32xbf16, #tpu.memory_space<vmem>>, %arg18: memref<1x32xf32, #tpu.memory_space<vmem>>, %arg19: memref<1x32xf32, #tpu.memory_space<vmem>>, %arg20: memref<1x1xf32, #tpu.memory_space<vmem>>, %arg21: memref<8x1xf32, #tpu.memory_space<vmem>>, %arg22: memref<80x128xf32, #tpu.memory_space<vmem>>, %arg23: memref<64x128xf32, #tpu.memory_space<vmem>>) attributes {dimension_semantics = [], scalar_prefetch = 0 : i64, scratch_operands = 2 : i64, tpu.core_type = #tpu.core_type<tc>} {
    %c0 = arith.constant 0 : index
    %c0_0 = arith.constant 0 : index
    %0 = vector.load %arg0[%c0, %c0_0] : memref<80x16xbf16, #tpu.memory_space<vmem>>, vector<80x16xbf16>
    %c0_1 = arith.constant 0 : index
    %c0_2 = arith.constant 0 : index
    %1 = vector.load %arg4[%c0_1, %c0_2] : memref<16x128xbf16, #tpu.memory_space<vmem>>, vector<16x128xbf16>
    %cst = arith.constant dense<0.000000e+00> : vector<80x128xf32>
    %2 = tpu.matmul %0, %1, %cst {dimension_numbers = #tpu.dot_dimension_numbers<[1], [0], [0], [1], [0, 0, 1, 1], [], []>} : vector<80x16xbf16>, vector<16x128xbf16>, vector<80x128xf32> -> vector<80x128xf32>
    %c0_3 = arith.constant 0 : index
    %c0_4 = arith.constant 0 : index
    %3 = vector.load %arg6[%c0_3, %c0_4] : memref<1x128xf32, #tpu.memory_space<vmem>>, vector<1x128xf32>
    %4 = vector.broadcast %3 : vector<1x128xf32> to vector<80x128xf32>
    %5 = arith.addf %2, %4 : vector<80x128xf32>
    %c0_5 = arith.constant 0 : index
    %c0_6 = arith.constant 0 : index
    %6 = vector.load %arg22[%c0_5, %c0_6] : memref<80x128xf32, #tpu.memory_space<vmem>>, vector<80x128xf32>
    tpu.vector_store %arg22[%c0_5, %c0_6], %5 {strides = array<i32>} : memref<80x128xf32, #tpu.memory_space<vmem>>, vector<80x128xf32>,
    %c0_7 = arith.constant 0 : index
    %c0_8 = arith.constant 0 : index
    %7 = vector.load %arg1[%c0_7, %c0_8] : memref<8x1xi32, #tpu.memory_space<vmem>>, vector<8x1xi32>
    %cst_9 = arith.constant 0.000000e+00 : f32
    %8 = vector.broadcast %cst_9 : f32 to vector<8x32xf32>
    %c0_i32 = arith.constant 0 : i32
    %c8_i32 = arith.constant 8 : i32
    %9 = arith.muli %c0_i32, %c8_i32 : i32
    %10 = tpu.assume_multiple %9, 8 : i32
    %11 = arith.index_cast %10 : i32 to index
    %c0_10 = arith.constant 0 : index
    %12 = vector.load %arg22[%11, %c0_10] : memref<80x128xf32, #tpu.memory_space<vmem>>, vector<8x128xf32>
    %13 = arith.truncf %8 : vector<8x32xf32> to vector<8x32xbf16>
    %c0_11 = arith.constant 0 : index
    %c0_12 = arith.constant 0 : index
    %14 = vector.load %arg5[%c0_11, %c0_12] : memref<32x128xbf16, #tpu.memory_space<vmem>>, vector<32x128xbf16>
    %cst_13 = arith.constant dense<0.000000e+00> : vector<8x128xf32>
    %15 = tpu.matmul %13, %14, %cst_13 {dimension_numbers = #tpu.dot_dimension_numbers<[1], [0], [0], [1], [0, 0, 1, 1], [], []>} : vector<8x32xbf16>, vector<32x128xbf16>, vector<8x128xf32> -> vector<8x128xf32>
    %16 = arith.addf %12, %15 : vector<8x128xf32>
    %17 = vector.extract_strided_slice %16 {offsets = [0, 0], sizes = [8, 32], strides = [1, 1]} : vector<8x128xf32> to vector<8x32xf32>
    %18 = arith.negf %17 : vector<8x32xf32>
    %19 = math.exp %18 : vector<8x32xf32>
    %cst_14 = arith.constant 1.000000e+00 : f32
    %20 = vector.broadcast %cst_14 : f32 to vector<8x32xf32>
    %21 = arith.addf %20, %19 : vector<8x32xf32>
    %22 = arith.divf %20, %21 : vector<8x32xf32>
    %23 = vector.extract_strided_slice %16 {offsets = [0, 32], sizes = [8, 32], strides = [1, 1]} : vector<8x128xf32> to vector<8x32xf32>
    %24 = arith.negf %23 : vector<8x32xf32>
    %25 = math.exp %24 : vector<8x32xf32>
    %cst_15 = arith.constant 1.000000e+00 : f32
    %26 = vector.broadcast %cst_15 : f32 to vector<8x32xf32>
    %27 = arith.addf %26, %25 : vector<8x32xf32>
    %28 = arith.divf %26, %27 : vector<8x32xf32>
    %29 = vector.extract_strided_slice %16 {offsets = [0, 64], sizes = [8, 32], strides = [1, 1]} : vector<8x128xf32> to vector<8x32xf32>
    %30 = math.tanh %29 : vector<8x32xf32>
    %31 = vector.extract_strided_slice %16 {offsets = [0, 96], sizes = [8, 32], strides = [1, 1]} : vector<8x128xf32> to vector<8x32xf32>
    %32 = arith.negf %31 : vector<8x32xf32>
    %33 = math.exp %32 : vector<8x32xf32>
    %cst_16 = arith.constant 1.000000e+00 : f32
    %34 = vector.broadcast %cst_16 : f32 to vector<8x32xf32>
    %35 = arith.addf %34, %33 : vector<8x32xf32>
    %36 = arith.divf %34, %35 : vector<8x32xf32>
    %37 = arith.mulf %28, %8 : vector<8x32xf32>
    %38 = arith.mulf %22, %30 : vector<8x32xf32>
    %39 = arith.addf %37, %38 : vector<8x32xf32>
    %40 = math.tanh %39 : vector<8x32xf32>
    %41 = arith.mulf %36, %40 : vector<8x32xf32>
    %42 = arith.truncf %41 : vector<8x32xf32> to vector<8x32xbf16>
    %c0_17 = arith.constant 0 : index
    %c0_18 = arith.constant 0 : index
    %43 = vector.load %arg7[%c0_17, %c0_18] : memref<32x128xbf16, #tpu.memory_space<vmem>>, vector<32x128xbf16>
    %cst_19 = arith.constant dense<0.000000e+00> : vector<8x128xf32>
    %44 = tpu.matmul %42, %43, %cst_19 {dimension_numbers = #tpu.dot_dimension_numbers<[1], [0], [0], [1], [0, 0, 1, 1], [], []>} : vector<8x32xbf16>, vector<32x128xbf16>, vector<8x128xf32> -> vector<8x128xf32>
    %45 = arith.truncf %8 : vector<8x32xf32> to vector<8x32xbf16>
    %c0_20 = arith.constant 0 : index
    %c0_21 = arith.constant 0 : index
    %46 = vector.load %arg8[%c0_20, %c0_21] : memref<32x128xbf16, #tpu.memory_space<vmem>>, vector<32x128xbf16>
    %cst_22 = arith.constant dense<0.000000e+00> : vector<8x128xf32>
    %47 = tpu.matmul %45, %46, %cst_22 {dimension_numbers = #tpu.dot_dimension_numbers<[1], [0], [0], [1], [0, 0, 1, 1], [], []>} : vector<8x32xbf16>, vector<32x128xbf16>, vector<8x128xf32> -> vector<8x128xf32>
    %48 = arith.addf %44, %47 : vector<8x128xf32>
    %c0_23 = arith.constant 0 : index
    %c0_24 = arith.constant 0 : index
    %49 = vector.load %arg9[%c0_23, %c0_24] : memref<1x128xf32, #tpu.memory_space<vmem>>, vector<1x128xf32>
    %50 = vector.broadcast %49 : vector<1x128xf32> to vector<8x128xf32>
    %51 = arith.addf %48, %50 : vector<8x128xf32>
    %52 = vector.extract_strided_slice %51 {offsets = [0, 0], sizes = [8, 32], strides = [1, 1]} : vector<8x128xf32> to vector<8x32xf32>
    %53 = arith.negf %52 : vector<8x32xf32>
    %54 = math.exp %53 : vector<8x32xf32>
    %cst_25 = arith.constant 1.000000e+00 : f32
    %55 = vector.broadcast %cst_25 : f32 to vector<8x32xf32>
    %56 = arith.addf %55, %54 : vector<8x32xf32>
    %57 = arith.divf %55, %56 : vector<8x32xf32>
    %58 = vector.extract_strided_slice %51 {offsets = [0, 32], sizes = [8, 32], strides = [1, 1]} : vector<8x128xf32> to vector<8x32xf32>
    %59 = arith.negf %58 : vector<8x32xf32>
    %60 = math.exp %59 : vector<8x32xf32>
    %cst_26 = arith.constant 1.000000e+00 : f32
    %61 = vector.broadcast %cst_26 : f32 to vector<8x32xf32>
    %62 = arith.addf %61, %60 : vector<8x32xf32>
    %63 = arith.divf %61, %62 : vector<8x32xf32>
    %64 = vector.extract_strided_slice %51 {offsets = [0, 64], sizes = [8, 32], strides = [1, 1]} : vector<8x128xf32> to vector<8x32xf32>
    %65 = math.tanh %64 : vector<8x32xf32>
    %66 = vector.extract_strided_slice %51 {offsets = [0, 96], sizes = [8, 32], strides = [1, 1]} : vector<8x128xf32> to vector<8x32xf32>
    %67 = arith.negf %66 : vector<8x32xf32>
    %68 = math.exp %67 : vector<8x32xf32>
    %cst_27 = arith.constant 1.000000e+00 : f32
    %69 = vector.broadcast %cst_27 : f32 to vector<8x32xf32>
    %70 = arith.addf %69, %68 : vector<8x32xf32>
    %71 = arith.divf %69, %70 : vector<8x32xf32>
    %72 = arith.mulf %63, %8 : vector<8x32xf32>
    %73 = arith.mulf %57, %65 : vector<8x32xf32>
    %74 = arith.addf %72, %73 : vector<8x32xf32>
    %75 = math.tanh %74 : vector<8x32xf32>
    %76 = arith.mulf %71, %75 : vector<8x32xf32>
    %c1_i32 = arith.constant 1 : i32
    %77 = arith.addi %c0_i32, %c1_i32 : i32
    %78 = vector.broadcast %77 : i32 to vector<8x1xi32>
    %79 = arith.cmpi eq, %7, %78 : vector<8x1xi32>
    %80 = vector.shape_cast %79 : vector<8x1xi1> to vector<8x1xi1>
    %81 = vector.broadcast %80 : vector<8x1xi1> to vector<8x32xi1>
    %82 = arith.select %81, %76, %8 : vector<8x32xi1>, vector<8x32xf32>
    %c1_i32_28 = arith.constant 1 : i32
    %c8_i32_29 = arith.constant 8 : i32
    %83 = arith.muli %c1_i32_28, %c8_i32_29 : i32
    %84 = tpu.assume_multiple %83, 8 : i32
    %85 = arith.index_cast %84 : i32 to index
    %c0_30 = arith.constant 0 : index
    %86 = vector.load %arg22[%85, %c0_30] : memref<80x128xf32, #tpu.memory_space<vmem>>, vector<8x128xf32>
    %87 = arith.truncf %41 : vector<8x32xf32> to vector<8x32xbf16>
    %c0_31 = arith.constant 0 : index
    %c0_32 = arith.constant 0 : index
    %88 = vector.load %arg5[%c0_31, %c0_32] : memref<32x128xbf16, #tpu.memory_space<vmem>>, vector<32x128xbf16>
    %cst_33 = arith.constant dense<0.000000e+00> : vector<8x128xf32>
    %89 = tpu.matmul %87, %88, %cst_33 {dimension_numbers = #tpu.dot_dimension_numbers<[1], [0], [0], [1], [0, 0, 1, 1], [], []>} : vector<8x32xbf16>, vector<32x128xbf16>, vector<8x128xf32> -> vector<8x128xf32>
    %90 = arith.addf %86, %89 : vector<8x128xf32>
    %91 = vector.extract_strided_slice %90 {offsets = [0, 0], sizes = [8, 32], strides = [1, 1]} : vector<8x128xf32> to vector<8x32xf32>
    %92 = arith.negf %91 : vector<8x32xf32>
    %93 = math.exp %92 : vector<8x32xf32>
    %cst_34 = arith.constant 1.000000e+00 : f32
    %94 = vector.broadcast %cst_34 : f32 to vector<8x32xf32>
    %95 = arith.addf %94, %93 : vector<8x32xf32>
    %96 = arith.divf %94, %95 : vector<8x32xf32>
    %97 = vector.extract_strided_slice %90 {offsets = [0, 32], sizes = [8, 32], strides = [1, 1]} : vector<8x128xf32> to vector<8x32xf32>
    %98 = arith.negf %97 : vector<8x32xf32>
    %99 = math.exp %98 : vector<8x32xf32>
    %cst_35 = arith.constant 1.000000e+00 : f32
    %100 = vector.broadcast %cst_35 : f32 to vector<8x32xf32>
    %101 = arith.addf %100, %99 : vector<8x32xf32>
    %102 = arith.divf %100, %101 : vector<8x32xf32>
    %103 = vector.extract_strided_slice %90 {offsets = [0, 64], sizes = [8, 32], strides = [1, 1]} : vector<8x128xf32> to vector<8x32xf32>
    %104 = math.tanh %103 : vector<8x32xf32>
    %105 = vector.extract_strided_slice %90 {offsets = [0, 96], sizes = [8, 32], strides = [1, 1]} : vector<8x128xf32> to vector<8x32xf32>
    %106 = arith.negf %105 : vector<8x32xf32>
    %107 = math.exp %106 : vector<8x32xf32>
    %cst_36 = arith.constant 1.000000e+00 : f32
    %108 = vector.broadcast %cst_36 : f32 to vector<8x32xf32>
    %109 = arith.addf %108, %107 : vector<8x32xf32>
    %110 = arith.divf %108, %109 : vector<8x32xf32>
    %111 = arith.mulf %102, %39 : vector<8x32xf32>
    %112 = arith.mulf %96, %104 : vector<8x32xf32>
    %113 = arith.addf %111, %112 : vector<8x32xf32>
    %114 = math.tanh %113 : vector<8x32xf32>
    %115 = arith.mulf %110, %114 : vector<8x32xf32>
    %116 = arith.truncf %115 : vector<8x32xf32> to vector<8x32xbf16>
    %c0_37 = arith.constant 0 : index
    %c0_38 = arith.constant 0 : index
    %117 = vector.load %arg7[%c0_37, %c0_38] : memref<32x128xbf16, #tpu.memory_space<vmem>>, vector<32x128xbf16>
    %cst_39 = arith.constant dense<0.000000e+00> : vector<8x128xf32>
    %118 = tpu.matmul %116, %117, %cst_39 {dimension_numbers = #tpu.dot_dimension_numbers<[1], [0], [0], [1], [0, 0, 1, 1], [], []>} : vector<8x32xbf16>, vector<32x128xbf16>, vector<8x128xf32> -> vector<8x128xf32>
    %119 = arith.truncf %76 : vector<8x32xf32> to vector<8x32xbf16>
    %c0_40 = arith.constant 0 : index
    %c0_41 = arith.constant 0 : index
    %120 = vector.load %arg8[%c0_40, %c0_41] : memref<32x128xbf16, #tpu.memory_space<vmem>>, vector<32x128xbf16>
    %cst_42 = arith.constant dense<0.000000e+00> : vector<8x128xf32>
    %121 = tpu.matmul %119, %120, %cst_42 {dimension_numbers = #tpu.dot_dimension_numbers<[1], [0], [0], [1], [0, 0, 1, 1], [], []>} : vector<8x32xbf16>, vector<32x128xbf16>, vector<8x128xf32> -> vector<8x128xf32>
    %122 = arith.addf %118, %121 : vector<8x128xf32>
    %c0_43 = arith.constant 0 : index
    %c0_44 = arith.constant 0 : index
    %123 = vector.load %arg9[%c0_43, %c0_44] : memref<1x128xf32, #tpu.memory_space<vmem>>, vector<1x128xf32>
    %124 = vector.broadcast %123 : vector<1x128xf32> to vector<8x128xf32>
    %125 = arith.addf %122, %124 : vector<8x128xf32>
    %126 = vector.extract_strided_slice %125 {offsets = [0, 0], sizes = [8, 32], strides = [1, 1]} : vector<8x128xf32> to vector<8x32xf32>
    %127 = arith.negf %126 : vector<8x32xf32>
    %128 = math.exp %127 : vector<8x32xf32>
    %cst_45 = arith.constant 1.000000e+00 : f32
    %129 = vector.broadcast %cst_45 : f32 to vector<8x32xf32>
    %130 = arith.addf %129, %128 : vector<8x32xf32>
    %131 = arith.divf %129, %130 : vector<8x32xf32>
    %132 = vector.extract_strided_slice %125 {offsets = [0, 32], sizes = [8, 32], strides = [1, 1]} : vector<8x128xf32> to vector<8x32xf32>
    %133 = arith.negf %132 : vector<8x32xf32>
    %134 = math.exp %133 : vector<8x32xf32>
    %cst_46 = arith.constant 1.000000e+00 : f32
    %135 = vector.broadcast %cst_46 : f32 to vector<8x32xf32>
    %136 = arith.addf %135, %134 : vector<8x32xf32>
    %137 = arith.divf %135, %136 : vector<8x32xf32>
    %138 = vector.extract_strided_slice %125 {offsets = [0, 64], sizes = [8, 32], strides = [1, 1]} : vector<8x128xf32> to vector<8x32xf32>
    %139 = math.tanh %138 : vector<8x32xf32>
    %140 = vector.extract_strided_slice %125 {offsets = [0, 96], sizes = [8, 32], strides = [1, 1]} : vector<8x128xf32> to vector<8x32xf32>
    %141 = arith.negf %140 : vector<8x32xf32>
    %142 = math.exp %141 : vector<8x32xf32>
    %cst_47 = arith.constant 1.000000e+00 : f32
    %143 = vector.broadcast %cst_47 : f32 to vector<8x32xf32>
    %144 = arith.addf %143, %142 : vector<8x32xf32>
    %145 = arith.divf %143, %144 : vector<8x32xf32>
    %146 = arith.mulf %137, %74 : vector<8x32xf32>
    %147 = arith.mulf %131, %139 : vector<8x32xf32>
    %148 = arith.addf %146, %147 : vector<8x32xf32>
    %149 = math.tanh %148 : vector<8x32xf32>
    %150 = arith.mulf %145, %149 : vector<8x32xf32>
    %c1_i32_48 = arith.constant 1 : i32
    %151 = arith.addi %c1_i32_28, %c1_i32_48 : i32
    %152 = vector.broadcast %151 : i32 to vector<8x1xi32>
    %153 = arith.cmpi eq, %7, %152 : vector<8x1xi32>
    %154 = vector.shape_cast %153 : vector<8x1xi1> to vector<8x1xi1>
    %155 = vector.broadcast %154 : vector<8x1xi1> to vector<8x32xi1>
    %156 = arith.select %155, %150, %82 : vector<8x32xi1>, vector<8x32xf32>
    %c2_i32 = arith.constant 2 : i32
    %c8_i32_49 = arith.constant 8 : i32
    %157 = arith.muli %c2_i32, %c8_i32_49 : i32
    %158 = tpu.assume_multiple %157, 8 : i32
    %159 = arith.index_cast %158 : i32 to index
    %c0_50 = arith.constant 0 : index
    %160 = vector.load %arg22[%159, %c0_50] : memref<80x128xf32, #tpu.memory_space<vmem>>, vector<8x128xf32>
    %161 = arith.truncf %115 : vector<8x32xf32> to vector<8x32xbf16>
    %c0_51 = arith.constant 0 : index
    %c0_52 = arith.constant 0 : index
    %162 = vector.load %arg5[%c0_51, %c0_52] : memref<32x128xbf16, #tpu.memory_space<vmem>>, vector<32x128xbf16>
    %cst_53 = arith.constant dense<0.000000e+00> : vector<8x128xf32>
    %163 = tpu.matmul %161, %162, %cst_53 {dimension_numbers = #tpu.dot_dimension_numbers<[1], [0], [0], [1], [0, 0, 1, 1], [], []>} : vector<8x32xbf16>, vector<32x128xbf16>, vector<8x128xf32> -> vector<8x128xf32>
    %164 = arith.addf %160, %163 : vector<8x128xf32>
    %165 = vector.extract_strided_slice %164 {offsets = [0, 0], sizes = [8, 32], strides = [1, 1]} : vector<8x128xf32> to vector<8x32xf32>
    %166 = arith.negf %165 : vector<8x32xf32>
    %167 = math.exp %166 : vector<8x32xf32>
    %cst_54 = arith.constant 1.000000e+00 : f32
    %168 = vector.broadcast %cst_54 : f32 to vector<8x32xf32>
    %169 = arith.addf %168, %167 : vector<8x32xf32>
    %170 = arith.divf %168, %169 : vector<8x32xf32>
    %171 = vector.extract_strided_slice %164 {offsets = [0, 32], sizes = [8, 32], strides = [1, 1]} : vector<8x128xf32> to vector<8x32xf32>
    %172 = arith.negf %171 : vector<8x32xf32>
    %173 = math.exp %172 : vector<8x32xf32>
    %cst_55 = arith.constant 1.000000e+00 : f32
    %174 = vector.broadcast %cst_55 : f32 to vector<8x32xf32>
    %175 = arith.addf %174, %173 : vector<8x32xf32>
    %176 = arith.divf %174, %175 : vector<8x32xf32>
    %177 = vector.extract_strided_slice %164 {offsets = [0, 64], sizes = [8, 32], strides = [1, 1]} : vector<8x128xf32> to vector<8x32xf32>
    %178 = math.tanh %177 : vector<8x32xf32>
    %179 = vector.extract_strided_slice %164 {offsets = [0, 96], sizes = [8, 32], strides = [1, 1]} : vector<8x128xf32> to vector<8x32xf32>
    %180 = arith.negf %179 : vector<8x32xf32>
    %181 = math.exp %180 : vector<8x32xf32>
    %cst_56 = arith.constant 1.000000e+00 : f32
    %182 = vector.broadcast %cst_56 : f32 to vector<8x32xf32>
    %183 = arith.addf %182, %181 : vector<8x32xf32>
    %184 = arith.divf %182, %183 : vector<8x32xf32>
    %185 = arith.mulf %176, %113 : vector<8x32xf32>
    %186 = arith.mulf %170, %178 : vector<8x32xf32>
    %187 = arith.addf %185, %186 : vector<8x32xf32>
    %188 = math.tanh %187 : vector<8x32xf32>
    %189 = arith.mulf %184, %188 : vector<8x32xf32>
    %190 = arith.truncf %189 : vector<8x32xf32> to vector<8x32xbf16>
    %c0_57 = arith.constant 0 : index
    %c0_58 = arith.constant 0 : index
    %191 = vector.load %arg7[%c0_57, %c0_58] : memref<32x128xbf16, #tpu.memory_space<vmem>>, vector<32x128xbf16>
    %cst_59 = arith.constant dense<0.000000e+00> : vector<8x128xf32>
    %192 = tpu.matmul %190, %191, %cst_59 {dimension_numbers = #tpu.dot_dimension_numbers<[1], [0], [0], [1], [0, 0, 1, 1], [], []>} : vector<8x32xbf16>, vector<32x128xbf16>, vector<8x128xf32> -> vector<8x128xf32>
    %193 = arith.truncf %150 : vector<8x32xf32> to vector<8x32xbf16>
    %c0_60 = arith.constant 0 : index
    %c0_61 = arith.constant 0 : index
    %194 = vector.load %arg8[%c0_60, %c0_61] : memref<32x128xbf16, #tpu.memory_space<vmem>>, vector<32x128xbf16>
    %cst_62 = arith.constant dense<0.000000e+00> : vector<8x128xf32>
    %195 = tpu.matmul %193, %194, %cst_62 {dimension_numbers = #tpu.dot_dimension_numbers<[1], [0], [0], [1], [0, 0, 1, 1], [], []>} : vector<8x32xbf16>, vector<32x128xbf16>, vector<8x128xf32> -> vector<8x128xf32>
    %196 = arith.addf %192, %195 : vector<8x128xf32>
    %c0_63 = arith.constant 0 : index
    %c0_64 = arith.constant 0 : index
    %197 = vector.load %arg9[%c0_63, %c0_64] : memref<1x128xf32, #tpu.memory_space<vmem>>, vector<1x128xf32>
    %198 = vector.broadcast %197 : vector<1x128xf32> to vector<8x128xf32>
    %199 = arith.addf %196, %198 : vector<8x128xf32>
    %200 = vector.extract_strided_slice %199 {offsets = [0, 0], sizes = [8, 32], strides = [1, 1]} : vector<8x128xf32> to vector<8x32xf32>
    %201 = arith.negf %200 : vector<8x32xf32>
    %202 = math.exp %201 : vector<8x32xf32>
    %cst_65 = arith.constant 1.000000e+00 : f32
    %203 = vector.broadcast %cst_65 : f32 to vector<8x32xf32>
    %204 = arith.addf %203, %202 : vector<8x32xf32>
    %205 = arith.divf %203, %204 : vector<8x32xf32>
    %206 = vector.extract_strided_slice %199 {offsets = [0, 32], sizes = [8, 32], strides = [1, 1]} : vector<8x128xf32> to vector<8x32xf32>
    %207 = arith.negf %206 : vector<8x32xf32>
    %208 = math.exp %207 : vector<8x32xf32>
    %cst_66 = arith.constant 1.000000e+00 : f32
    %209 = vector.broadcast %cst_66 : f32 to vector<8x32xf32>
    %210 = arith.addf %209, %208 : vector<8x32xf32>
    %211 = arith.divf %209, %210 : vector<8x32xf32>
    %212 = vector.extract_strided_slice %199 {offsets = [0, 64], sizes = [8, 32], strides = [1, 1]} : vector<8x128xf32> to vector<8x32xf32>
    %213 = math.tanh %212 : vector<8x32xf32>
    %214 = vector.extract_strided_slice %199 {offsets = [0, 96], sizes = [8, 32], strides = [1, 1]} : vector<8x128xf32> to vector<8x32xf32>
    %215 = arith.negf %214 : vector<8x32xf32>
    %216 = math.exp %215 : vector<8x32xf32>
    %cst_67 = arith.constant 1.000000e+00 : f32
    %217 = vector.broadcast %cst_67 : f32 to vector<8x32xf32>
    %218 = arith.addf %217, %216 : vector<8x32xf32>
    %219 = arith.divf %217, %218 : vector<8x32xf32>
    %220 = arith.mulf %211, %148 : vector<8x32xf32>
    %221 = arith.mulf %205, %213 : vector<8x32xf32>
    %222 = arith.addf %220, %221 : vector<8x32xf32>
    %223 = math.tanh %222 : vector<8x32xf32>
    %224 = arith.mulf %219, %223 : vector<8x32xf32>
    %c1_i32_68 = arith.constant 1 : i32
    %225 = arith.addi %c2_i32, %c1_i32_68 : i32
    %226 = vector.broadcast %225 : i32 to vector<8x1xi32>
    %227 = arith.cmpi eq, %7, %226 : vector<8x1xi32>
    %228 = vector.shape_cast %227 : vector<8x1xi1> to vector<8x1xi1>
    %229 = vector.broadcast %228 : vector<8x1xi1> to vector<8x32xi1>
    %230 = arith.select %229, %224, %156 : vector<8x32xi1>, vector<8x32xf32>
    %c3_i32 = arith.constant 3 : i32
    %c8_i32_69 = arith.constant 8 : i32
    %231 = arith.muli %c3_i32, %c8_i32_69 : i32
    %232 = tpu.assume_multiple %231, 8 : i32
    %233 = arith.index_cast %232 : i32 to index
    %c0_70 = arith.constant 0 : index
    %234 = vector.load %arg22[%233, %c0_70] : memref<80x128xf32, #tpu.memory_space<vmem>>, vector<8x128xf32>
    %235 = arith.truncf %189 : vector<8x32xf32> to vector<8x32xbf16>
    %c0_71 = arith.constant 0 : index
    %c0_72 = arith.constant 0 : index
    %236 = vector.load %arg5[%c0_71, %c0_72] : memref<32x128xbf16, #tpu.memory_space<vmem>>, vector<32x128xbf16>
    %cst_73 = arith.constant dense<0.000000e+00> : vector<8x128xf32>
    %237 = tpu.matmul %235, %236, %cst_73 {dimension_numbers = #tpu.dot_dimension_numbers<[1], [0], [0], [1], [0, 0, 1, 1], [], []>} : vector<8x32xbf16>, vector<32x128xbf16>, vector<8x128xf32> -> vector<8x128xf32>
    %238 = arith.addf %234, %237 : vector<8x128xf32>
    %239 = vector.extract_strided_slice %238 {offsets = [0, 0], sizes = [8, 32], strides = [1, 1]} : vector<8x128xf32> to vector<8x32xf32>
    %240 = arith.negf %239 : vector<8x32xf32>
    %241 = math.exp %240 : vector<8x32xf32>
    %cst_74 = arith.constant 1.000000e+00 : f32
    %242 = vector.broadcast %cst_74 : f32 to vector<8x32xf32>
    %243 = arith.addf %242, %241 : vector<8x32xf32>
    %244 = arith.divf %242, %243 : vector<8x32xf32>
    %245 = vector.extract_strided_slice %238 {offsets = [0, 32], sizes = [8, 32], strides = [1, 1]} : vector<8x128xf32> to vector<8x32xf32>
    %246 = arith.negf %245 : vector<8x32xf32>
    %247 = math.exp %246 : vector<8x32xf32>
    %cst_75 = arith.constant 1.000000e+00 : f32
    %248 = vector.broadcast %cst_75 : f32 to vector<8x32xf32>
    %249 = arith.addf %248, %247 : vector<8x32xf32>
    %250 = arith.divf %248, %249 : vector<8x32xf32>
    %251 = vector.extract_strided_slice %238 {offsets = [0, 64], sizes = [8, 32], strides = [1, 1]} : vector<8x128xf32> to vector<8x32xf32>
    %252 = math.tanh %251 : vector<8x32xf32>
    %253 = vector.extract_strided_slice %238 {offsets = [0, 96], sizes = [8, 32], strides = [1, 1]} : vector<8x128xf32> to vector<8x32xf32>
    %254 = arith.negf %253 : vector<8x32xf32>
    %255 = math.exp %254 : vector<8x32xf32>
    %cst_76 = arith.constant 1.000000e+00 : f32
    %256 = vector.broadcast %cst_76 : f32 to vector<8x32xf32>
    %257 = arith.addf %256, %255 : vector<8x32xf32>
    %258 = arith.divf %256, %257 : vector<8x32xf32>
    %259 = arith.mulf %250, %187 : vector<8x32xf32>
    %260 = arith.mulf %244, %252 : vector<8x32xf32>
    %261 = arith.addf %259, %260 : vector<8x32xf32>
    %262 = math.tanh %261 : vector<8x32xf32>
    %263 = arith.mulf %258, %262 : vector<8x32xf32>
    %264 = arith.truncf %263 : vector<8x32xf32> to vector<8x32xbf16>
    %c0_77 = arith.constant 0 : index
    %c0_78 = arith.constant 0 : index
    %265 = vector.load %arg7[%c0_77, %c0_78] : memref<32x128xbf16, #tpu.memory_space<vmem>>, vector<32x128xbf16>
    %cst_79 = arith.constant dense<0.000000e+00> : vector<8x128xf32>
    %266 = tpu.matmul %264, %265, %cst_79 {dimension_numbers = #tpu.dot_dimension_numbers<[1], [0], [0], [1], [0, 0, 1, 1], [], []>} : vector<8x32xbf16>, vector<32x128xbf16>, vector<8x128xf32> -> vector<8x128xf32>
    %267 = arith.truncf %224 : vector<8x32xf32> to vector<8x32xbf16>
    %c0_80 = arith.constant 0 : index
    %c0_81 = arith.constant 0 : index
    %268 = vector.load %arg8[%c0_80, %c0_81] : memref<32x128xbf16, #tpu.memory_space<vmem>>, vector<32x128xbf16>
    %cst_82 = arith.constant dense<0.000000e+00> : vector<8x128xf32>
    %269 = tpu.matmul %267, %268, %cst_82 {dimension_numbers = #tpu.dot_dimension_numbers<[1], [0], [0], [1], [0, 0, 1, 1], [], []>} : vector<8x32xbf16>, vector<32x128xbf16>, vector<8x128xf32> -> vector<8x128xf32>
    %270 = arith.addf %266, %269 : vector<8x128xf32>
    %c0_83 = arith.constant 0 : index
    %c0_84 = arith.constant 0 : index
    %271 = vector.load %arg9[%c0_83, %c0_84] : memref<1x128xf32, #tpu.memory_space<vmem>>, vector<1x128xf32>
    %272 = vector.broadcast %271 : vector<1x128xf32> to vector<8x128xf32>
    %273 = arith.addf %270, %272 : vector<8x128xf32>
    %274 = vector.extract_strided_slice %273 {offsets = [0, 0], sizes = [8, 32], strides = [1, 1]} : vector<8x128xf32> to vector<8x32xf32>
    %275 = arith.negf %274 : vector<8x32xf32>
    %276 = math.exp %275 : vector<8x32xf32>
    %cst_85 = arith.constant 1.000000e+00 : f32
    %277 = vector.broadcast %cst_85 : f32 to vector<8x32xf32>
    %278 = arith.addf %277, %276 : vector<8x32xf32>
    %279 = arith.divf %277, %278 : vector<8x32xf32>
    %280 = vector.extract_strided_slice %273 {offsets = [0, 32], sizes = [8, 32], strides = [1, 1]} : vector<8x128xf32> to vector<8x32xf32>
    %281 = arith.negf %280 : vector<8x32xf32>
    %282 = math.exp %281 : vector<8x32xf32>
    %cst_86 = arith.constant 1.000000e+00 : f32
    %283 = vector.broadcast %cst_86 : f32 to vector<8x32xf32>
    %284 = arith.addf %283, %282 : vector<8x32xf32>
    %285 = arith.divf %283, %284 : vector<8x32xf32>
    %286 = vector.extract_strided_slice %273 {offsets = [0, 64], sizes = [8, 32], strides = [1, 1]} : vector<8x128xf32> to vector<8x32xf32>
    %287 = math.tanh %286 : vector<8x32xf32>
    %288 = vector.extract_strided_slice %273 {offsets = [0, 96], sizes = [8, 32], strides = [1, 1]} : vector<8x128xf32> to vector<8x32xf32>
    %289 = arith.negf %288 : vector<8x32xf32>
    %290 = math.exp %289 : vector<8x32xf32>
    %cst_87 = arith.constant 1.000000e+00 : f32
    %291 = vector.broadcast %cst_87 : f32 to vector<8x32xf32>
    %292 = arith.addf %291, %290 : vector<8x32xf32>
    %293 = arith.divf %291, %292 : vector<8x32xf32>
    %294 = arith.mulf %285, %222 : vector<8x32xf32>
    %295 = arith.mulf %279, %287 : vector<8x32xf32>
    %296 = arith.addf %294, %295 : vector<8x32xf32>
    %297 = math.tanh %296 : vector<8x32xf32>
    %298 = arith.mulf %293, %297 : vector<8x32xf32>
    %c1_i32_88 = arith.constant 1 : i32
    %299 = arith.addi %c3_i32, %c1_i32_88 : i32
    %300 = vector.broadcast %299 : i32 to vector<8x1xi32>
    %301 = arith.cmpi eq, %7, %300 : vector<8x1xi32>
    %302 = vector.shape_cast %301 : vector<8x1xi1> to vector<8x1xi1>
    %303 = vector.broadcast %302 : vector<8x1xi1> to vector<8x32xi1>
    %304 = arith.select %303, %298, %230 : vector<8x32xi1>, vector<8x32xf32>
    %c4_i32 = arith.constant 4 : i32
    %c8_i32_89 = arith.constant 8 : i32
    %305 = arith.muli %c4_i32, %c8_i32_89 : i32
    %306 = tpu.assume_multiple %305, 8 : i32
    %307 = arith.index_cast %306 : i32 to index
    %c0_90 = arith.constant 0 : index
    %308 = vector.load %arg22[%307, %c0_90] : memref<80x128xf32, #tpu.memory_space<vmem>>, vector<8x128xf32>
    %309 = arith.truncf %263 : vector<8x32xf32> to vector<8x32xbf16>
    %c0_91 = arith.constant 0 : index
    %c0_92 = arith.constant 0 : index
    %310 = vector.load %arg5[%c0_91, %c0_92] : memref<32x128xbf16, #tpu.memory_space<vmem>>, vector<32x128xbf16>
    %cst_93 = arith.constant dense<0.000000e+00> : vector<8x128xf32>
    %311 = tpu.matmul %309, %310, %cst_93 {dimension_numbers = #tpu.dot_dimension_numbers<[1], [0], [0], [1], [0, 0, 1, 1], [], []>} : vector<8x32xbf16>, vector<32x128xbf16>, vector<8x128xf32> -> vector<8x128xf32>
    %312 = arith.addf %308, %311 : vector<8x128xf32>
    %313 = vector.extract_strided_slice %312 {offsets = [0, 0], sizes = [8, 32], strides = [1, 1]} : vector<8x128xf32> to vector<8x32xf32>
    %314 = arith.negf %313 : vector<8x32xf32>
    %315 = math.exp %314 : vector<8x32xf32>
    %cst_94 = arith.constant 1.000000e+00 : f32
    %316 = vector.broadcast %cst_94 : f32 to vector<8x32xf32>
    %317 = arith.addf %316, %315 : vector<8x32xf32>
    %318 = arith.divf %316, %317 : vector<8x32xf32>
    %319 = vector.extract_strided_slice %312 {offsets = [0, 32], sizes = [8, 32], strides = [1, 1]} : vector<8x128xf32> to vector<8x32xf32>
    %320 = arith.negf %319 : vector<8x32xf32>
    %321 = math.exp %320 : vector<8x32xf32>
    %cst_95 = arith.constant 1.000000e+00 : f32
    %322 = vector.broadcast %cst_95 : f32 to vector<8x32xf32>
    %323 = arith.addf %322, %321 : vector<8x32xf32>
    %324 = arith.divf %322, %323 : vector<8x32xf32>
    %325 = vector.extract_strided_slice %312 {offsets = [0, 64], sizes = [8, 32], strides = [1, 1]} : vector<8x128xf32> to vector<8x32xf32>
    %326 = math.tanh %325 : vector<8x32xf32>
    %327 = vector.extract_strided_slice %312 {offsets = [0, 96], sizes = [8, 32], strides = [1, 1]} : vector<8x128xf32> to vector<8x32xf32>
    %328 = arith.negf %327 : vector<8x32xf32>
    %329 = math.exp %328 : vector<8x32xf32>
    %cst_96 = arith.constant 1.000000e+00 : f32
    %330 = vector.broadcast %cst_96 : f32 to vector<8x32xf32>
    %331 = arith.addf %330, %329 : vector<8x32xf32>
    %332 = arith.divf %330, %331 : vector<8x32xf32>
    %333 = arith.mulf %324, %261 : vector<8x32xf32>
    %334 = arith.mulf %318, %326 : vector<8x32xf32>
    %335 = arith.addf %333, %334 : vector<8x32xf32>
    %336 = math.tanh %335 : vector<8x32xf32>
    %337 = arith.mulf %332, %336 : vector<8x32xf32>
    %338 = arith.truncf %337 : vector<8x32xf32> to vector<8x32xbf16>
    %c0_97 = arith.constant 0 : index
    %c0_98 = arith.constant 0 : index
    %339 = vector.load %arg7[%c0_97, %c0_98] : memref<32x128xbf16, #tpu.memory_space<vmem>>, vector<32x128xbf16>
    %cst_99 = arith.constant dense<0.000000e+00> : vector<8x128xf32>
    %340 = tpu.matmul %338, %339, %cst_99 {dimension_numbers = #tpu.dot_dimension_numbers<[1], [0], [0], [1], [0, 0, 1, 1], [], []>} : vector<8x32xbf16>, vector<32x128xbf16>, vector<8x128xf32> -> vector<8x128xf32>
    %341 = arith.truncf %298 : vector<8x32xf32> to vector<8x32xbf16>
    %c0_100 = arith.constant 0 : index
    %c0_101 = arith.constant 0 : index
    %342 = vector.load %arg8[%c0_100, %c0_101] : memref<32x128xbf16, #tpu.memory_space<vmem>>, vector<32x128xbf16>
    %cst_102 = arith.constant dense<0.000000e+00> : vector<8x128xf32>
    %343 = tpu.matmul %341, %342, %cst_102 {dimension_numbers = #tpu.dot_dimension_numbers<[1], [0], [0], [1], [0, 0, 1, 1], [], []>} : vector<8x32xbf16>, vector<32x128xbf16>, vector<8x128xf32> -> vector<8x128xf32>
    %344 = arith.addf %340, %343 : vector<8x128xf32>
    %c0_103 = arith.constant 0 : index
    %c0_104 = arith.constant 0 : index
    %345 = vector.load %arg9[%c0_103, %c0_104] : memref<1x128xf32, #tpu.memory_space<vmem>>, vector<1x128xf32>
    %346 = vector.broadcast %345 : vector<1x128xf32> to vector<8x128xf32>
    %347 = arith.addf %344, %346 : vector<8x128xf32>
    %348 = vector.extract_strided_slice %347 {offsets = [0, 0], sizes = [8, 32], strides = [1, 1]} : vector<8x128xf32> to vector<8x32xf32>
    %349 = arith.negf %348 : vector<8x32xf32>
    %350 = math.exp %349 : vector<8x32xf32>
    %cst_105 = arith.constant 1.000000e+00 : f32
    %351 = vector.broadcast %cst_105 : f32 to vector<8x32xf32>
    %352 = arith.addf %351, %350 : vector<8x32xf32>
    %353 = arith.divf %351, %352 : vector<8x32xf32>
    %354 = vector.extract_strided_slice %347 {offsets = [0, 32], sizes = [8, 32], strides = [1, 1]} : vector<8x128xf32> to vector<8x32xf32>
    %355 = arith.negf %354 : vector<8x32xf32>
    %356 = math.exp %355 : vector<8x32xf32>
    %cst_106 = arith.constant 1.000000e+00 : f32
    %357 = vector.broadcast %cst_106 : f32 to vector<8x32xf32>
    %358 = arith.addf %357, %356 : vector<8x32xf32>
    %359 = arith.divf %357, %358 : vector<8x32xf32>
    %360 = vector.extract_strided_slice %347 {offsets = [0, 64], sizes = [8, 32], strides = [1, 1]} : vector<8x128xf32> to vector<8x32xf32>
    %361 = math.tanh %360 : vector<8x32xf32>
    %362 = vector.extract_strided_slice %347 {offsets = [0, 96], sizes = [8, 32], strides = [1, 1]} : vector<8x128xf32> to vector<8x32xf32>
    %363 = arith.negf %362 : vector<8x32xf32>
    %364 = math.exp %363 : vector<8x32xf32>
    %cst_107 = arith.constant 1.000000e+00 : f32
    %365 = vector.broadcast %cst_107 : f32 to vector<8x32xf32>
    %366 = arith.addf %365, %364 : vector<8x32xf32>
    %367 = arith.divf %365, %366 : vector<8x32xf32>
    %368 = arith.mulf %359, %296 : vector<8x32xf32>
    %369 = arith.mulf %353, %361 : vector<8x32xf32>
    %370 = arith.addf %368, %369 : vector<8x32xf32>
    %371 = math.tanh %370 : vector<8x32xf32>
    %372 = arith.mulf %367, %371 : vector<8x32xf32>
    %c1_i32_108 = arith.constant 1 : i32
    %373 = arith.addi %c4_i32, %c1_i32_108 : i32
    %374 = vector.broadcast %373 : i32 to vector<8x1xi32>
    %375 = arith.cmpi eq, %7, %374 : vector<8x1xi32>
    %376 = vector.shape_cast %375 : vector<8x1xi1> to vector<8x1xi1>
    %377 = vector.broadcast %376 : vector<8x1xi1> to vector<8x32xi1>
    %378 = arith.select %377, %372, %304 : vector<8x32xi1>, vector<8x32xf32>
    %c5_i32 = arith.constant 5 : i32
    %c8_i32_109 = arith.constant 8 : i32
    %379 = arith.muli %c5_i32, %c8_i32_109 : i32
    %380 = tpu.assume_multiple %379, 8 : i32
    %381 = arith.index_cast %380 : i32 to index
    %c0_110 = arith.constant 0 : index
    %382 = vector.load %arg22[%381, %c0_110] : memref<80x128xf32, #tpu.memory_space<vmem>>, vector<8x128xf32>
    %383 = arith.truncf %337 : vector<8x32xf32> to vector<8x32xbf16>
    %c0_111 = arith.constant 0 : index
    %c0_112 = arith.constant 0 : index
    %384 = vector.load %arg5[%c0_111, %c0_112] : memref<32x128xbf16, #tpu.memory_space<vmem>>, vector<32x128xbf16>
    %cst_113 = arith.constant dense<0.000000e+00> : vector<8x128xf32>
    %385 = tpu.matmul %383, %384, %cst_113 {dimension_numbers = #tpu.dot_dimension_numbers<[1], [0], [0], [1], [0, 0, 1, 1], [], []>} : vector<8x32xbf16>, vector<32x128xbf16>, vector<8x128xf32> -> vector<8x128xf32>
    %386 = arith.addf %382, %385 : vector<8x128xf32>
    %387 = vector.extract_strided_slice %386 {offsets = [0, 0], sizes = [8, 32], strides = [1, 1]} : vector<8x128xf32> to vector<8x32xf32>
    %388 = arith.negf %387 : vector<8x32xf32>
    %389 = math.exp %388 : vector<8x32xf32>
    %cst_114 = arith.constant 1.000000e+00 : f32
    %390 = vector.broadcast %cst_114 : f32 to vector<8x32xf32>
    %391 = arith.addf %390, %389 : vector<8x32xf32>
    %392 = arith.divf %390, %391 : vector<8x32xf32>
    %393 = vector.extract_strided_slice %386 {offsets = [0, 32], sizes = [8, 32], strides = [1, 1]} : vector<8x128xf32> to vector<8x32xf32>
    %394 = arith.negf %393 : vector<8x32xf32>
    %395 = math.exp %394 : vector<8x32xf32>
    %cst_115 = arith.constant 1.000000e+00 : f32
    %396 = vector.broadcast %cst_115 : f32 to vector<8x32xf32>
    %397 = arith.addf %396, %395 : vector<8x32xf32>
    %398 = arith.divf %396, %397 : vector<8x32xf32>
    %399 = vector.extract_strided_slice %386 {offsets = [0, 64], sizes = [8, 32], strides = [1, 1]} : vector<8x128xf32> to vector<8x32xf32>
    %400 = math.tanh %399 : vector<8x32xf32>
    %401 = vector.extract_strided_slice %386 {offsets = [0, 96], sizes = [8, 32], strides = [1, 1]} : vector<8x128xf32> to vector<8x32xf32>
    %402 = arith.negf %401 : vector<8x32xf32>
    %403 = math.exp %402 : vector<8x32xf32>
    %cst_116 = arith.constant 1.000000e+00 : f32
    %404 = vector.broadcast %cst_116 : f32 to vector<8x32xf32>
    %405 = arith.addf %404, %403 : vector<8x32xf32>
    %406 = arith.divf %404, %405 : vector<8x32xf32>
    %407 = arith.mulf %398, %335 : vector<8x32xf32>
    %408 = arith.mulf %392, %400 : vector<8x32xf32>
    %409 = arith.addf %407, %408 : vector<8x32xf32>
    %410 = math.tanh %409 : vector<8x32xf32>
    %411 = arith.mulf %406, %410 : vector<8x32xf32>
    %412 = arith.truncf %411 : vector<8x32xf32> to vector<8x32xbf16>
    %c0_117 = arith.constant 0 : index
    %c0_118 = arith.constant 0 : index
    %413 = vector.load %arg7[%c0_117, %c0_118] : memref<32x128xbf16, #tpu.memory_space<vmem>>, vector<32x128xbf16>
    %cst_119 = arith.constant dense<0.000000e+00> : vector<8x128xf32>
    %414 = tpu.matmul %412, %413, %cst_119 {dimension_numbers = #tpu.dot_dimension_numbers<[1], [0], [0], [1], [0, 0, 1, 1], [], []>} : vector<8x32xbf16>, vector<32x128xbf16>, vector<8x128xf32> -> vector<8x128xf32>
    %415 = arith.truncf %372 : vector<8x32xf32> to vector<8x32xbf16>
    %c0_120 = arith.constant 0 : index
    %c0_121 = arith.constant 0 : index
    %416 = vector.load %arg8[%c0_120, %c0_121] : memref<32x128xbf16, #tpu.memory_space<vmem>>, vector<32x128xbf16>
    %cst_122 = arith.constant dense<0.000000e+00> : vector<8x128xf32>
    %417 = tpu.matmul %415, %416, %cst_122 {dimension_numbers = #tpu.dot_dimension_numbers<[1], [0], [0], [1], [0, 0, 1, 1], [], []>} : vector<8x32xbf16>, vector<32x128xbf16>, vector<8x128xf32> -> vector<8x128xf32>
    %418 = arith.addf %414, %417 : vector<8x128xf32>
    %c0_123 = arith.constant 0 : index
    %c0_124 = arith.constant 0 : index
    %419 = vector.load %arg9[%c0_123, %c0_124] : memref<1x128xf32, #tpu.memory_space<vmem>>, vector<1x128xf32>
    %420 = vector.broadcast %419 : vector<1x128xf32> to vector<8x128xf32>
    %421 = arith.addf %418, %420 : vector<8x128xf32>
    %422 = vector.extract_strided_slice %421 {offsets = [0, 0], sizes = [8, 32], strides = [1, 1]} : vector<8x128xf32> to vector<8x32xf32>
    %423 = arith.negf %422 : vector<8x32xf32>
    %424 = math.exp %423 : vector<8x32xf32>
    %cst_125 = arith.constant 1.000000e+00 : f32
    %425 = vector.broadcast %cst_125 : f32 to vector<8x32xf32>
    %426 = arith.addf %425, %424 : vector<8x32xf32>
    %427 = arith.divf %425, %426 : vector<8x32xf32>
    %428 = vector.extract_strided_slice %421 {offsets = [0, 32], sizes = [8, 32], strides = [1, 1]} : vector<8x128xf32> to vector<8x32xf32>
    %429 = arith.negf %428 : vector<8x32xf32>
    %430 = math.exp %429 : vector<8x32xf32>
    %cst_126 = arith.constant 1.000000e+00 : f32
    %431 = vector.broadcast %cst_126 : f32 to vector<8x32xf32>
    %432 = arith.addf %431, %430 : vector<8x32xf32>
    %433 = arith.divf %431, %432 : vector<8x32xf32>
    %434 = vector.extract_strided_slice %421 {offsets = [0, 64], sizes = [8, 32], strides = [1, 1]} : vector<8x128xf32> to vector<8x32xf32>
    %435 = math.tanh %434 : vector<8x32xf32>
    %436 = vector.extract_strided_slice %421 {offsets = [0, 96], sizes = [8, 32], strides = [1, 1]} : vector<8x128xf32> to vector<8x32xf32>
    %437 = arith.negf %436 : vector<8x32xf32>
    %438 = math.exp %437 : vector<8x32xf32>
    %cst_127 = arith.constant 1.000000e+00 : f32
    %439 = vector.broadcast %cst_127 : f32 to vector<8x32xf32>
    %440 = arith.addf %439, %438 : vector<8x32xf32>
    %441 = arith.divf %439, %440 : vector<8x32xf32>
    %442 = arith.mulf %433, %370 : vector<8x32xf32>
    %443 = arith.mulf %427, %435 : vector<8x32xf32>
    %444 = arith.addf %442, %443 : vector<8x32xf32>
    %445 = math.tanh %444 : vector<8x32xf32>
    %446 = arith.mulf %441, %445 : vector<8x32xf32>
    %c1_i32_128 = arith.constant 1 : i32
    %447 = arith.addi %c5_i32, %c1_i32_128 : i32
    %448 = vector.broadcast %447 : i32 to vector<8x1xi32>
    %449 = arith.cmpi eq, %7, %448 : vector<8x1xi32>
    %450 = vector.shape_cast %449 : vector<8x1xi1> to vector<8x1xi1>
    %451 = vector.broadcast %450 : vector<8x1xi1> to vector<8x32xi1>
    %452 = arith.select %451, %446, %378 : vector<8x32xi1>, vector<8x32xf32>
    %c6_i32 = arith.constant 6 : i32
    %c8_i32_129 = arith.constant 8 : i32
    %453 = arith.muli %c6_i32, %c8_i32_129 : i32
    %454 = tpu.assume_multiple %453, 8 : i32
    %455 = arith.index_cast %454 : i32 to index
    %c0_130 = arith.constant 0 : index
    %456 = vector.load %arg22[%455, %c0_130] : memref<80x128xf32, #tpu.memory_space<vmem>>, vector<8x128xf32>
    %457 = arith.truncf %411 : vector<8x32xf32> to vector<8x32xbf16>
    %c0_131 = arith.constant 0 : index
    %c0_132 = arith.constant 0 : index
    %458 = vector.load %arg5[%c0_131, %c0_132] : memref<32x128xbf16, #tpu.memory_space<vmem>>, vector<32x128xbf16>
    %cst_133 = arith.constant dense<0.000000e+00> : vector<8x128xf32>
    %459 = tpu.matmul %457, %458, %cst_133 {dimension_numbers = #tpu.dot_dimension_numbers<[1], [0], [0], [1], [0, 0, 1, 1], [], []>} : vector<8x32xbf16>, vector<32x128xbf16>, vector<8x128xf32> -> vector<8x128xf32>
    %460 = arith.addf %456, %459 : vector<8x128xf32>
    %461 = vector.extract_strided_slice %460 {offsets = [0, 0], sizes = [8, 32], strides = [1, 1]} : vector<8x128xf32> to vector<8x32xf32>
    %462 = arith.negf %461 : vector<8x32xf32>
    %463 = math.exp %462 : vector<8x32xf32>
    %cst_134 = arith.constant 1.000000e+00 : f32
    %464 = vector.broadcast %cst_134 : f32 to vector<8x32xf32>
    %465 = arith.addf %464, %463 : vector<8x32xf32>
    %466 = arith.divf %464, %465 : vector<8x32xf32>
    %467 = vector.extract_strided_slice %460 {offsets = [0, 32], sizes = [8, 32], strides = [1, 1]} : vector<8x128xf32> to vector<8x32xf32>
    %468 = arith.negf %467 : vector<8x32xf32>
    %469 = math.exp %468 : vector<8x32xf32>
    %cst_135 = arith.constant 1.000000e+00 : f32
    %470 = vector.broadcast %cst_135 : f32 to vector<8x32xf32>
    %471 = arith.addf %470, %469 : vector<8x32xf32>
    %472 = arith.divf %470, %471 : vector<8x32xf32>
    %473 = vector.extract_strided_slice %460 {offsets = [0, 64], sizes = [8, 32], strides = [1, 1]} : vector<8x128xf32> to vector<8x32xf32>
    %474 = math.tanh %473 : vector<8x32xf32>
    %475 = vector.extract_strided_slice %460 {offsets = [0, 96], sizes = [8, 32], strides = [1, 1]} : vector<8x128xf32> to vector<8x32xf32>
    %476 = arith.negf %475 : vector<8x32xf32>
    %477 = math.exp %476 : vector<8x32xf32>
    %cst_136 = arith.constant 1.000000e+00 : f32
    %478 = vector.broadcast %cst_136 : f32 to vector<8x32xf32>
    %479 = arith.addf %478, %477 : vector<8x32xf32>
    %480 = arith.divf %478, %479 : vector<8x32xf32>
    %481 = arith.mulf %472, %409 : vector<8x32xf32>
    %482 = arith.mulf %466, %474 : vector<8x32xf32>
    %483 = arith.addf %481, %482 : vector<8x32xf32>
    %484 = math.tanh %483 : vector<8x32xf32>
    %485 = arith.mulf %480, %484 : vector<8x32xf32>
    %486 = arith.truncf %485 : vector<8x32xf32> to vector<8x32xbf16>
    %c0_137 = arith.constant 0 : index
    %c0_138 = arith.constant 0 : index
    %487 = vector.load %arg7[%c0_137, %c0_138] : memref<32x128xbf16, #tpu.memory_space<vmem>>, vector<32x128xbf16>
    %cst_139 = arith.constant dense<0.000000e+00> : vector<8x128xf32>
    %488 = tpu.matmul %486, %487, %cst_139 {dimension_numbers = #tpu.dot_dimension_numbers<[1], [0], [0], [1], [0, 0, 1, 1], [], []>} : vector<8x32xbf16>, vector<32x128xbf16>, vector<8x128xf32> -> vector<8x128xf32>
    %489 = arith.truncf %446 : vector<8x32xf32> to vector<8x32xbf16>
    %c0_140 = arith.constant 0 : index
    %c0_141 = arith.constant 0 : index
    %490 = vector.load %arg8[%c0_140, %c0_141] : memref<32x128xbf16, #tpu.memory_space<vmem>>, vector<32x128xbf16>
    %cst_142 = arith.constant dense<0.000000e+00> : vector<8x128xf32>
    %491 = tpu.matmul %489, %490, %cst_142 {dimension_numbers = #tpu.dot_dimension_numbers<[1], [0], [0], [1], [0, 0, 1, 1], [], []>} : vector<8x32xbf16>, vector<32x128xbf16>, vector<8x128xf32> -> vector<8x128xf32>
    %492 = arith.addf %488, %491 : vector<8x128xf32>
    %c0_143 = arith.constant 0 : index
    %c0_144 = arith.constant 0 : index
    %493 = vector.load %arg9[%c0_143, %c0_144] : memref<1x128xf32, #tpu.memory_space<vmem>>, vector<1x128xf32>
    %494 = vector.broadcast %493 : vector<1x128xf32> to vector<8x128xf32>
    %495 = arith.addf %492, %494 : vector<8x128xf32>
    %496 = vector.extract_strided_slice %495 {offsets = [0, 0], sizes = [8, 32], strides = [1, 1]} : vector<8x128xf32> to vector<8x32xf32>
    %497 = arith.negf %496 : vector<8x32xf32>
    %498 = math.exp %497 : vector<8x32xf32>
    %cst_145 = arith.constant 1.000000e+00 : f32
    %499 = vector.broadcast %cst_145 : f32 to vector<8x32xf32>
    %500 = arith.addf %499, %498 : vector<8x32xf32>
    %501 = arith.divf %499, %500 : vector<8x32xf32>
    %502 = vector.extract_strided_slice %495 {offsets = [0, 32], sizes = [8, 32], strides = [1, 1]} : vector<8x128xf32> to vector<8x32xf32>
    %503 = arith.negf %502 : vector<8x32xf32>
    %504 = math.exp %503 : vector<8x32xf32>
    %cst_146 = arith.constant 1.000000e+00 : f32
    %505 = vector.broadcast %cst_146 : f32 to vector<8x32xf32>
    %506 = arith.addf %505, %504 : vector<8x32xf32>
    %507 = arith.divf %505, %506 : vector<8x32xf32>
    %508 = vector.extract_strided_slice %495 {offsets = [0, 64], sizes = [8, 32], strides = [1, 1]} : vector<8x128xf32> to vector<8x32xf32>
    %509 = math.tanh %508 : vector<8x32xf32>
    %510 = vector.extract_strided_slice %495 {offsets = [0, 96], sizes = [8, 32], strides = [1, 1]} : vector<8x128xf32> to vector<8x32xf32>
    %511 = arith.negf %510 : vector<8x32xf32>
    %512 = math.exp %511 : vector<8x32xf32>
    %cst_147 = arith.constant 1.000000e+00 : f32
    %513 = vector.broadcast %cst_147 : f32 to vector<8x32xf32>
    %514 = arith.addf %513, %512 : vector<8x32xf32>
    %515 = arith.divf %513, %514 : vector<8x32xf32>
    %516 = arith.mulf %507, %444 : vector<8x32xf32>
    %517 = arith.mulf %501, %509 : vector<8x32xf32>
    %518 = arith.addf %516, %517 : vector<8x32xf32>
    %519 = math.tanh %518 : vector<8x32xf32>
    %520 = arith.mulf %515, %519 : vector<8x32xf32>
    %c1_i32_148 = arith.constant 1 : i32
    %521 = arith.addi %c6_i32, %c1_i32_148 : i32
    %522 = vector.broadcast %521 : i32 to vector<8x1xi32>
    %523 = arith.cmpi eq, %7, %522 : vector<8x1xi32>
    %524 = vector.shape_cast %523 : vector<8x1xi1> to vector<8x1xi1>
    %525 = vector.broadcast %524 : vector<8x1xi1> to vector<8x32xi1>
    %526 = arith.select %525, %520, %452 : vector<8x32xi1>, vector<8x32xf32>
    %c7_i32 = arith.constant 7 : i32
    %c8_i32_149 = arith.constant 8 : i32
    %527 = arith.muli %c7_i32, %c8_i32_149 : i32
    %528 = tpu.assume_multiple %527, 8 : i32
    %529 = arith.index_cast %528 : i32 to index
    %c0_150 = arith.constant 0 : index
    %530 = vector.load %arg22[%529, %c0_150] : memref<80x128xf32, #tpu.memory_space<vmem>>, vector<8x128xf32>
    %531 = arith.truncf %485 : vector<8x32xf32> to vector<8x32xbf16>
    %c0_151 = arith.constant 0 : index
    %c0_152 = arith.constant 0 : index
    %532 = vector.load %arg5[%c0_151, %c0_152] : memref<32x128xbf16, #tpu.memory_space<vmem>>, vector<32x128xbf16>
    %cst_153 = arith.constant dense<0.000000e+00> : vector<8x128xf32>
    %533 = tpu.matmul %531, %532, %cst_153 {dimension_numbers = #tpu.dot_dimension_numbers<[1], [0], [0], [1], [0, 0, 1, 1], [], []>} : vector<8x32xbf16>, vector<32x128xbf16>, vector<8x128xf32> -> vector<8x128xf32>
    %534 = arith.addf %530, %533 : vector<8x128xf32>
    %535 = vector.extract_strided_slice %534 {offsets = [0, 0], sizes = [8, 32], strides = [1, 1]} : vector<8x128xf32> to vector<8x32xf32>
    %536 = arith.negf %535 : vector<8x32xf32>
    %537 = math.exp %536 : vector<8x32xf32>
    %cst_154 = arith.constant 1.000000e+00 : f32
    %538 = vector.broadcast %cst_154 : f32 to vector<8x32xf32>
    %539 = arith.addf %538, %537 : vector<8x32xf32>
    %540 = arith.divf %538, %539 : vector<8x32xf32>
    %541 = vector.extract_strided_slice %534 {offsets = [0, 32], sizes = [8, 32], strides = [1, 1]} : vector<8x128xf32> to vector<8x32xf32>
    %542 = arith.negf %541 : vector<8x32xf32>
    %543 = math.exp %542 : vector<8x32xf32>
    %cst_155 = arith.constant 1.000000e+00 : f32
    %544 = vector.broadcast %cst_155 : f32 to vector<8x32xf32>
    %545 = arith.addf %544, %543 : vector<8x32xf32>
    %546 = arith.divf %544, %545 : vector<8x32xf32>
    %547 = vector.extract_strided_slice %534 {offsets = [0, 64], sizes = [8, 32], strides = [1, 1]} : vector<8x128xf32> to vector<8x32xf32>
    %548 = math.tanh %547 : vector<8x32xf32>
    %549 = vector.extract_strided_slice %534 {offsets = [0, 96], sizes = [8, 32], strides = [1, 1]} : vector<8x128xf32> to vector<8x32xf32>
    %550 = arith.negf %549 : vector<8x32xf32>
    %551 = math.exp %550 : vector<8x32xf32>
    %cst_156 = arith.constant 1.000000e+00 : f32
    %552 = vector.broadcast %cst_156 : f32 to vector<8x32xf32>
    %553 = arith.addf %552, %551 : vector<8x32xf32>
    %554 = arith.divf %552, %553 : vector<8x32xf32>
    %555 = arith.mulf %546, %483 : vector<8x32xf32>
    %556 = arith.mulf %540, %548 : vector<8x32xf32>
    %557 = arith.addf %555, %556 : vector<8x32xf32>
    %558 = math.tanh %557 : vector<8x32xf32>
    %559 = arith.mulf %554, %558 : vector<8x32xf32>
    %560 = arith.truncf %559 : vector<8x32xf32> to vector<8x32xbf16>
    %c0_157 = arith.constant 0 : index
    %c0_158 = arith.constant 0 : index
    %561 = vector.load %arg7[%c0_157, %c0_158] : memref<32x128xbf16, #tpu.memory_space<vmem>>, vector<32x128xbf16>
    %cst_159 = arith.constant dense<0.000000e+00> : vector<8x128xf32>
    %562 = tpu.matmul %560, %561, %cst_159 {dimension_numbers = #tpu.dot_dimension_numbers<[1], [0], [0], [1], [0, 0, 1, 1], [], []>} : vector<8x32xbf16>, vector<32x128xbf16>, vector<8x128xf32> -> vector<8x128xf32>
    %563 = arith.truncf %520 : vector<8x32xf32> to vector<8x32xbf16>
    %c0_160 = arith.constant 0 : index
    %c0_161 = arith.constant 0 : index
    %564 = vector.load %arg8[%c0_160, %c0_161] : memref<32x128xbf16, #tpu.memory_space<vmem>>, vector<32x128xbf16>
    %cst_162 = arith.constant dense<0.000000e+00> : vector<8x128xf32>
    %565 = tpu.matmul %563, %564, %cst_162 {dimension_numbers = #tpu.dot_dimension_numbers<[1], [0], [0], [1], [0, 0, 1, 1], [], []>} : vector<8x32xbf16>, vector<32x128xbf16>, vector<8x128xf32> -> vector<8x128xf32>
    %566 = arith.addf %562, %565 : vector<8x128xf32>
    %c0_163 = arith.constant 0 : index
    %c0_164 = arith.constant 0 : index
    %567 = vector.load %arg9[%c0_163, %c0_164] : memref<1x128xf32, #tpu.memory_space<vmem>>, vector<1x128xf32>
    %568 = vector.broadcast %567 : vector<1x128xf32> to vector<8x128xf32>
    %569 = arith.addf %566, %568 : vector<8x128xf32>
    %570 = vector.extract_strided_slice %569 {offsets = [0, 0], sizes = [8, 32], strides = [1, 1]} : vector<8x128xf32> to vector<8x32xf32>
    %571 = arith.negf %570 : vector<8x32xf32>
    %572 = math.exp %571 : vector<8x32xf32>
    %cst_165 = arith.constant 1.000000e+00 : f32
    %573 = vector.broadcast %cst_165 : f32 to vector<8x32xf32>
    %574 = arith.addf %573, %572 : vector<8x32xf32>
    %575 = arith.divf %573, %574 : vector<8x32xf32>
    %576 = vector.extract_strided_slice %569 {offsets = [0, 32], sizes = [8, 32], strides = [1, 1]} : vector<8x128xf32> to vector<8x32xf32>
    %577 = arith.negf %576 : vector<8x32xf32>
    %578 = math.exp %577 : vector<8x32xf32>
    %cst_166 = arith.constant 1.000000e+00 : f32
    %579 = vector.broadcast %cst_166 : f32 to vector<8x32xf32>
    %580 = arith.addf %579, %578 : vector<8x32xf32>
    %581 = arith.divf %579, %580 : vector<8x32xf32>
    %582 = vector.extract_strided_slice %569 {offsets = [0, 64], sizes = [8, 32], strides = [1, 1]} : vector<8x128xf32> to vector<8x32xf32>
    %583 = math.tanh %582 : vector<8x32xf32>
    %584 = vector.extract_strided_slice %569 {offsets = [0, 96], sizes = [8, 32], strides = [1, 1]} : vector<8x128xf32> to vector<8x32xf32>
    %585 = arith.negf %584 : vector<8x32xf32>
    %586 = math.exp %585 : vector<8x32xf32>
    %cst_167 = arith.constant 1.000000e+00 : f32
    %587 = vector.broadcast %cst_167 : f32 to vector<8x32xf32>
    %588 = arith.addf %587, %586 : vector<8x32xf32>
    %589 = arith.divf %587, %588 : vector<8x32xf32>
    %590 = arith.mulf %581, %518 : vector<8x32xf32>
    %591 = arith.mulf %575, %583 : vector<8x32xf32>
    %592 = arith.addf %590, %591 : vector<8x32xf32>
    %593 = math.tanh %592 : vector<8x32xf32>
    %594 = arith.mulf %589, %593 : vector<8x32xf32>
    %c1_i32_168 = arith.constant 1 : i32
    %595 = arith.addi %c7_i32, %c1_i32_168 : i32
    %596 = vector.broadcast %595 : i32 to vector<8x1xi32>
    %597 = arith.cmpi eq, %7, %596 : vector<8x1xi32>
    %598 = vector.shape_cast %597 : vector<8x1xi1> to vector<8x1xi1>
    %599 = vector.broadcast %598 : vector<8x1xi1> to vector<8x32xi1>
    %600 = arith.select %599, %594, %526 : vector<8x32xi1>, vector<8x32xf32>
    %c8_i32_169 = arith.constant 8 : i32
    %c8_i32_170 = arith.constant 8 : i32
    %601 = arith.muli %c8_i32_169, %c8_i32_170 : i32
    %602 = tpu.assume_multiple %601, 8 : i32
    %603 = arith.index_cast %602 : i32 to index
    %c0_171 = arith.constant 0 : index
    %604 = vector.load %arg22[%603, %c0_171] : memref<80x128xf32, #tpu.memory_space<vmem>>, vector<8x128xf32>
    %605 = arith.truncf %559 : vector<8x32xf32> to vector<8x32xbf16>
    %c0_172 = arith.constant 0 : index
    %c0_173 = arith.constant 0 : index
    %606 = vector.load %arg5[%c0_172, %c0_173] : memref<32x128xbf16, #tpu.memory_space<vmem>>, vector<32x128xbf16>
    %cst_174 = arith.constant dense<0.000000e+00> : vector<8x128xf32>
    %607 = tpu.matmul %605, %606, %cst_174 {dimension_numbers = #tpu.dot_dimension_numbers<[1], [0], [0], [1], [0, 0, 1, 1], [], []>} : vector<8x32xbf16>, vector<32x128xbf16>, vector<8x128xf32> -> vector<8x128xf32>
    %608 = arith.addf %604, %607 : vector<8x128xf32>
    %609 = vector.extract_strided_slice %608 {offsets = [0, 0], sizes = [8, 32], strides = [1, 1]} : vector<8x128xf32> to vector<8x32xf32>
    %610 = arith.negf %609 : vector<8x32xf32>
    %611 = math.exp %610 : vector<8x32xf32>
    %cst_175 = arith.constant 1.000000e+00 : f32
    %612 = vector.broadcast %cst_175 : f32 to vector<8x32xf32>
    %613 = arith.addf %612, %611 : vector<8x32xf32>
    %614 = arith.divf %612, %613 : vector<8x32xf32>
    %615 = vector.extract_strided_slice %608 {offsets = [0, 32], sizes = [8, 32], strides = [1, 1]} : vector<8x128xf32> to vector<8x32xf32>
    %616 = arith.negf %615 : vector<8x32xf32>
    %617 = math.exp %616 : vector<8x32xf32>
    %cst_176 = arith.constant 1.000000e+00 : f32
    %618 = vector.broadcast %cst_176 : f32 to vector<8x32xf32>
    %619 = arith.addf %618, %617 : vector<8x32xf32>
    %620 = arith.divf %618, %619 : vector<8x32xf32>
    %621 = vector.extract_strided_slice %608 {offsets = [0, 64], sizes = [8, 32], strides = [1, 1]} : vector<8x128xf32> to vector<8x32xf32>
    %622 = math.tanh %621 : vector<8x32xf32>
    %623 = vector.extract_strided_slice %608 {offsets = [0, 96], sizes = [8, 32], strides = [1, 1]} : vector<8x128xf32> to vector<8x32xf32>
    %624 = arith.negf %623 : vector<8x32xf32>
    %625 = math.exp %624 : vector<8x32xf32>
    %cst_177 = arith.constant 1.000000e+00 : f32
    %626 = vector.broadcast %cst_177 : f32 to vector<8x32xf32>
    %627 = arith.addf %626, %625 : vector<8x32xf32>
    %628 = arith.divf %626, %627 : vector<8x32xf32>
    %629 = arith.mulf %620, %557 : vector<8x32xf32>
    %630 = arith.mulf %614, %622 : vector<8x32xf32>
    %631 = arith.addf %629, %630 : vector<8x32xf32>
    %632 = math.tanh %631 : vector<8x32xf32>
    %633 = arith.mulf %628, %632 : vector<8x32xf32>
    %634 = arith.truncf %633 : vector<8x32xf32> to vector<8x32xbf16>
    %c0_178 = arith.constant 0 : index
    %c0_179 = arith.constant 0 : index
    %635 = vector.load %arg7[%c0_178, %c0_179] : memref<32x128xbf16, #tpu.memory_space<vmem>>, vector<32x128xbf16>
    %cst_180 = arith.constant dense<0.000000e+00> : vector<8x128xf32>
    %636 = tpu.matmul %634, %635, %cst_180 {dimension_numbers = #tpu.dot_dimension_numbers<[1], [0], [0], [1], [0, 0, 1, 1], [], []>} : vector<8x32xbf16>, vector<32x128xbf16>, vector<8x128xf32> -> vector<8x128xf32>
    %637 = arith.truncf %594 : vector<8x32xf32> to vector<8x32xbf16>
    %c0_181 = arith.constant 0 : index
    %c0_182 = arith.constant 0 : index
    %638 = vector.load %arg8[%c0_181, %c0_182] : memref<32x128xbf16, #tpu.memory_space<vmem>>, vector<32x128xbf16>
    %cst_183 = arith.constant dense<0.000000e+00> : vector<8x128xf32>
    %639 = tpu.matmul %637, %638, %cst_183 {dimension_numbers = #tpu.dot_dimension_numbers<[1], [0], [0], [1], [0, 0, 1, 1], [], []>} : vector<8x32xbf16>, vector<32x128xbf16>, vector<8x128xf32> -> vector<8x128xf32>
    %640 = arith.addf %636, %639 : vector<8x128xf32>
    %c0_184 = arith.constant 0 : index
    %c0_185 = arith.constant 0 : index
    %641 = vector.load %arg9[%c0_184, %c0_185] : memref<1x128xf32, #tpu.memory_space<vmem>>, vector<1x128xf32>
    %642 = vector.broadcast %641 : vector<1x128xf32> to vector<8x128xf32>
    %643 = arith.addf %640, %642 : vector<8x128xf32>
    %644 = vector.extract_strided_slice %643 {offsets = [0, 0], sizes = [8, 32], strides = [1, 1]} : vector<8x128xf32> to vector<8x32xf32>
    %645 = arith.negf %644 : vector<8x32xf32>
    %646 = math.exp %645 : vector<8x32xf32>
    %cst_186 = arith.constant 1.000000e+00 : f32
    %647 = vector.broadcast %cst_186 : f32 to vector<8x32xf32>
    %648 = arith.addf %647, %646 : vector<8x32xf32>
    %649 = arith.divf %647, %648 : vector<8x32xf32>
    %650 = vector.extract_strided_slice %643 {offsets = [0, 32], sizes = [8, 32], strides = [1, 1]} : vector<8x128xf32> to vector<8x32xf32>
    %651 = arith.negf %650 : vector<8x32xf32>
    %652 = math.exp %651 : vector<8x32xf32>
    %cst_187 = arith.constant 1.000000e+00 : f32
    %653 = vector.broadcast %cst_187 : f32 to vector<8x32xf32>
    %654 = arith.addf %653, %652 : vector<8x32xf32>
    %655 = arith.divf %653, %654 : vector<8x32xf32>
    %656 = vector.extract_strided_slice %643 {offsets = [0, 64], sizes = [8, 32], strides = [1, 1]} : vector<8x128xf32> to vector<8x32xf32>
    %657 = math.tanh %656 : vector<8x32xf32>
    %658 = vector.extract_strided_slice %643 {offsets = [0, 96], sizes = [8, 32], strides = [1, 1]} : vector<8x128xf32> to vector<8x32xf32>
    %659 = arith.negf %658 : vector<8x32xf32>
    %660 = math.exp %659 : vector<8x32xf32>
    %cst_188 = arith.constant 1.000000e+00 : f32
    %661 = vector.broadcast %cst_188 : f32 to vector<8x32xf32>
    %662 = arith.addf %661, %660 : vector<8x32xf32>
    %663 = arith.divf %661, %662 : vector<8x32xf32>
    %664 = arith.mulf %655, %592 : vector<8x32xf32>
    %665 = arith.mulf %649, %657 : vector<8x32xf32>
    %666 = arith.addf %664, %665 : vector<8x32xf32>
    %667 = math.tanh %666 : vector<8x32xf32>
    %668 = arith.mulf %663, %667 : vector<8x32xf32>
    %c1_i32_189 = arith.constant 1 : i32
    %669 = arith.addi %c8_i32_169, %c1_i32_189 : i32
    %670 = vector.broadcast %669 : i32 to vector<8x1xi32>
    %671 = arith.cmpi eq, %7, %670 : vector<8x1xi32>
    %672 = vector.shape_cast %671 : vector<8x1xi1> to vector<8x1xi1>
    %673 = vector.broadcast %672 : vector<8x1xi1> to vector<8x32xi1>
    %674 = arith.select %673, %668, %600 : vector<8x32xi1>, vector<8x32xf32>
    %c9_i32 = arith.constant 9 : i32
    %c8_i32_190 = arith.constant 8 : i32
    %675 = arith.muli %c9_i32, %c8_i32_190 : i32
    %676 = tpu.assume_multiple %675, 8 : i32
    %677 = arith.index_cast %676 : i32 to index
    %c0_191 = arith.constant 0 : index
    %678 = vector.load %arg22[%677, %c0_191] : memref<80x128xf32, #tpu.memory_space<vmem>>, vector<8x128xf32>
    %679 = arith.truncf %633 : vector<8x32xf32> to vector<8x32xbf16>
    %c0_192 = arith.constant 0 : index
    %c0_193 = arith.constant 0 : index
    %680 = vector.load %arg5[%c0_192, %c0_193] : memref<32x128xbf16, #tpu.memory_space<vmem>>, vector<32x128xbf16>
    %cst_194 = arith.constant dense<0.000000e+00> : vector<8x128xf32>
    %681 = tpu.matmul %679, %680, %cst_194 {dimension_numbers = #tpu.dot_dimension_numbers<[1], [0], [0], [1], [0, 0, 1, 1], [], []>} : vector<8x32xbf16>, vector<32x128xbf16>, vector<8x128xf32> -> vector<8x128xf32>
    %682 = arith.addf %678, %681 : vector<8x128xf32>
    %683 = vector.extract_strided_slice %682 {offsets = [0, 0], sizes = [8, 32], strides = [1, 1]} : vector<8x128xf32> to vector<8x32xf32>
    %684 = arith.negf %683 : vector<8x32xf32>
    %685 = math.exp %684 : vector<8x32xf32>
    %cst_195 = arith.constant 1.000000e+00 : f32
    %686 = vector.broadcast %cst_195 : f32 to vector<8x32xf32>
    %687 = arith.addf %686, %685 : vector<8x32xf32>
    %688 = arith.divf %686, %687 : vector<8x32xf32>
    %689 = vector.extract_strided_slice %682 {offsets = [0, 32], sizes = [8, 32], strides = [1, 1]} : vector<8x128xf32> to vector<8x32xf32>
    %690 = arith.negf %689 : vector<8x32xf32>
    %691 = math.exp %690 : vector<8x32xf32>
    %cst_196 = arith.constant 1.000000e+00 : f32
    %692 = vector.broadcast %cst_196 : f32 to vector<8x32xf32>
    %693 = arith.addf %692, %691 : vector<8x32xf32>
    %694 = arith.divf %692, %693 : vector<8x32xf32>
    %695 = vector.extract_strided_slice %682 {offsets = [0, 64], sizes = [8, 32], strides = [1, 1]} : vector<8x128xf32> to vector<8x32xf32>
    %696 = math.tanh %695 : vector<8x32xf32>
    %697 = vector.extract_strided_slice %682 {offsets = [0, 96], sizes = [8, 32], strides = [1, 1]} : vector<8x128xf32> to vector<8x32xf32>
    %698 = arith.negf %697 : vector<8x32xf32>
    %699 = math.exp %698 : vector<8x32xf32>
    %cst_197 = arith.constant 1.000000e+00 : f32
    %700 = vector.broadcast %cst_197 : f32 to vector<8x32xf32>
    %701 = arith.addf %700, %699 : vector<8x32xf32>
    %702 = arith.divf %700, %701 : vector<8x32xf32>
    %703 = arith.mulf %694, %631 : vector<8x32xf32>
    %704 = arith.mulf %688, %696 : vector<8x32xf32>
    %705 = arith.addf %703, %704 : vector<8x32xf32>
    %706 = math.tanh %705 : vector<8x32xf32>
    %707 = arith.mulf %702, %706 : vector<8x32xf32>
    %708 = arith.truncf %707 : vector<8x32xf32> to vector<8x32xbf16>
    %c0_198 = arith.constant 0 : index
    %c0_199 = arith.constant 0 : index
    %709 = vector.load %arg7[%c0_198, %c0_199] : memref<32x128xbf16, #tpu.memory_space<vmem>>, vector<32x128xbf16>
    %cst_200 = arith.constant dense<0.000000e+00> : vector<8x128xf32>
    %710 = tpu.matmul %708, %709, %cst_200 {dimension_numbers = #tpu.dot_dimension_numbers<[1], [0], [0], [1], [0, 0, 1, 1], [], []>} : vector<8x32xbf16>, vector<32x128xbf16>, vector<8x128xf32> -> vector<8x128xf32>
    %711 = arith.truncf %668 : vector<8x32xf32> to vector<8x32xbf16>
    %c0_201 = arith.constant 0 : index
    %c0_202 = arith.constant 0 : index
    %712 = vector.load %arg8[%c0_201, %c0_202] : memref<32x128xbf16, #tpu.memory_space<vmem>>, vector<32x128xbf16>
    %cst_203 = arith.constant dense<0.000000e+00> : vector<8x128xf32>
    %713 = tpu.matmul %711, %712, %cst_203 {dimension_numbers = #tpu.dot_dimension_numbers<[1], [0], [0], [1], [0, 0, 1, 1], [], []>} : vector<8x32xbf16>, vector<32x128xbf16>, vector<8x128xf32> -> vector<8x128xf32>
    %714 = arith.addf %710, %713 : vector<8x128xf32>
    %c0_204 = arith.constant 0 : index
    %c0_205 = arith.constant 0 : index
    %715 = vector.load %arg9[%c0_204, %c0_205] : memref<1x128xf32, #tpu.memory_space<vmem>>, vector<1x128xf32>
    %716 = vector.broadcast %715 : vector<1x128xf32> to vector<8x128xf32>
    %717 = arith.addf %714, %716 : vector<8x128xf32>
    %718 = vector.extract_strided_slice %717 {offsets = [0, 0], sizes = [8, 32], strides = [1, 1]} : vector<8x128xf32> to vector<8x32xf32>
    %719 = arith.negf %718 : vector<8x32xf32>
    %720 = math.exp %719 : vector<8x32xf32>
    %cst_206 = arith.constant 1.000000e+00 : f32
    %721 = vector.broadcast %cst_206 : f32 to vector<8x32xf32>
    %722 = arith.addf %721, %720 : vector<8x32xf32>
    %723 = arith.divf %721, %722 : vector<8x32xf32>
    %724 = vector.extract_strided_slice %717 {offsets = [0, 32], sizes = [8, 32], strides = [1, 1]} : vector<8x128xf32> to vector<8x32xf32>
    %725 = arith.negf %724 : vector<8x32xf32>
    %726 = math.exp %725 : vector<8x32xf32>
    %cst_207 = arith.constant 1.000000e+00 : f32
    %727 = vector.broadcast %cst_207 : f32 to vector<8x32xf32>
    %728 = arith.addf %727, %726 : vector<8x32xf32>
    %729 = arith.divf %727, %728 : vector<8x32xf32>
    %730 = vector.extract_strided_slice %717 {offsets = [0, 64], sizes = [8, 32], strides = [1, 1]} : vector<8x128xf32> to vector<8x32xf32>
    %731 = math.tanh %730 : vector<8x32xf32>
    %732 = vector.extract_strided_slice %717 {offsets = [0, 96], sizes = [8, 32], strides = [1, 1]} : vector<8x128xf32> to vector<8x32xf32>
    %733 = arith.negf %732 : vector<8x32xf32>
    %734 = math.exp %733 : vector<8x32xf32>
    %cst_208 = arith.constant 1.000000e+00 : f32
    %735 = vector.broadcast %cst_208 : f32 to vector<8x32xf32>
    %736 = arith.addf %735, %734 : vector<8x32xf32>
    %737 = arith.divf %735, %736 : vector<8x32xf32>
    %738 = arith.mulf %729, %666 : vector<8x32xf32>
    %739 = arith.mulf %723, %731 : vector<8x32xf32>
    %740 = arith.addf %738, %739 : vector<8x32xf32>
    %741 = math.tanh %740 : vector<8x32xf32>
    %742 = arith.mulf %737, %741 : vector<8x32xf32>
    %c1_i32_209 = arith.constant 1 : i32
    %743 = arith.addi %c9_i32, %c1_i32_209 : i32
    %744 = vector.broadcast %743 : i32 to vector<8x1xi32>
    %745 = arith.cmpi eq, %7, %744 : vector<8x1xi32>
    %746 = vector.shape_cast %745 : vector<8x1xi1> to vector<8x1xi1>
    %747 = vector.broadcast %746 : vector<8x1xi1> to vector<8x32xi1>
    %748 = arith.select %747, %742, %674 : vector<8x32xi1>, vector<8x32xf32>
    %c10_i32 = arith.constant 10 : i32
    %c0_210 = arith.constant 0 : index
    %c0_211 = arith.constant 0 : index
    %749 = vector.load %arg2[%c0_210, %c0_211] : memref<64x16xbf16, #tpu.memory_space<vmem>>, vector<64x16xbf16>
    %c0_212 = arith.constant 0 : index
    %c0_213 = arith.constant 0 : index
    %750 = vector.load %arg10[%c0_212, %c0_213] : memref<16x128xbf16, #tpu.memory_space<vmem>>, vector<16x128xbf16>
    %cst_214 = arith.constant dense<0.000000e+00> : vector<64x128xf32>
    %751 = tpu.matmul %749, %750, %cst_214 {dimension_numbers = #tpu.dot_dimension_numbers<[1], [0], [0], [1], [0, 0, 1, 1], [], []>} : vector<64x16xbf16>, vector<16x128xbf16>, vector<64x128xf32> -> vector<64x128xf32>
    %c0_215 = arith.constant 0 : index
    %c0_216 = arith.constant 0 : index
    %752 = vector.load %arg12[%c0_215, %c0_216] : memref<1x128xf32, #tpu.memory_space<vmem>>, vector<1x128xf32>
    %753 = vector.broadcast %752 : vector<1x128xf32> to vector<64x128xf32>
    %754 = arith.addf %751, %753 : vector<64x128xf32>
    %c0_217 = arith.constant 0 : index
    %c0_218 = arith.constant 0 : index
    %755 = vector.load %arg23[%c0_217, %c0_218] : memref<64x128xf32, #tpu.memory_space<vmem>>, vector<64x128xf32>
    tpu.vector_store %arg23[%c0_217, %c0_218], %754 {strides = array<i32>} : memref<64x128xf32, #tpu.memory_space<vmem>>, vector<64x128xf32>,
    %c0_219 = arith.constant 0 : index
    %c0_220 = arith.constant 0 : index
    %756 = vector.load %arg3[%c0_219, %c0_220] : memref<8x1xi32, #tpu.memory_space<vmem>>, vector<8x1xi32>
    %cst_221 = arith.constant 0.000000e+00 : f32
    %757 = vector.broadcast %cst_221 : f32 to vector<8x32xf32>
    %c0_i32_222 = arith.constant 0 : i32
    %c8_i32_223 = arith.constant 8 : i32
    %758 = arith.muli %c0_i32_222, %c8_i32_223 : i32
    %759 = tpu.assume_multiple %758, 8 : i32
    %760 = arith.index_cast %759 : i32 to index
    %c0_224 = arith.constant 0 : index
    %761 = vector.load %arg23[%760, %c0_224] : memref<64x128xf32, #tpu.memory_space<vmem>>, vector<8x128xf32>
    %762 = arith.truncf %757 : vector<8x32xf32> to vector<8x32xbf16>
    %c0_225 = arith.constant 0 : index
    %c0_226 = arith.constant 0 : index
    %763 = vector.load %arg11[%c0_225, %c0_226] : memref<32x128xbf16, #tpu.memory_space<vmem>>, vector<32x128xbf16>
    %cst_227 = arith.constant dense<0.000000e+00> : vector<8x128xf32>
    %764 = tpu.matmul %762, %763, %cst_227 {dimension_numbers = #tpu.dot_dimension_numbers<[1], [0], [0], [1], [0, 0, 1, 1], [], []>} : vector<8x32xbf16>, vector<32x128xbf16>, vector<8x128xf32> -> vector<8x128xf32>
    %765 = arith.addf %761, %764 : vector<8x128xf32>
    %766 = vector.extract_strided_slice %765 {offsets = [0, 0], sizes = [8, 32], strides = [1, 1]} : vector<8x128xf32> to vector<8x32xf32>
    %767 = arith.negf %766 : vector<8x32xf32>
    %768 = math.exp %767 : vector<8x32xf32>
    %cst_228 = arith.constant 1.000000e+00 : f32
    %769 = vector.broadcast %cst_228 : f32 to vector<8x32xf32>
    %770 = arith.addf %769, %768 : vector<8x32xf32>
    %771 = arith.divf %769, %770 : vector<8x32xf32>
    %772 = vector.extract_strided_slice %765 {offsets = [0, 32], sizes = [8, 32], strides = [1, 1]} : vector<8x128xf32> to vector<8x32xf32>
    %773 = arith.negf %772 : vector<8x32xf32>
    %774 = math.exp %773 : vector<8x32xf32>
    %cst_229 = arith.constant 1.000000e+00 : f32
    %775 = vector.broadcast %cst_229 : f32 to vector<8x32xf32>
    %776 = arith.addf %775, %774 : vector<8x32xf32>
    %777 = arith.divf %775, %776 : vector<8x32xf32>
    %778 = vector.extract_strided_slice %765 {offsets = [0, 64], sizes = [8, 32], strides = [1, 1]} : vector<8x128xf32> to vector<8x32xf32>
    %779 = math.tanh %778 : vector<8x32xf32>
    %780 = vector.extract_strided_slice %765 {offsets = [0, 96], sizes = [8, 32], strides = [1, 1]} : vector<8x128xf32> to vector<8x32xf32>
    %781 = arith.negf %780 : vector<8x32xf32>
    %782 = math.exp %781 : vector<8x32xf32>
    %cst_230 = arith.constant 1.000000e+00 : f32
    %783 = vector.broadcast %cst_230 : f32 to vector<8x32xf32>
    %784 = arith.addf %783, %782 : vector<8x32xf32>
    %785 = arith.divf %783, %784 : vector<8x32xf32>
    %786 = arith.mulf %777, %757 : vector<8x32xf32>
    %787 = arith.mulf %771, %779 : vector<8x32xf32>
    %788 = arith.addf %786, %787 : vector<8x32xf32>
    %789 = math.tanh %788 : vector<8x32xf32>
    %790 = arith.mulf %785, %789 : vector<8x32xf32>
    %791 = arith.truncf %790 : vector<8x32xf32> to vector<8x32xbf16>
    %c0_231 = arith.constant 0 : index
    %c0_232 = arith.constant 0 : index
    %792 = vector.load %arg13[%c0_231, %c0_232] : memref<32x128xbf16, #tpu.memory_space<vmem>>, vector<32x128xbf16>
    %cst_233 = arith.constant dense<0.000000e+00> : vector<8x128xf32>
    %793 = tpu.matmul %791, %792, %cst_233 {dimension_numbers = #tpu.dot_dimension_numbers<[1], [0], [0], [1], [0, 0, 1, 1], [], []>} : vector<8x32xbf16>, vector<32x128xbf16>, vector<8x128xf32> -> vector<8x128xf32>
    %794 = arith.truncf %757 : vector<8x32xf32> to vector<8x32xbf16>
    %c0_234 = arith.constant 0 : index
    %c0_235 = arith.constant 0 : index
    %795 = vector.load %arg14[%c0_234, %c0_235] : memref<32x128xbf16, #tpu.memory_space<vmem>>, vector<32x128xbf16>
    %cst_236 = arith.constant dense<0.000000e+00> : vector<8x128xf32>
    %796 = tpu.matmul %794, %795, %cst_236 {dimension_numbers = #tpu.dot_dimension_numbers<[1], [0], [0], [1], [0, 0, 1, 1], [], []>} : vector<8x32xbf16>, vector<32x128xbf16>, vector<8x128xf32> -> vector<8x128xf32>
    %797 = arith.addf %793, %796 : vector<8x128xf32>
    %c0_237 = arith.constant 0 : index
    %c0_238 = arith.constant 0 : index
    %798 = vector.load %arg15[%c0_237, %c0_238] : memref<1x128xf32, #tpu.memory_space<vmem>>, vector<1x128xf32>
    %799 = vector.broadcast %798 : vector<1x128xf32> to vector<8x128xf32>
    %800 = arith.addf %797, %799 : vector<8x128xf32>
    %801 = vector.extract_strided_slice %800 {offsets = [0, 0], sizes = [8, 32], strides = [1, 1]} : vector<8x128xf32> to vector<8x32xf32>
    %802 = arith.negf %801 : vector<8x32xf32>
    %803 = math.exp %802 : vector<8x32xf32>
    %cst_239 = arith.constant 1.000000e+00 : f32
    %804 = vector.broadcast %cst_239 : f32 to vector<8x32xf32>
    %805 = arith.addf %804, %803 : vector<8x32xf32>
    %806 = arith.divf %804, %805 : vector<8x32xf32>
    %807 = vector.extract_strided_slice %800 {offsets = [0, 32], sizes = [8, 32], strides = [1, 1]} : vector<8x128xf32> to vector<8x32xf32>
    %808 = arith.negf %807 : vector<8x32xf32>
    %809 = math.exp %808 : vector<8x32xf32>
    %cst_240 = arith.constant 1.000000e+00 : f32
    %810 = vector.broadcast %cst_240 : f32 to vector<8x32xf32>
    %811 = arith.addf %810, %809 : vector<8x32xf32>
    %812 = arith.divf %810, %811 : vector<8x32xf32>
    %813 = vector.extract_strided_slice %800 {offsets = [0, 64], sizes = [8, 32], strides = [1, 1]} : vector<8x128xf32> to vector<8x32xf32>
    %814 = math.tanh %813 : vector<8x32xf32>
    %815 = vector.extract_strided_slice %800 {offsets = [0, 96], sizes = [8, 32], strides = [1, 1]} : vector<8x128xf32> to vector<8x32xf32>
    %816 = arith.negf %815 : vector<8x32xf32>
    %817 = math.exp %816 : vector<8x32xf32>
    %cst_241 = arith.constant 1.000000e+00 : f32
    %818 = vector.broadcast %cst_241 : f32 to vector<8x32xf32>
    %819 = arith.addf %818, %817 : vector<8x32xf32>
    %820 = arith.divf %818, %819 : vector<8x32xf32>
    %821 = arith.mulf %812, %757 : vector<8x32xf32>
    %822 = arith.mulf %806, %814 : vector<8x32xf32>
    %823 = arith.addf %821, %822 : vector<8x32xf32>
    %824 = math.tanh %823 : vector<8x32xf32>
    %825 = arith.mulf %820, %824 : vector<8x32xf32>
    %c1_i32_242 = arith.constant 1 : i32
    %826 = arith.addi %c0_i32_222, %c1_i32_242 : i32
    %827 = vector.broadcast %826 : i32 to vector<8x1xi32>
    %828 = arith.cmpi eq, %756, %827 : vector<8x1xi32>
    %829 = vector.shape_cast %828 : vector<8x1xi1> to vector<8x1xi1>
    %830 = vector.broadcast %829 : vector<8x1xi1> to vector<8x32xi1>
    %831 = arith.select %830, %825, %757 : vector<8x32xi1>, vector<8x32xf32>
    %c1_i32_243 = arith.constant 1 : i32
    %c8_i32_244 = arith.constant 8 : i32
    %832 = arith.muli %c1_i32_243, %c8_i32_244 : i32
    %833 = tpu.assume_multiple %832, 8 : i32
    %834 = arith.index_cast %833 : i32 to index
    %c0_245 = arith.constant 0 : index
    %835 = vector.load %arg23[%834, %c0_245] : memref<64x128xf32, #tpu.memory_space<vmem>>, vector<8x128xf32>
    %836 = arith.truncf %790 : vector<8x32xf32> to vector<8x32xbf16>
    %c0_246 = arith.constant 0 : index
    %c0_247 = arith.constant 0 : index
    %837 = vector.load %arg11[%c0_246, %c0_247] : memref<32x128xbf16, #tpu.memory_space<vmem>>, vector<32x128xbf16>
    %cst_248 = arith.constant dense<0.000000e+00> : vector<8x128xf32>
    %838 = tpu.matmul %836, %837, %cst_248 {dimension_numbers = #tpu.dot_dimension_numbers<[1], [0], [0], [1], [0, 0, 1, 1], [], []>} : vector<8x32xbf16>, vector<32x128xbf16>, vector<8x128xf32> -> vector<8x128xf32>
    %839 = arith.addf %835, %838 : vector<8x128xf32>
    %840 = vector.extract_strided_slice %839 {offsets = [0, 0], sizes = [8, 32], strides = [1, 1]} : vector<8x128xf32> to vector<8x32xf32>
    %841 = arith.negf %840 : vector<8x32xf32>
    %842 = math.exp %841 : vector<8x32xf32>
    %cst_249 = arith.constant 1.000000e+00 : f32
    %843 = vector.broadcast %cst_249 : f32 to vector<8x32xf32>
    %844 = arith.addf %843, %842 : vector<8x32xf32>
    %845 = arith.divf %843, %844 : vector<8x32xf32>
    %846 = vector.extract_strided_slice %839 {offsets = [0, 32], sizes = [8, 32], strides = [1, 1]} : vector<8x128xf32> to vector<8x32xf32>
    %847 = arith.negf %846 : vector<8x32xf32>
    %848 = math.exp %847 : vector<8x32xf32>
    %cst_250 = arith.constant 1.000000e+00 : f32
    %849 = vector.broadcast %cst_250 : f32 to vector<8x32xf32>
    %850 = arith.addf %849, %848 : vector<8x32xf32>
    %851 = arith.divf %849, %850 : vector<8x32xf32>
    %852 = vector.extract_strided_slice %839 {offsets = [0, 64], sizes = [8, 32], strides = [1, 1]} : vector<8x128xf32> to vector<8x32xf32>
    %853 = math.tanh %852 : vector<8x32xf32>
    %854 = vector.extract_strided_slice %839 {offsets = [0, 96], sizes = [8, 32], strides = [1, 1]} : vector<8x128xf32> to vector<8x32xf32>
    %855 = arith.negf %854 : vector<8x32xf32>
    %856 = math.exp %855 : vector<8x32xf32>
    %cst_251 = arith.constant 1.000000e+00 : f32
    %857 = vector.broadcast %cst_251 : f32 to vector<8x32xf32>
    %858 = arith.addf %857, %856 : vector<8x32xf32>
    %859 = arith.divf %857, %858 : vector<8x32xf32>
    %860 = arith.mulf %851, %788 : vector<8x32xf32>
    %861 = arith.mulf %845, %853 : vector<8x32xf32>
    %862 = arith.addf %860, %861 : vector<8x32xf32>
    %863 = math.tanh %862 : vector<8x32xf32>
    %864 = arith.mulf %859, %863 : vector<8x32xf32>
    %865 = arith.truncf %864 : vector<8x32xf32> to vector<8x32xbf16>
    %c0_252 = arith.constant 0 : index
    %c0_253 = arith.constant 0 : index
    %866 = vector.load %arg13[%c0_252, %c0_253] : memref<32x128xbf16, #tpu.memory_space<vmem>>, vector<32x128xbf16>
    %cst_254 = arith.constant dense<0.000000e+00> : vector<8x128xf32>
    %867 = tpu.matmul %865, %866, %cst_254 {dimension_numbers = #tpu.dot_dimension_numbers<[1], [0], [0], [1], [0, 0, 1, 1], [], []>} : vector<8x32xbf16>, vector<32x128xbf16>, vector<8x128xf32> -> vector<8x128xf32>
    %868 = arith.truncf %825 : vector<8x32xf32> to vector<8x32xbf16>
    %c0_255 = arith.constant 0 : index
    %c0_256 = arith.constant 0 : index
    %869 = vector.load %arg14[%c0_255, %c0_256] : memref<32x128xbf16, #tpu.memory_space<vmem>>, vector<32x128xbf16>
    %cst_257 = arith.constant dense<0.000000e+00> : vector<8x128xf32>
    %870 = tpu.matmul %868, %869, %cst_257 {dimension_numbers = #tpu.dot_dimension_numbers<[1], [0], [0], [1], [0, 0, 1, 1], [], []>} : vector<8x32xbf16>, vector<32x128xbf16>, vector<8x128xf32> -> vector<8x128xf32>
    %871 = arith.addf %867, %870 : vector<8x128xf32>
    %c0_258 = arith.constant 0 : index
    %c0_259 = arith.constant 0 : index
    %872 = vector.load %arg15[%c0_258, %c0_259] : memref<1x128xf32, #tpu.memory_space<vmem>>, vector<1x128xf32>
    %873 = vector.broadcast %872 : vector<1x128xf32> to vector<8x128xf32>
    %874 = arith.addf %871, %873 : vector<8x128xf32>
    %875 = vector.extract_strided_slice %874 {offsets = [0, 0], sizes = [8, 32], strides = [1, 1]} : vector<8x128xf32> to vector<8x32xf32>
    %876 = arith.negf %875 : vector<8x32xf32>
    %877 = math.exp %876 : vector<8x32xf32>
    %cst_260 = arith.constant 1.000000e+00 : f32
    %878 = vector.broadcast %cst_260 : f32 to vector<8x32xf32>
    %879 = arith.addf %878, %877 : vector<8x32xf32>
    %880 = arith.divf %878, %879 : vector<8x32xf32>
    %881 = vector.extract_strided_slice %874 {offsets = [0, 32], sizes = [8, 32], strides = [1, 1]} : vector<8x128xf32> to vector<8x32xf32>
    %882 = arith.negf %881 : vector<8x32xf32>
    %883 = math.exp %882 : vector<8x32xf32>
    %cst_261 = arith.constant 1.000000e+00 : f32
    %884 = vector.broadcast %cst_261 : f32 to vector<8x32xf32>
    %885 = arith.addf %884, %883 : vector<8x32xf32>
    %886 = arith.divf %884, %885 : vector<8x32xf32>
    %887 = vector.extract_strided_slice %874 {offsets = [0, 64], sizes = [8, 32], strides = [1, 1]} : vector<8x128xf32> to vector<8x32xf32>
    %888 = math.tanh %887 : vector<8x32xf32>
    %889 = vector.extract_strided_slice %874 {offsets = [0, 96], sizes = [8, 32], strides = [1, 1]} : vector<8x128xf32> to vector<8x32xf32>
    %890 = arith.negf %889 : vector<8x32xf32>
    %891 = math.exp %890 : vector<8x32xf32>
    %cst_262 = arith.constant 1.000000e+00 : f32
    %892 = vector.broadcast %cst_262 : f32 to vector<8x32xf32>
    %893 = arith.addf %892, %891 : vector<8x32xf32>
    %894 = arith.divf %892, %893 : vector<8x32xf32>
    %895 = arith.mulf %886, %823 : vector<8x32xf32>
    %896 = arith.mulf %880, %888 : vector<8x32xf32>
    %897 = arith.addf %895, %896 : vector<8x32xf32>
    %898 = math.tanh %897 : vector<8x32xf32>
    %899 = arith.mulf %894, %898 : vector<8x32xf32>
    %c1_i32_263 = arith.constant 1 : i32
    %900 = arith.addi %c1_i32_243, %c1_i32_263 : i32
    %901 = vector.broadcast %900 : i32 to vector<8x1xi32>
    %902 = arith.cmpi eq, %756, %901 : vector<8x1xi32>
    %903 = vector.shape_cast %902 : vector<8x1xi1> to vector<8x1xi1>
    %904 = vector.broadcast %903 : vector<8x1xi1> to vector<8x32xi1>
    %905 = arith.select %904, %899, %831 : vector<8x32xi1>, vector<8x32xf32>
    %c2_i32_264 = arith.constant 2 : i32
    %c8_i32_265 = arith.constant 8 : i32
    %906 = arith.muli %c2_i32_264, %c8_i32_265 : i32
    %907 = tpu.assume_multiple %906, 8 : i32
    %908 = arith.index_cast %907 : i32 to index
    %c0_266 = arith.constant 0 : index
    %909 = vector.load %arg23[%908, %c0_266] : memref<64x128xf32, #tpu.memory_space<vmem>>, vector<8x128xf32>
    %910 = arith.truncf %864 : vector<8x32xf32> to vector<8x32xbf16>
    %c0_267 = arith.constant 0 : index
    %c0_268 = arith.constant 0 : index
    %911 = vector.load %arg11[%c0_267, %c0_268] : memref<32x128xbf16, #tpu.memory_space<vmem>>, vector<32x128xbf16>
    %cst_269 = arith.constant dense<0.000000e+00> : vector<8x128xf32>
    %912 = tpu.matmul %910, %911, %cst_269 {dimension_numbers = #tpu.dot_dimension_numbers<[1], [0], [0], [1], [0, 0, 1, 1], [], []>} : vector<8x32xbf16>, vector<32x128xbf16>, vector<8x128xf32> -> vector<8x128xf32>
    %913 = arith.addf %909, %912 : vector<8x128xf32>
    %914 = vector.extract_strided_slice %913 {offsets = [0, 0], sizes = [8, 32], strides = [1, 1]} : vector<8x128xf32> to vector<8x32xf32>
    %915 = arith.negf %914 : vector<8x32xf32>
    %916 = math.exp %915 : vector<8x32xf32>
    %cst_270 = arith.constant 1.000000e+00 : f32
    %917 = vector.broadcast %cst_270 : f32 to vector<8x32xf32>
    %918 = arith.addf %917, %916 : vector<8x32xf32>
    %919 = arith.divf %917, %918 : vector<8x32xf32>
    %920 = vector.extract_strided_slice %913 {offsets = [0, 32], sizes = [8, 32], strides = [1, 1]} : vector<8x128xf32> to vector<8x32xf32>
    %921 = arith.negf %920 : vector<8x32xf32>
    %922 = math.exp %921 : vector<8x32xf32>
    %cst_271 = arith.constant 1.000000e+00 : f32
    %923 = vector.broadcast %cst_271 : f32 to vector<8x32xf32>
    %924 = arith.addf %923, %922 : vector<8x32xf32>
    %925 = arith.divf %923, %924 : vector<8x32xf32>
    %926 = vector.extract_strided_slice %913 {offsets = [0, 64], sizes = [8, 32], strides = [1, 1]} : vector<8x128xf32> to vector<8x32xf32>
    %927 = math.tanh %926 : vector<8x32xf32>
    %928 = vector.extract_strided_slice %913 {offsets = [0, 96], sizes = [8, 32], strides = [1, 1]} : vector<8x128xf32> to vector<8x32xf32>
    %929 = arith.negf %928 : vector<8x32xf32>
    %930 = math.exp %929 : vector<8x32xf32>
    %cst_272 = arith.constant 1.000000e+00 : f32
    %931 = vector.broadcast %cst_272 : f32 to vector<8x32xf32>
    %932 = arith.addf %931, %930 : vector<8x32xf32>
    %933 = arith.divf %931, %932 : vector<8x32xf32>
    %934 = arith.mulf %925, %862 : vector<8x32xf32>
    %935 = arith.mulf %919, %927 : vector<8x32xf32>
    %936 = arith.addf %934, %935 : vector<8x32xf32>
    %937 = math.tanh %936 : vector<8x32xf32>
    %938 = arith.mulf %933, %937 : vector<8x32xf32>
    %939 = arith.truncf %938 : vector<8x32xf32> to vector<8x32xbf16>
    %c0_273 = arith.constant 0 : index
    %c0_274 = arith.constant 0 : index
    %940 = vector.load %arg13[%c0_273, %c0_274] : memref<32x128xbf16, #tpu.memory_space<vmem>>, vector<32x128xbf16>
    %cst_275 = arith.constant dense<0.000000e+00> : vector<8x128xf32>
    %941 = tpu.matmul %939, %940, %cst_275 {dimension_numbers = #tpu.dot_dimension_numbers<[1], [0], [0], [1], [0, 0, 1, 1], [], []>} : vector<8x32xbf16>, vector<32x128xbf16>, vector<8x128xf32> -> vector<8x128xf32>
    %942 = arith.truncf %899 : vector<8x32xf32> to vector<8x32xbf16>
    %c0_276 = arith.constant 0 : index
    %c0_277 = arith.constant 0 : index
    %943 = vector.load %arg14[%c0_276, %c0_277] : memref<32x128xbf16, #tpu.memory_space<vmem>>, vector<32x128xbf16>
    %cst_278 = arith.constant dense<0.000000e+00> : vector<8x128xf32>
    %944 = tpu.matmul %942, %943, %cst_278 {dimension_numbers = #tpu.dot_dimension_numbers<[1], [0], [0], [1], [0, 0, 1, 1], [], []>} : vector<8x32xbf16>, vector<32x128xbf16>, vector<8x128xf32> -> vector<8x128xf32>
    %945 = arith.addf %941, %944 : vector<8x128xf32>
    %c0_279 = arith.constant 0 : index
    %c0_280 = arith.constant 0 : index
    %946 = vector.load %arg15[%c0_279, %c0_280] : memref<1x128xf32, #tpu.memory_space<vmem>>, vector<1x128xf32>
    %947 = vector.broadcast %946 : vector<1x128xf32> to vector<8x128xf32>
    %948 = arith.addf %945, %947 : vector<8x128xf32>
    %949 = vector.extract_strided_slice %948 {offsets = [0, 0], sizes = [8, 32], strides = [1, 1]} : vector<8x128xf32> to vector<8x32xf32>
    %950 = arith.negf %949 : vector<8x32xf32>
    %951 = math.exp %950 : vector<8x32xf32>
    %cst_281 = arith.constant 1.000000e+00 : f32
    %952 = vector.broadcast %cst_281 : f32 to vector<8x32xf32>
    %953 = arith.addf %952, %951 : vector<8x32xf32>
    %954 = arith.divf %952, %953 : vector<8x32xf32>
    %955 = vector.extract_strided_slice %948 {offsets = [0, 32], sizes = [8, 32], strides = [1, 1]} : vector<8x128xf32> to vector<8x32xf32>
    %956 = arith.negf %955 : vector<8x32xf32>
    %957 = math.exp %956 : vector<8x32xf32>
    %cst_282 = arith.constant 1.000000e+00 : f32
    %958 = vector.broadcast %cst_282 : f32 to vector<8x32xf32>
    %959 = arith.addf %958, %957 : vector<8x32xf32>
    %960 = arith.divf %958, %959 : vector<8x32xf32>
    %961 = vector.extract_strided_slice %948 {offsets = [0, 64], sizes = [8, 32], strides = [1, 1]} : vector<8x128xf32> to vector<8x32xf32>
    %962 = math.tanh %961 : vector<8x32xf32>
    %963 = vector.extract_strided_slice %948 {offsets = [0, 96], sizes = [8, 32], strides = [1, 1]} : vector<8x128xf32> to vector<8x32xf32>
    %964 = arith.negf %963 : vector<8x32xf32>
    %965 = math.exp %964 : vector<8x32xf32>
    %cst_283 = arith.constant 1.000000e+00 : f32
    %966 = vector.broadcast %cst_283 : f32 to vector<8x32xf32>
    %967 = arith.addf %966, %965 : vector<8x32xf32>
    %968 = arith.divf %966, %967 : vector<8x32xf32>
    %969 = arith.mulf %960, %897 : vector<8x32xf32>
    %970 = arith.mulf %954, %962 : vector<8x32xf32>
    %971 = arith.addf %969, %970 : vector<8x32xf32>
    %972 = math.tanh %971 : vector<8x32xf32>
    %973 = arith.mulf %968, %972 : vector<8x32xf32>
    %c1_i32_284 = arith.constant 1 : i32
    %974 = arith.addi %c2_i32_264, %c1_i32_284 : i32
    %975 = vector.broadcast %974 : i32 to vector<8x1xi32>
    %976 = arith.cmpi eq, %756, %975 : vector<8x1xi32>
    %977 = vector.shape_cast %976 : vector<8x1xi1> to vector<8x1xi1>
    %978 = vector.broadcast %977 : vector<8x1xi1> to vector<8x32xi1>
    %979 = arith.select %978, %973, %905 : vector<8x32xi1>, vector<8x32xf32>
    %c3_i32_285 = arith.constant 3 : i32
    %c8_i32_286 = arith.constant 8 : i32
    %980 = arith.muli %c3_i32_285, %c8_i32_286 : i32
    %981 = tpu.assume_multiple %980, 8 : i32
    %982 = arith.index_cast %981 : i32 to index
    %c0_287 = arith.constant 0 : index
    %983 = vector.load %arg23[%982, %c0_287] : memref<64x128xf32, #tpu.memory_space<vmem>>, vector<8x128xf32>
    %984 = arith.truncf %938 : vector<8x32xf32> to vector<8x32xbf16>
    %c0_288 = arith.constant 0 : index
    %c0_289 = arith.constant 0 : index
    %985 = vector.load %arg11[%c0_288, %c0_289] : memref<32x128xbf16, #tpu.memory_space<vmem>>, vector<32x128xbf16>
    %cst_290 = arith.constant dense<0.000000e+00> : vector<8x128xf32>
    %986 = tpu.matmul %984, %985, %cst_290 {dimension_numbers = #tpu.dot_dimension_numbers<[1], [0], [0], [1], [0, 0, 1, 1], [], []>} : vector<8x32xbf16>, vector<32x128xbf16>, vector<8x128xf32> -> vector<8x128xf32>
    %987 = arith.addf %983, %986 : vector<8x128xf32>
    %988 = vector.extract_strided_slice %987 {offsets = [0, 0], sizes = [8, 32], strides = [1, 1]} : vector<8x128xf32> to vector<8x32xf32>
    %989 = arith.negf %988 : vector<8x32xf32>
    %990 = math.exp %989 : vector<8x32xf32>
    %cst_291 = arith.constant 1.000000e+00 : f32
    %991 = vector.broadcast %cst_291 : f32 to vector<8x32xf32>
    %992 = arith.addf %991, %990 : vector<8x32xf32>
    %993 = arith.divf %991, %992 : vector<8x32xf32>
    %994 = vector.extract_strided_slice %987 {offsets = [0, 32], sizes = [8, 32], strides = [1, 1]} : vector<8x128xf32> to vector<8x32xf32>
    %995 = arith.negf %994 : vector<8x32xf32>
    %996 = math.exp %995 : vector<8x32xf32>
    %cst_292 = arith.constant 1.000000e+00 : f32
    %997 = vector.broadcast %cst_292 : f32 to vector<8x32xf32>
    %998 = arith.addf %997, %996 : vector<8x32xf32>
    %999 = arith.divf %997, %998 : vector<8x32xf32>
    %1000 = vector.extract_strided_slice %987 {offsets = [0, 64], sizes = [8, 32], strides = [1, 1]} : vector<8x128xf32> to vector<8x32xf32>
    %1001 = math.tanh %1000 : vector<8x32xf32>
    %1002 = vector.extract_strided_slice %987 {offsets = [0, 96], sizes = [8, 32], strides = [1, 1]} : vector<8x128xf32> to vector<8x32xf32>
    %1003 = arith.negf %1002 : vector<8x32xf32>
    %1004 = math.exp %1003 : vector<8x32xf32>
    %cst_293 = arith.constant 1.000000e+00 : f32
    %1005 = vector.broadcast %cst_293 : f32 to vector<8x32xf32>
    %1006 = arith.addf %1005, %1004 : vector<8x32xf32>
    %1007 = arith.divf %1005, %1006 : vector<8x32xf32>
    %1008 = arith.mulf %999, %936 : vector<8x32xf32>
    %1009 = arith.mulf %993, %1001 : vector<8x32xf32>
    %1010 = arith.addf %1008, %1009 : vector<8x32xf32>
    %1011 = math.tanh %1010 : vector<8x32xf32>
    %1012 = arith.mulf %1007, %1011 : vector<8x32xf32>
    %1013 = arith.truncf %1012 : vector<8x32xf32> to vector<8x32xbf16>
    %c0_294 = arith.constant 0 : index
    %c0_295 = arith.constant 0 : index
    %1014 = vector.load %arg13[%c0_294, %c0_295] : memref<32x128xbf16, #tpu.memory_space<vmem>>, vector<32x128xbf16>
    %cst_296 = arith.constant dense<0.000000e+00> : vector<8x128xf32>
    %1015 = tpu.matmul %1013, %1014, %cst_296 {dimension_numbers = #tpu.dot_dimension_numbers<[1], [0], [0], [1], [0, 0, 1, 1], [], []>} : vector<8x32xbf16>, vector<32x128xbf16>, vector<8x128xf32> -> vector<8x128xf32>
    %1016 = arith.truncf %973 : vector<8x32xf32> to vector<8x32xbf16>
    %c0_297 = arith.constant 0 : index
    %c0_298 = arith.constant 0 : index
    %1017 = vector.load %arg14[%c0_297, %c0_298] : memref<32x128xbf16, #tpu.memory_space<vmem>>, vector<32x128xbf16>
    %cst_299 = arith.constant dense<0.000000e+00> : vector<8x128xf32>
    %1018 = tpu.matmul %1016, %1017, %cst_299 {dimension_numbers = #tpu.dot_dimension_numbers<[1], [0], [0], [1], [0, 0, 1, 1], [], []>} : vector<8x32xbf16>, vector<32x128xbf16>, vector<8x128xf32> -> vector<8x128xf32>
    %1019 = arith.addf %1015, %1018 : vector<8x128xf32>
    %c0_300 = arith.constant 0 : index
    %c0_301 = arith.constant 0 : index
    %1020 = vector.load %arg15[%c0_300, %c0_301] : memref<1x128xf32, #tpu.memory_space<vmem>>, vector<1x128xf32>
    %1021 = vector.broadcast %1020 : vector<1x128xf32> to vector<8x128xf32>
    %1022 = arith.addf %1019, %1021 : vector<8x128xf32>
    %1023 = vector.extract_strided_slice %1022 {offsets = [0, 0], sizes = [8, 32], strides = [1, 1]} : vector<8x128xf32> to vector<8x32xf32>
    %1024 = arith.negf %1023 : vector<8x32xf32>
    %1025 = math.exp %1024 : vector<8x32xf32>
    %cst_302 = arith.constant 1.000000e+00 : f32
    %1026 = vector.broadcast %cst_302 : f32 to vector<8x32xf32>
    %1027 = arith.addf %1026, %1025 : vector<8x32xf32>
    %1028 = arith.divf %1026, %1027 : vector<8x32xf32>
    %1029 = vector.extract_strided_slice %1022 {offsets = [0, 32], sizes = [8, 32], strides = [1, 1]} : vector<8x128xf32> to vector<8x32xf32>
    %1030 = arith.negf %1029 : vector<8x32xf32>
    %1031 = math.exp %1030 : vector<8x32xf32>
    %cst_303 = arith.constant 1.000000e+00 : f32
    %1032 = vector.broadcast %cst_303 : f32 to vector<8x32xf32>
    %1033 = arith.addf %1032, %1031 : vector<8x32xf32>
    %1034 = arith.divf %1032, %1033 : vector<8x32xf32>
    %1035 = vector.extract_strided_slice %1022 {offsets = [0, 64], sizes = [8, 32], strides = [1, 1]} : vector<8x128xf32> to vector<8x32xf32>
    %1036 = math.tanh %1035 : vector<8x32xf32>
    %1037 = vector.extract_strided_slice %1022 {offsets = [0, 96], sizes = [8, 32], strides = [1, 1]} : vector<8x128xf32> to vector<8x32xf32>
    %1038 = arith.negf %1037 : vector<8x32xf32>
    %1039 = math.exp %1038 : vector<8x32xf32>
    %cst_304 = arith.constant 1.000000e+00 : f32
    %1040 = vector.broadcast %cst_304 : f32 to vector<8x32xf32>
    %1041 = arith.addf %1040, %1039 : vector<8x32xf32>
    %1042 = arith.divf %1040, %1041 : vector<8x32xf32>
    %1043 = arith.mulf %1034, %971 : vector<8x32xf32>
    %1044 = arith.mulf %1028, %1036 : vector<8x32xf32>
    %1045 = arith.addf %1043, %1044 : vector<8x32xf32>
    %1046 = math.tanh %1045 : vector<8x32xf32>
    %1047 = arith.mulf %1042, %1046 : vector<8x32xf32>
    %c1_i32_305 = arith.constant 1 : i32
    %1048 = arith.addi %c3_i32_285, %c1_i32_305 : i32
    %1049 = vector.broadcast %1048 : i32 to vector<8x1xi32>
    %1050 = arith.cmpi eq, %756, %1049 : vector<8x1xi32>
    %1051 = vector.shape_cast %1050 : vector<8x1xi1> to vector<8x1xi1>
    %1052 = vector.broadcast %1051 : vector<8x1xi1> to vector<8x32xi1>
    %1053 = arith.select %1052, %1047, %979 : vector<8x32xi1>, vector<8x32xf32>
    %c4_i32_306 = arith.constant 4 : i32
    %c8_i32_307 = arith.constant 8 : i32
    %1054 = arith.muli %c4_i32_306, %c8_i32_307 : i32
    %1055 = tpu.assume_multiple %1054, 8 : i32
    %1056 = arith.index_cast %1055 : i32 to index
    %c0_308 = arith.constant 0 : index
    %1057 = vector.load %arg23[%1056, %c0_308] : memref<64x128xf32, #tpu.memory_space<vmem>>, vector<8x128xf32>
    %1058 = arith.truncf %1012 : vector<8x32xf32> to vector<8x32xbf16>
    %c0_309 = arith.constant 0 : index
    %c0_310 = arith.constant 0 : index
    %1059 = vector.load %arg11[%c0_309, %c0_310] : memref<32x128xbf16, #tpu.memory_space<vmem>>, vector<32x128xbf16>
    %cst_311 = arith.constant dense<0.000000e+00> : vector<8x128xf32>
    %1060 = tpu.matmul %1058, %1059, %cst_311 {dimension_numbers = #tpu.dot_dimension_numbers<[1], [0], [0], [1], [0, 0, 1, 1], [], []>} : vector<8x32xbf16>, vector<32x128xbf16>, vector<8x128xf32> -> vector<8x128xf32>
    %1061 = arith.addf %1057, %1060 : vector<8x128xf32>
    %1062 = vector.extract_strided_slice %1061 {offsets = [0, 0], sizes = [8, 32], strides = [1, 1]} : vector<8x128xf32> to vector<8x32xf32>
    %1063 = arith.negf %1062 : vector<8x32xf32>
    %1064 = math.exp %1063 : vector<8x32xf32>
    %cst_312 = arith.constant 1.000000e+00 : f32
    %1065 = vector.broadcast %cst_312 : f32 to vector<8x32xf32>
    %1066 = arith.addf %1065, %1064 : vector<8x32xf32>
    %1067 = arith.divf %1065, %1066 : vector<8x32xf32>
    %1068 = vector.extract_strided_slice %1061 {offsets = [0, 32], sizes = [8, 32], strides = [1, 1]} : vector<8x128xf32> to vector<8x32xf32>
    %1069 = arith.negf %1068 : vector<8x32xf32>
    %1070 = math.exp %1069 : vector<8x32xf32>
    %cst_313 = arith.constant 1.000000e+00 : f32
    %1071 = vector.broadcast %cst_313 : f32 to vector<8x32xf32>
    %1072 = arith.addf %1071, %1070 : vector<8x32xf32>
    %1073 = arith.divf %1071, %1072 : vector<8x32xf32>
    %1074 = vector.extract_strided_slice %1061 {offsets = [0, 64], sizes = [8, 32], strides = [1, 1]} : vector<8x128xf32> to vector<8x32xf32>
    %1075 = math.tanh %1074 : vector<8x32xf32>
    %1076 = vector.extract_strided_slice %1061 {offsets = [0, 96], sizes = [8, 32], strides = [1, 1]} : vector<8x128xf32> to vector<8x32xf32>
    %1077 = arith.negf %1076 : vector<8x32xf32>
    %1078 = math.exp %1077 : vector<8x32xf32>
    %cst_314 = arith.constant 1.000000e+00 : f32
    %1079 = vector.broadcast %cst_314 : f32 to vector<8x32xf32>
    %1080 = arith.addf %1079, %1078 : vector<8x32xf32>
    %1081 = arith.divf %1079, %1080 : vector<8x32xf32>
    %1082 = arith.mulf %1073, %1010 : vector<8x32xf32>
    %1083 = arith.mulf %1067, %1075 : vector<8x32xf32>
    %1084 = arith.addf %1082, %1083 : vector<8x32xf32>
    %1085 = math.tanh %1084 : vector<8x32xf32>
    %1086 = arith.mulf %1081, %1085 : vector<8x32xf32>
    %1087 = arith.truncf %1086 : vector<8x32xf32> to vector<8x32xbf16>
    %c0_315 = arith.constant 0 : index
    %c0_316 = arith.constant 0 : index
    %1088 = vector.load %arg13[%c0_315, %c0_316] : memref<32x128xbf16, #tpu.memory_space<vmem>>, vector<32x128xbf16>
    %cst_317 = arith.constant dense<0.000000e+00> : vector<8x128xf32>
    %1089 = tpu.matmul %1087, %1088, %cst_317 {dimension_numbers = #tpu.dot_dimension_numbers<[1], [0], [0], [1], [0, 0, 1, 1], [], []>} : vector<8x32xbf16>, vector<32x128xbf16>, vector<8x128xf32> -> vector<8x128xf32>
    %1090 = arith.truncf %1047 : vector<8x32xf32> to vector<8x32xbf16>
    %c0_318 = arith.constant 0 : index
    %c0_319 = arith.constant 0 : index
    %1091 = vector.load %arg14[%c0_318, %c0_319] : memref<32x128xbf16, #tpu.memory_space<vmem>>, vector<32x128xbf16>
    %cst_320 = arith.constant dense<0.000000e+00> : vector<8x128xf32>
    %1092 = tpu.matmul %1090, %1091, %cst_320 {dimension_numbers = #tpu.dot_dimension_numbers<[1], [0], [0], [1], [0, 0, 1, 1], [], []>} : vector<8x32xbf16>, vector<32x128xbf16>, vector<8x128xf32> -> vector<8x128xf32>
    %1093 = arith.addf %1089, %1092 : vector<8x128xf32>
    %c0_321 = arith.constant 0 : index
    %c0_322 = arith.constant 0 : index
    %1094 = vector.load %arg15[%c0_321, %c0_322] : memref<1x128xf32, #tpu.memory_space<vmem>>, vector<1x128xf32>
    %1095 = vector.broadcast %1094 : vector<1x128xf32> to vector<8x128xf32>
    %1096 = arith.addf %1093, %1095 : vector<8x128xf32>
    %1097 = vector.extract_strided_slice %1096 {offsets = [0, 0], sizes = [8, 32], strides = [1, 1]} : vector<8x128xf32> to vector<8x32xf32>
    %1098 = arith.negf %1097 : vector<8x32xf32>
    %1099 = math.exp %1098 : vector<8x32xf32>
    %cst_323 = arith.constant 1.000000e+00 : f32
    %1100 = vector.broadcast %cst_323 : f32 to vector<8x32xf32>
    %1101 = arith.addf %1100, %1099 : vector<8x32xf32>
    %1102 = arith.divf %1100, %1101 : vector<8x32xf32>
    %1103 = vector.extract_strided_slice %1096 {offsets = [0, 32], sizes = [8, 32], strides = [1, 1]} : vector<8x128xf32> to vector<8x32xf32>
    %1104 = arith.negf %1103 : vector<8x32xf32>
    %1105 = math.exp %1104 : vector<8x32xf32>
    %cst_324 = arith.constant 1.000000e+00 : f32
    %1106 = vector.broadcast %cst_324 : f32 to vector<8x32xf32>
    %1107 = arith.addf %1106, %1105 : vector<8x32xf32>
    %1108 = arith.divf %1106, %1107 : vector<8x32xf32>
    %1109 = vector.extract_strided_slice %1096 {offsets = [0, 64], sizes = [8, 32], strides = [1, 1]} : vector<8x128xf32> to vector<8x32xf32>
    %1110 = math.tanh %1109 : vector<8x32xf32>
    %1111 = vector.extract_strided_slice %1096 {offsets = [0, 96], sizes = [8, 32], strides = [1, 1]} : vector<8x128xf32> to vector<8x32xf32>
    %1112 = arith.negf %1111 : vector<8x32xf32>
    %1113 = math.exp %1112 : vector<8x32xf32>
    %cst_325 = arith.constant 1.000000e+00 : f32
    %1114 = vector.broadcast %cst_325 : f32 to vector<8x32xf32>
    %1115 = arith.addf %1114, %1113 : vector<8x32xf32>
    %1116 = arith.divf %1114, %1115 : vector<8x32xf32>
    %1117 = arith.mulf %1108, %1045 : vector<8x32xf32>
    %1118 = arith.mulf %1102, %1110 : vector<8x32xf32>
    %1119 = arith.addf %1117, %1118 : vector<8x32xf32>
    %1120 = math.tanh %1119 : vector<8x32xf32>
    %1121 = arith.mulf %1116, %1120 : vector<8x32xf32>
    %c1_i32_326 = arith.constant 1 : i32
    %1122 = arith.addi %c4_i32_306, %c1_i32_326 : i32
    %1123 = vector.broadcast %1122 : i32 to vector<8x1xi32>
    %1124 = arith.cmpi eq, %756, %1123 : vector<8x1xi32>
    %1125 = vector.shape_cast %1124 : vector<8x1xi1> to vector<8x1xi1>
    %1126 = vector.broadcast %1125 : vector<8x1xi1> to vector<8x32xi1>
    %1127 = arith.select %1126, %1121, %1053 : vector<8x32xi1>, vector<8x32xf32>
    %c5_i32_327 = arith.constant 5 : i32
    %c8_i32_328 = arith.constant 8 : i32
    %1128 = arith.muli %c5_i32_327, %c8_i32_328 : i32
    %1129 = tpu.assume_multiple %1128, 8 : i32
    %1130 = arith.index_cast %1129 : i32 to index
    %c0_329 = arith.constant 0 : index
    %1131 = vector.load %arg23[%1130, %c0_329] : memref<64x128xf32, #tpu.memory_space<vmem>>, vector<8x128xf32>
    %1132 = arith.truncf %1086 : vector<8x32xf32> to vector<8x32xbf16>
    %c0_330 = arith.constant 0 : index
    %c0_331 = arith.constant 0 : index
    %1133 = vector.load %arg11[%c0_330, %c0_331] : memref<32x128xbf16, #tpu.memory_space<vmem>>, vector<32x128xbf16>
    %cst_332 = arith.constant dense<0.000000e+00> : vector<8x128xf32>
    %1134 = tpu.matmul %1132, %1133, %cst_332 {dimension_numbers = #tpu.dot_dimension_numbers<[1], [0], [0], [1], [0, 0, 1, 1], [], []>} : vector<8x32xbf16>, vector<32x128xbf16>, vector<8x128xf32> -> vector<8x128xf32>
    %1135 = arith.addf %1131, %1134 : vector<8x128xf32>
    %1136 = vector.extract_strided_slice %1135 {offsets = [0, 0], sizes = [8, 32], strides = [1, 1]} : vector<8x128xf32> to vector<8x32xf32>
    %1137 = arith.negf %1136 : vector<8x32xf32>
    %1138 = math.exp %1137 : vector<8x32xf32>
    %cst_333 = arith.constant 1.000000e+00 : f32
    %1139 = vector.broadcast %cst_333 : f32 to vector<8x32xf32>
    %1140 = arith.addf %1139, %1138 : vector<8x32xf32>
    %1141 = arith.divf %1139, %1140 : vector<8x32xf32>
    %1142 = vector.extract_strided_slice %1135 {offsets = [0, 32], sizes = [8, 32], strides = [1, 1]} : vector<8x128xf32> to vector<8x32xf32>
    %1143 = arith.negf %1142 : vector<8x32xf32>
    %1144 = math.exp %1143 : vector<8x32xf32>
    %cst_334 = arith.constant 1.000000e+00 : f32
    %1145 = vector.broadcast %cst_334 : f32 to vector<8x32xf32>
    %1146 = arith.addf %1145, %1144 : vector<8x32xf32>
    %1147 = arith.divf %1145, %1146 : vector<8x32xf32>
    %1148 = vector.extract_strided_slice %1135 {offsets = [0, 64], sizes = [8, 32], strides = [1, 1]} : vector<8x128xf32> to vector<8x32xf32>
    %1149 = math.tanh %1148 : vector<8x32xf32>
    %1150 = vector.extract_strided_slice %1135 {offsets = [0, 96], sizes = [8, 32], strides = [1, 1]} : vector<8x128xf32> to vector<8x32xf32>
    %1151 = arith.negf %1150 : vector<8x32xf32>
    %1152 = math.exp %1151 : vector<8x32xf32>
    %cst_335 = arith.constant 1.000000e+00 : f32
    %1153 = vector.broadcast %cst_335 : f32 to vector<8x32xf32>
    %1154 = arith.addf %1153, %1152 : vector<8x32xf32>
    %1155 = arith.divf %1153, %1154 : vector<8x32xf32>
    %1156 = arith.mulf %1147, %1084 : vector<8x32xf32>
    %1157 = arith.mulf %1141, %1149 : vector<8x32xf32>
    %1158 = arith.addf %1156, %1157 : vector<8x32xf32>
    %1159 = math.tanh %1158 : vector<8x32xf32>
    %1160 = arith.mulf %1155, %1159 : vector<8x32xf32>
    %1161 = arith.truncf %1160 : vector<8x32xf32> to vector<8x32xbf16>
    %c0_336 = arith.constant 0 : index
    %c0_337 = arith.constant 0 : index
    %1162 = vector.load %arg13[%c0_336, %c0_337] : memref<32x128xbf16, #tpu.memory_space<vmem>>, vector<32x128xbf16>
    %cst_338 = arith.constant dense<0.000000e+00> : vector<8x128xf32>
    %1163 = tpu.matmul %1161, %1162, %cst_338 {dimension_numbers = #tpu.dot_dimension_numbers<[1], [0], [0], [1], [0, 0, 1, 1], [], []>} : vector<8x32xbf16>, vector<32x128xbf16>, vector<8x128xf32> -> vector<8x128xf32>
    %1164 = arith.truncf %1121 : vector<8x32xf32> to vector<8x32xbf16>
    %c0_339 = arith.constant 0 : index
    %c0_340 = arith.constant 0 : index
    %1165 = vector.load %arg14[%c0_339, %c0_340] : memref<32x128xbf16, #tpu.memory_space<vmem>>, vector<32x128xbf16>
    %cst_341 = arith.constant dense<0.000000e+00> : vector<8x128xf32>
    %1166 = tpu.matmul %1164, %1165, %cst_341 {dimension_numbers = #tpu.dot_dimension_numbers<[1], [0], [0], [1], [0, 0, 1, 1], [], []>} : vector<8x32xbf16>, vector<32x128xbf16>, vector<8x128xf32> -> vector<8x128xf32>
    %1167 = arith.addf %1163, %1166 : vector<8x128xf32>
    %c0_342 = arith.constant 0 : index
    %c0_343 = arith.constant 0 : index
    %1168 = vector.load %arg15[%c0_342, %c0_343] : memref<1x128xf32, #tpu.memory_space<vmem>>, vector<1x128xf32>
    %1169 = vector.broadcast %1168 : vector<1x128xf32> to vector<8x128xf32>
    %1170 = arith.addf %1167, %1169 : vector<8x128xf32>
    %1171 = vector.extract_strided_slice %1170 {offsets = [0, 0], sizes = [8, 32], strides = [1, 1]} : vector<8x128xf32> to vector<8x32xf32>
    %1172 = arith.negf %1171 : vector<8x32xf32>
    %1173 = math.exp %1172 : vector<8x32xf32>
    %cst_344 = arith.constant 1.000000e+00 : f32
    %1174 = vector.broadcast %cst_344 : f32 to vector<8x32xf32>
    %1175 = arith.addf %1174, %1173 : vector<8x32xf32>
    %1176 = arith.divf %1174, %1175 : vector<8x32xf32>
    %1177 = vector.extract_strided_slice %1170 {offsets = [0, 32], sizes = [8, 32], strides = [1, 1]} : vector<8x128xf32> to vector<8x32xf32>
    %1178 = arith.negf %1177 : vector<8x32xf32>
    %1179 = math.exp %1178 : vector<8x32xf32>
    %cst_345 = arith.constant 1.000000e+00 : f32
    %1180 = vector.broadcast %cst_345 : f32 to vector<8x32xf32>
    %1181 = arith.addf %1180, %1179 : vector<8x32xf32>
    %1182 = arith.divf %1180, %1181 : vector<8x32xf32>
    %1183 = vector.extract_strided_slice %1170 {offsets = [0, 64], sizes = [8, 32], strides = [1, 1]} : vector<8x128xf32> to vector<8x32xf32>
    %1184 = math.tanh %1183 : vector<8x32xf32>
    %1185 = vector.extract_strided_slice %1170 {offsets = [0, 96], sizes = [8, 32], strides = [1, 1]} : vector<8x128xf32> to vector<8x32xf32>
    %1186 = arith.negf %1185 : vector<8x32xf32>
    %1187 = math.exp %1186 : vector<8x32xf32>
    %cst_346 = arith.constant 1.000000e+00 : f32
    %1188 = vector.broadcast %cst_346 : f32 to vector<8x32xf32>
    %1189 = arith.addf %1188, %1187 : vector<8x32xf32>
    %1190 = arith.divf %1188, %1189 : vector<8x32xf32>
    %1191 = arith.mulf %1182, %1119 : vector<8x32xf32>
    %1192 = arith.mulf %1176, %1184 : vector<8x32xf32>
    %1193 = arith.addf %1191, %1192 : vector<8x32xf32>
    %1194 = math.tanh %1193 : vector<8x32xf32>
    %1195 = arith.mulf %1190, %1194 : vector<8x32xf32>
    %c1_i32_347 = arith.constant 1 : i32
    %1196 = arith.addi %c5_i32_327, %c1_i32_347 : i32
    %1197 = vector.broadcast %1196 : i32 to vector<8x1xi32>
    %1198 = arith.cmpi eq, %756, %1197 : vector<8x1xi32>
    %1199 = vector.shape_cast %1198 : vector<8x1xi1> to vector<8x1xi1>
    %1200 = vector.broadcast %1199 : vector<8x1xi1> to vector<8x32xi1>
    %1201 = arith.select %1200, %1195, %1127 : vector<8x32xi1>, vector<8x32xf32>
    %c6_i32_348 = arith.constant 6 : i32
    %c8_i32_349 = arith.constant 8 : i32
    %1202 = arith.muli %c6_i32_348, %c8_i32_349 : i32
    %1203 = tpu.assume_multiple %1202, 8 : i32
    %1204 = arith.index_cast %1203 : i32 to index
    %c0_350 = arith.constant 0 : index
    %1205 = vector.load %arg23[%1204, %c0_350] : memref<64x128xf32, #tpu.memory_space<vmem>>, vector<8x128xf32>
    %1206 = arith.truncf %1160 : vector<8x32xf32> to vector<8x32xbf16>
    %c0_351 = arith.constant 0 : index
    %c0_352 = arith.constant 0 : index
    %1207 = vector.load %arg11[%c0_351, %c0_352] : memref<32x128xbf16, #tpu.memory_space<vmem>>, vector<32x128xbf16>
    %cst_353 = arith.constant dense<0.000000e+00> : vector<8x128xf32>
    %1208 = tpu.matmul %1206, %1207, %cst_353 {dimension_numbers = #tpu.dot_dimension_numbers<[1], [0], [0], [1], [0, 0, 1, 1], [], []>} : vector<8x32xbf16>, vector<32x128xbf16>, vector<8x128xf32> -> vector<8x128xf32>
    %1209 = arith.addf %1205, %1208 : vector<8x128xf32>
    %1210 = vector.extract_strided_slice %1209 {offsets = [0, 0], sizes = [8, 32], strides = [1, 1]} : vector<8x128xf32> to vector<8x32xf32>
    %1211 = arith.negf %1210 : vector<8x32xf32>
    %1212 = math.exp %1211 : vector<8x32xf32>
    %cst_354 = arith.constant 1.000000e+00 : f32
    %1213 = vector.broadcast %cst_354 : f32 to vector<8x32xf32>
    %1214 = arith.addf %1213, %1212 : vector<8x32xf32>
    %1215 = arith.divf %1213, %1214 : vector<8x32xf32>
    %1216 = vector.extract_strided_slice %1209 {offsets = [0, 32], sizes = [8, 32], strides = [1, 1]} : vector<8x128xf32> to vector<8x32xf32>
    %1217 = arith.negf %1216 : vector<8x32xf32>
    %1218 = math.exp %1217 : vector<8x32xf32>
    %cst_355 = arith.constant 1.000000e+00 : f32
    %1219 = vector.broadcast %cst_355 : f32 to vector<8x32xf32>
    %1220 = arith.addf %1219, %1218 : vector<8x32xf32>
    %1221 = arith.divf %1219, %1220 : vector<8x32xf32>
    %1222 = vector.extract_strided_slice %1209 {offsets = [0, 64], sizes = [8, 32], strides = [1, 1]} : vector<8x128xf32> to vector<8x32xf32>
    %1223 = math.tanh %1222 : vector<8x32xf32>
    %1224 = vector.extract_strided_slice %1209 {offsets = [0, 96], sizes = [8, 32], strides = [1, 1]} : vector<8x128xf32> to vector<8x32xf32>
    %1225 = arith.negf %1224 : vector<8x32xf32>
    %1226 = math.exp %1225 : vector<8x32xf32>
    %cst_356 = arith.constant 1.000000e+00 : f32
    %1227 = vector.broadcast %cst_356 : f32 to vector<8x32xf32>
    %1228 = arith.addf %1227, %1226 : vector<8x32xf32>
    %1229 = arith.divf %1227, %1228 : vector<8x32xf32>
    %1230 = arith.mulf %1221, %1158 : vector<8x32xf32>
    %1231 = arith.mulf %1215, %1223 : vector<8x32xf32>
    %1232 = arith.addf %1230, %1231 : vector<8x32xf32>
    %1233 = math.tanh %1232 : vector<8x32xf32>
    %1234 = arith.mulf %1229, %1233 : vector<8x32xf32>
    %1235 = arith.truncf %1234 : vector<8x32xf32> to vector<8x32xbf16>
    %c0_357 = arith.constant 0 : index
    %c0_358 = arith.constant 0 : index
    %1236 = vector.load %arg13[%c0_357, %c0_358] : memref<32x128xbf16, #tpu.memory_space<vmem>>, vector<32x128xbf16>
    %cst_359 = arith.constant dense<0.000000e+00> : vector<8x128xf32>
    %1237 = tpu.matmul %1235, %1236, %cst_359 {dimension_numbers = #tpu.dot_dimension_numbers<[1], [0], [0], [1], [0, 0, 1, 1], [], []>} : vector<8x32xbf16>, vector<32x128xbf16>, vector<8x128xf32> -> vector<8x128xf32>
    %1238 = arith.truncf %1195 : vector<8x32xf32> to vector<8x32xbf16>
    %c0_360 = arith.constant 0 : index
    %c0_361 = arith.constant 0 : index
    %1239 = vector.load %arg14[%c0_360, %c0_361] : memref<32x128xbf16, #tpu.memory_space<vmem>>, vector<32x128xbf16>
    %cst_362 = arith.constant dense<0.000000e+00> : vector<8x128xf32>
    %1240 = tpu.matmul %1238, %1239, %cst_362 {dimension_numbers = #tpu.dot_dimension_numbers<[1], [0], [0], [1], [0, 0, 1, 1], [], []>} : vector<8x32xbf16>, vector<32x128xbf16>, vector<8x128xf32> -> vector<8x128xf32>
    %1241 = arith.addf %1237, %1240 : vector<8x128xf32>
    %c0_363 = arith.constant 0 : index
    %c0_364 = arith.constant 0 : index
    %1242 = vector.load %arg15[%c0_363, %c0_364] : memref<1x128xf32, #tpu.memory_space<vmem>>, vector<1x128xf32>
    %1243 = vector.broadcast %1242 : vector<1x128xf32> to vector<8x128xf32>
    %1244 = arith.addf %1241, %1243 : vector<8x128xf32>
    %1245 = vector.extract_strided_slice %1244 {offsets = [0, 0], sizes = [8, 32], strides = [1, 1]} : vector<8x128xf32> to vector<8x32xf32>
    %1246 = arith.negf %1245 : vector<8x32xf32>
    %1247 = math.exp %1246 : vector<8x32xf32>
    %cst_365 = arith.constant 1.000000e+00 : f32
    %1248 = vector.broadcast %cst_365 : f32 to vector<8x32xf32>
    %1249 = arith.addf %1248, %1247 : vector<8x32xf32>
    %1250 = arith.divf %1248, %1249 : vector<8x32xf32>
    %1251 = vector.extract_strided_slice %1244 {offsets = [0, 32], sizes = [8, 32], strides = [1, 1]} : vector<8x128xf32> to vector<8x32xf32>
    %1252 = arith.negf %1251 : vector<8x32xf32>
    %1253 = math.exp %1252 : vector<8x32xf32>
    %cst_366 = arith.constant 1.000000e+00 : f32
    %1254 = vector.broadcast %cst_366 : f32 to vector<8x32xf32>
    %1255 = arith.addf %1254, %1253 : vector<8x32xf32>
    %1256 = arith.divf %1254, %1255 : vector<8x32xf32>
    %1257 = vector.extract_strided_slice %1244 {offsets = [0, 64], sizes = [8, 32], strides = [1, 1]} : vector<8x128xf32> to vector<8x32xf32>
    %1258 = math.tanh %1257 : vector<8x32xf32>
    %1259 = vector.extract_strided_slice %1244 {offsets = [0, 96], sizes = [8, 32], strides = [1, 1]} : vector<8x128xf32> to vector<8x32xf32>
    %1260 = arith.negf %1259 : vector<8x32xf32>
    %1261 = math.exp %1260 : vector<8x32xf32>
    %cst_367 = arith.constant 1.000000e+00 : f32
    %1262 = vector.broadcast %cst_367 : f32 to vector<8x32xf32>
    %1263 = arith.addf %1262, %1261 : vector<8x32xf32>
    %1264 = arith.divf %1262, %1263 : vector<8x32xf32>
    %1265 = arith.mulf %1256, %1193 : vector<8x32xf32>
    %1266 = arith.mulf %1250, %1258 : vector<8x32xf32>
    %1267 = arith.addf %1265, %1266 : vector<8x32xf32>
    %1268 = math.tanh %1267 : vector<8x32xf32>
    %1269 = arith.mulf %1264, %1268 : vector<8x32xf32>
    %c1_i32_368 = arith.constant 1 : i32
    %1270 = arith.addi %c6_i32_348, %c1_i32_368 : i32
    %1271 = vector.broadcast %1270 : i32 to vector<8x1xi32>
    %1272 = arith.cmpi eq, %756, %1271 : vector<8x1xi32>
    %1273 = vector.shape_cast %1272 : vector<8x1xi1> to vector<8x1xi1>
    %1274 = vector.broadcast %1273 : vector<8x1xi1> to vector<8x32xi1>
    %1275 = arith.select %1274, %1269, %1201 : vector<8x32xi1>, vector<8x32xf32>
    %c7_i32_369 = arith.constant 7 : i32
    %c8_i32_370 = arith.constant 8 : i32
    %1276 = arith.muli %c7_i32_369, %c8_i32_370 : i32
    %1277 = tpu.assume_multiple %1276, 8 : i32
    %1278 = arith.index_cast %1277 : i32 to index
    %c0_371 = arith.constant 0 : index
    %1279 = vector.load %arg23[%1278, %c0_371] : memref<64x128xf32, #tpu.memory_space<vmem>>, vector<8x128xf32>
    %1280 = arith.truncf %1234 : vector<8x32xf32> to vector<8x32xbf16>
    %c0_372 = arith.constant 0 : index
    %c0_373 = arith.constant 0 : index
    %1281 = vector.load %arg11[%c0_372, %c0_373] : memref<32x128xbf16, #tpu.memory_space<vmem>>, vector<32x128xbf16>
    %cst_374 = arith.constant dense<0.000000e+00> : vector<8x128xf32>
    %1282 = tpu.matmul %1280, %1281, %cst_374 {dimension_numbers = #tpu.dot_dimension_numbers<[1], [0], [0], [1], [0, 0, 1, 1], [], []>} : vector<8x32xbf16>, vector<32x128xbf16>, vector<8x128xf32> -> vector<8x128xf32>
    %1283 = arith.addf %1279, %1282 : vector<8x128xf32>
    %1284 = vector.extract_strided_slice %1283 {offsets = [0, 0], sizes = [8, 32], strides = [1, 1]} : vector<8x128xf32> to vector<8x32xf32>
    %1285 = arith.negf %1284 : vector<8x32xf32>
    %1286 = math.exp %1285 : vector<8x32xf32>
    %cst_375 = arith.constant 1.000000e+00 : f32
    %1287 = vector.broadcast %cst_375 : f32 to vector<8x32xf32>
    %1288 = arith.addf %1287, %1286 : vector<8x32xf32>
    %1289 = arith.divf %1287, %1288 : vector<8x32xf32>
    %1290 = vector.extract_strided_slice %1283 {offsets = [0, 32], sizes = [8, 32], strides = [1, 1]} : vector<8x128xf32> to vector<8x32xf32>
    %1291 = arith.negf %1290 : vector<8x32xf32>
    %1292 = math.exp %1291 : vector<8x32xf32>
    %cst_376 = arith.constant 1.000000e+00 : f32
    %1293 = vector.broadcast %cst_376 : f32 to vector<8x32xf32>
    %1294 = arith.addf %1293, %1292 : vector<8x32xf32>
    %1295 = arith.divf %1293, %1294 : vector<8x32xf32>
    %1296 = vector.extract_strided_slice %1283 {offsets = [0, 64], sizes = [8, 32], strides = [1, 1]} : vector<8x128xf32> to vector<8x32xf32>
    %1297 = math.tanh %1296 : vector<8x32xf32>
    %1298 = vector.extract_strided_slice %1283 {offsets = [0, 96], sizes = [8, 32], strides = [1, 1]} : vector<8x128xf32> to vector<8x32xf32>
    %1299 = arith.negf %1298 : vector<8x32xf32>
    %1300 = math.exp %1299 : vector<8x32xf32>
    %cst_377 = arith.constant 1.000000e+00 : f32
    %1301 = vector.broadcast %cst_377 : f32 to vector<8x32xf32>
    %1302 = arith.addf %1301, %1300 : vector<8x32xf32>
    %1303 = arith.divf %1301, %1302 : vector<8x32xf32>
    %1304 = arith.mulf %1295, %1232 : vector<8x32xf32>
    %1305 = arith.mulf %1289, %1297 : vector<8x32xf32>
    %1306 = arith.addf %1304, %1305 : vector<8x32xf32>
    %1307 = math.tanh %1306 : vector<8x32xf32>
    %1308 = arith.mulf %1303, %1307 : vector<8x32xf32>
    %1309 = arith.truncf %1308 : vector<8x32xf32> to vector<8x32xbf16>
    %c0_378 = arith.constant 0 : index
    %c0_379 = arith.constant 0 : index
    %1310 = vector.load %arg13[%c0_378, %c0_379] : memref<32x128xbf16, #tpu.memory_space<vmem>>, vector<32x128xbf16>
    %cst_380 = arith.constant dense<0.000000e+00> : vector<8x128xf32>
    %1311 = tpu.matmul %1309, %1310, %cst_380 {dimension_numbers = #tpu.dot_dimension_numbers<[1], [0], [0], [1], [0, 0, 1, 1], [], []>} : vector<8x32xbf16>, vector<32x128xbf16>, vector<8x128xf32> -> vector<8x128xf32>
    %1312 = arith.truncf %1269 : vector<8x32xf32> to vector<8x32xbf16>
    %c0_381 = arith.constant 0 : index
    %c0_382 = arith.constant 0 : index
    %1313 = vector.load %arg14[%c0_381, %c0_382] : memref<32x128xbf16, #tpu.memory_space<vmem>>, vector<32x128xbf16>
    %cst_383 = arith.constant dense<0.000000e+00> : vector<8x128xf32>
    %1314 = tpu.matmul %1312, %1313, %cst_383 {dimension_numbers = #tpu.dot_dimension_numbers<[1], [0], [0], [1], [0, 0, 1, 1], [], []>} : vector<8x32xbf16>, vector<32x128xbf16>, vector<8x128xf32> -> vector<8x128xf32>
    %1315 = arith.addf %1311, %1314 : vector<8x128xf32>
    %c0_384 = arith.constant 0 : index
    %c0_385 = arith.constant 0 : index
    %1316 = vector.load %arg15[%c0_384, %c0_385] : memref<1x128xf32, #tpu.memory_space<vmem>>, vector<1x128xf32>
    %1317 = vector.broadcast %1316 : vector<1x128xf32> to vector<8x128xf32>
    %1318 = arith.addf %1315, %1317 : vector<8x128xf32>
    %1319 = vector.extract_strided_slice %1318 {offsets = [0, 0], sizes = [8, 32], strides = [1, 1]} : vector<8x128xf32> to vector<8x32xf32>
    %1320 = arith.negf %1319 : vector<8x32xf32>
    %1321 = math.exp %1320 : vector<8x32xf32>
    %cst_386 = arith.constant 1.000000e+00 : f32
    %1322 = vector.broadcast %cst_386 : f32 to vector<8x32xf32>
    %1323 = arith.addf %1322, %1321 : vector<8x32xf32>
    %1324 = arith.divf %1322, %1323 : vector<8x32xf32>
    %1325 = vector.extract_strided_slice %1318 {offsets = [0, 32], sizes = [8, 32], strides = [1, 1]} : vector<8x128xf32> to vector<8x32xf32>
    %1326 = arith.negf %1325 : vector<8x32xf32>
    %1327 = math.exp %1326 : vector<8x32xf32>
    %cst_387 = arith.constant 1.000000e+00 : f32
    %1328 = vector.broadcast %cst_387 : f32 to vector<8x32xf32>
    %1329 = arith.addf %1328, %1327 : vector<8x32xf32>
    %1330 = arith.divf %1328, %1329 : vector<8x32xf32>
    %1331 = vector.extract_strided_slice %1318 {offsets = [0, 64], sizes = [8, 32], strides = [1, 1]} : vector<8x128xf32> to vector<8x32xf32>
    %1332 = math.tanh %1331 : vector<8x32xf32>
    %1333 = vector.extract_strided_slice %1318 {offsets = [0, 96], sizes = [8, 32], strides = [1, 1]} : vector<8x128xf32> to vector<8x32xf32>
    %1334 = arith.negf %1333 : vector<8x32xf32>
    %1335 = math.exp %1334 : vector<8x32xf32>
    %cst_388 = arith.constant 1.000000e+00 : f32
    %1336 = vector.broadcast %cst_388 : f32 to vector<8x32xf32>
    %1337 = arith.addf %1336, %1335 : vector<8x32xf32>
    %1338 = arith.divf %1336, %1337 : vector<8x32xf32>
    %1339 = arith.mulf %1330, %1267 : vector<8x32xf32>
    %1340 = arith.mulf %1324, %1332 : vector<8x32xf32>
    %1341 = arith.addf %1339, %1340 : vector<8x32xf32>
    %1342 = math.tanh %1341 : vector<8x32xf32>
    %1343 = arith.mulf %1338, %1342 : vector<8x32xf32>
    %c1_i32_389 = arith.constant 1 : i32
    %1344 = arith.addi %c7_i32_369, %c1_i32_389 : i32
    %1345 = vector.broadcast %1344 : i32 to vector<8x1xi32>
    %1346 = arith.cmpi eq, %756, %1345 : vector<8x1xi32>
    %1347 = vector.shape_cast %1346 : vector<8x1xi1> to vector<8x1xi1>
    %1348 = vector.broadcast %1347 : vector<8x1xi1> to vector<8x32xi1>
    %1349 = arith.select %1348, %1343, %1275 : vector<8x32xi1>, vector<8x32xf32>
    %c8_i32_390 = arith.constant 8 : i32
    %1350 = arith.truncf %748 : vector<8x32xf32> to vector<8x32xbf16>
    %c0_391 = arith.constant 0 : index
    %c0_392 = arith.constant 0 : index
    %1351 = vector.load %arg16[%c0_391, %c0_392] : memref<32x32xbf16, #tpu.memory_space<vmem>>, vector<32x32xbf16>
    %cst_393 = arith.constant dense<0.000000e+00> : vector<8x32xf32>
    %1352 = tpu.matmul %1350, %1351, %cst_393 {dimension_numbers = #tpu.dot_dimension_numbers<[1], [0], [0], [1], [0, 0, 1, 1], [], []>} : vector<8x32xbf16>, vector<32x32xbf16>, vector<8x32xf32> -> vector<8x32xf32>
    %1353 = arith.truncf %1349 : vector<8x32xf32> to vector<8x32xbf16>
    %c0_394 = arith.constant 0 : index
    %c0_395 = arith.constant 0 : index
    %1354 = vector.load %arg17[%c0_394, %c0_395] : memref<32x32xbf16, #tpu.memory_space<vmem>>, vector<32x32xbf16>
    %cst_396 = arith.constant dense<0.000000e+00> : vector<8x32xf32>
    %1355 = tpu.matmul %1353, %1354, %cst_396 {dimension_numbers = #tpu.dot_dimension_numbers<[1], [0], [0], [1], [0, 0, 1, 1], [], []>} : vector<8x32xbf16>, vector<32x32xbf16>, vector<8x32xf32> -> vector<8x32xf32>
    %1356 = arith.addf %1352, %1355 : vector<8x32xf32>
    %c0_397 = arith.constant 0 : index
    %c0_398 = arith.constant 0 : index
    %1357 = vector.load %arg18[%c0_397, %c0_398] : memref<1x32xf32, #tpu.memory_space<vmem>>, vector<1x32xf32>
    %1358 = vector.broadcast %1357 : vector<1x32xf32> to vector<8x32xf32>
    %1359 = arith.addf %1356, %1358 : vector<8x32xf32>
    %cst_399 = arith.constant 0.000000e+00 : f32
    %1360 = vector.broadcast %cst_399 : f32 to vector<8x32xf32>
    %1361 = arith.cmpf oge, %1359, %1360 : vector<8x32xf32>
    %cst_400 = arith.constant 0.00999999977 : f32
    %1362 = vector.broadcast %cst_400 : f32 to vector<8x32xf32>
    %1363 = arith.mulf %1362, %1359 : vector<8x32xf32>
    %1364 = arith.select %1361, %1359, %1363 : vector<8x32xi1>, vector<8x32xf32>
    %c0_401 = arith.constant 0 : index
    %c0_402 = arith.constant 0 : index
    %1365 = vector.load %arg19[%c0_401, %c0_402] : memref<1x32xf32, #tpu.memory_space<vmem>>, vector<1x32xf32>
    %1366 = vector.broadcast %1365 : vector<1x32xf32> to vector<8x32xf32>
    %1367 = arith.mulf %1364, %1366 : vector<8x32xf32>
    %cst_403 = arith.constant dense<0.000000e+00> : vector<8xf32>
    %1368 = vector.multi_reduction <add>, %1367, %cst_403 [1] : vector<8x32xf32> to vector<8xf32>
    %1369 = vector.shape_cast %1368 : vector<8xf32> to vector<8x1xf32>
    %c0_404 = arith.constant 0 : index
    %c0_405 = arith.constant 0 : index
    %1370 = vector.load %arg20[%c0_404, %c0_405] : memref<1x1xf32, #tpu.memory_space<vmem>>, vector<1x1xf32>
    %1371 = vector.broadcast %1370 : vector<1x1xf32> to vector<8x1xf32>
    %1372 = arith.addf %1369, %1371 : vector<8x1xf32>
    %1373 = arith.negf %1372 : vector<8x1xf32>
    %1374 = math.exp %1373 : vector<8x1xf32>
    %cst_406 = arith.constant 1.000000e+00 : f32
    %1375 = vector.broadcast %cst_406 : f32 to vector<8x1xf32>
    %1376 = arith.addf %1375, %1374 : vector<8x1xf32>
    %1377 = arith.divf %1375, %1376 : vector<8x1xf32>
    %c0_407 = arith.constant 0 : index
    %c0_408 = arith.constant 0 : index
    %1378 = vector.load %arg21[%c0_407, %c0_408] : memref<8x1xf32, #tpu.memory_space<vmem>>, vector<8x1xf32>
    tpu.vector_store %arg21[%c0_407, %c0_408], %1377 {strides = array<i32>} : memref<8x1xf32, #tpu.memory_space<vmem>>, vector<8x1xf32>,
    return
  }
}

</mosaic_0001>

<bundles_post_ra>
// kernel: double_lstm_classifier_forward.1
= control target key start
LH: loop header
LB: loop body
LE: loop exit
PB: predicated region body
PF: predicated region fallthrough
CT: control target
= control target key end

     0   :  { %v5224_v0 = vmov 0.0   ;;  %vm5225_vm0 = vmmov 0   ;;  %vm121_vm1 = vcmask 130048   ;;  %v5226_v4 = vmov 0   ;;  %s5227_s24 = smov 64   ;;  %s6427_s4 = inlined_call_operand.vmem [shape: bf16[16,128], index: 4, kind: input, shape index: {}]   ;;  %s6428_s5 = inlined_call_operand.vmem [shape: bf16[32,128], index: 5, kind: input, shape index: {}]   ;;  %s6429_s0 = inlined_call_operand.vmem [shape: bf16[80,16], index: 0, kind: input, shape index: {}]   ;;  %s6430_s6 = inlined_call_operand.vmem [shape: f32[1,128], index: 6, kind: input, shape index: {}]   ;;  %s6431_s8 = inlined_call_operand.vmem [shape: bf16[32,128], index: 8, kind: input, shape index: {}]   ;;  %s6432_s7 = inlined_call_operand.vmem [shape: bf16[32,128], index: 7, kind: input, shape index: {}]   ;;  %s6433_s9 = inlined_call_operand.vmem [shape: f32[1,128], index: 9, kind: input, shape index: {}]   ;;  %s6434_s10 = inlined_call_operand.vmem [shape: bf16[16,128], index: 10, kind: input, shape index: {}]   ;;  %s6435_s11 = inlined_call_operand.vmem [shape: bf16[32,128], index: 11, kind: input, shape index: {}]   ;;  %s6436_s2 = inlined_call_operand.vmem [shape: bf16[64,16], index: 2, kind: input, shape index: {}]   ;;  %s6437_s12 = inlined_call_operand.vmem [shape: f32[1,128], index: 12, kind: input, shape index: {}]   ;;  %s6438_s14 = inlined_call_operand.vmem [shape: bf16[32,128], index: 14, kind: input, shape index: {}]   ;;  %s6439_s13 = inlined_call_operand.vmem [shape: bf16[32,128], index: 13, kind: input, shape index: {}]   ;;  %s6440_s15 = inlined_call_operand.vmem [shape: f32[1,128], index: 15, kind: input, shape index: {}]   ;;  %s6441_s1 = inlined_call_operand.vmem [shape: s32[8,1], index: 1, kind: input, shape index: {}]   ;;  %s6442_s3 = inlined_call_operand.vmem [shape: s32[8,1], index: 3, kind: input, shape index: {}]   ;;  %s6443_s16 = inlined_call_operand.vmem [shape: bf16[32,32], index: 16, kind: input, shape index: {}]   ;;  %s6444_s17 = inlined_call_operand.vmem [shape: bf16[32,32], index: 17, kind: input, shape index: {}]   ;;  %s6445_s20 = inlined_call_operand.<no memory space> [shape: f32[1,1], index: 20, kind: input, shape index: {}]   ;;  %s6446_s18 = inlined_call_operand.vmem [shape: f32[1,32], index: 18, kind: input, shape index: {}]   ;;  %s6447_s19 = inlined_call_operand.vmem [shape: f32[1,32], index: 19, kind: input, shape index: {}]   ;;  %s6448_s21 = inlined_call_operand.vmem [shape: f32[8,1], index: 21, kind: output, shape index: {}]  }
   0x1   :  { %6454 = sst [smem:[#allocation5_spill]] %s6427_s4  ;;  %4401 = vmatprep.subr.bf16.mxu0 %v5224_v0  ;;  %4423 = vmatprep.subr.bf16.mxu1 %v5224_v0  ;;  %vm238_vm2 = vcmask 261120   ;;  %v5441_v41 = vld [vmem:[%s6433_s9] ss:$0 sm:$0xff] }
   0x2   :  { %6455 = sst [smem:[#allocation6_spill]] %s6428_s5  ;;  %s6460_s26 = sld [smem:[#allocation5_spill]]  ;;  %4403 = vmatprep.mubr.msk.bf16.mxu0 %vm5225_vm0, %v5224_v0  ;;  %4427 = vmatprep.mubr.msk.bf16.mxu1 %vm5225_vm0, %v5224_v0 }
   0x3   :  { %6456 = sst [smem:[#allocation7_spill]] %s6429_s0  ;;  %s6461_s28 = sld [smem:[#allocation6_spill]]  ;;  %4886 = vset.pattern.permute.xlu0 %v5226_v4  ;;  %4887 = vset.pattern.permute.xlu1 %v5226_v4 }
   0x4   :  { %6457 = sst [smem:[#allocation8_spill]] %s6430_s6  ;;  %s5228_s0 = smov 32  }
   0x5   :  { %6458 = sst [smem:[#allocation9_spill]] %s6431_s8  ;;  %s6462_s8 = sld [smem:[#allocation7_spill]] }
   0x6   :  { %6459 = sst [smem:[#allocation10_spill]] %s6432_s7  ;;  %s6463_s5 = sld [smem:[#allocation8_spill]] }
   0x7   :  { %s6464_s27 = sld [smem:[#allocation9_spill]]  ;;  %s6465_s7 = sld [smem:[#allocation10_spill]] }
   0x8   :  { %v4888_v1 = vld [vmem:[%s6460_s26] sm:$0xff]  }
   0x9   :  { %v5347_v2 = vld [vmem:[%s6461_s28] sm:$0xff]   ;;  %4402 = vmatpush3.bf16.msra.mxu0 %v4888_v1  ;;  %v5361_v5 = vld [vmem:[%s6461_s28 + $0x8] sm:$0xff]  }
   0xa   :  { %4424 = vmatpush3.bf16.msra.mxu1 %v5347_v2  ;;  %4463 = vmatprep.subr.bf16.mxu0 %v5224_v0 }
   0xb   :  { %v4890_v3 = vld [vmem:[%s6462_s8] sm:$0xff]   ;;  %4425 = vmatprep.subr.bf16.mxu1 %v5224_v0 }
   0xc   :  { %4404 = vmatmul.mubr.msk.bf16.vlgmr.msra.gmra.mrb[0].mxu0 %vm121_vm1, %v4890_v3  ;;  %v5377_v6 = vld [vmem:[%s6463_s5] ss:$0 sm:$0xff] }
   0xd   :  { %4407 = vmatprep.mubr.msk.bf16.mxu0 %vm5225_vm0, %v5224_v0  ;;  %v5390_v27 = vld [vmem:[%s6464_s27] sm:$0xff]   ;;  %v5395_v28 = vld [vmem:[%s6464_s27 + $0x8] sm:$0xff]  }
   0xe   :  { %4426 = vmatpush3.bf16.msra.mxu1 %v5361_v5  ;;  %v5401_v29 = vld [vmem:[%s6465_s7] sm:$0xff]   ;;  %v5410_v30 = vld [vmem:[%s6465_s7 + $0x8] sm:$0xff]  }
   0xf   :  { %4431 = vmatprep.subr.bf16.mxu1 %v5224_v0  ;;  %4464 = vmatpush3.bf16.msra.mxu0 %v5401_v29 }
  0x10   :  { %4465 = vmatprep.subr.bf16.mxu0 %v5224_v0 }
  0x11   :  { %4428 = vmatmul.mubr.bf16.vlgmr.msra.gmra.mrb[0].mxu1 %v5226_v4 }
  0x12   :  { %4435 = vmatprep.mubr.msk.bf16.mxu1 %vm5225_vm0, %v5224_v0  ;;  %4432 = vmatpush3.bf16.msra.mxu1 %v5390_v27 }
  0x13   :  { %4433 = vmatprep.subr.bf16.mxu1 %v5224_v0  ;;  %4466 = vmatpush3.bf16.msra.mxu0 %v5410_v30 }
  0x14   :  { %4479 = vmatprep.subr.bf16.mxu0 %v5224_v0 }
  0x16   :  { %4434 = vmatpush3.bf16.msra.mxu1 %v5395_v28 }
  0x17   :  { %4439 = vmatprep.subr.bf16.mxu1 %v5224_v0 }
  0x19   :  { %4436 = vmatmul.mubr.bf16.vlgmr.msra.gmra.mrb[4].mxu1 %v5226_v4 }
  0x1a   :  { %4440 = vmatpush3.bf16.msra.mxu1 %v5401_v29  ;;  %4443 = vmatprep.mubr.msk.bf16.mxu1 %vm5225_vm0, %v5224_v0 }
  0x1b   :  { %4441 = vmatprep.subr.bf16.mxu1 %v5224_v0 }
  0x1e   :  { %4442 = vmatpush3.bf16.msra.mxu1 %v5410_v30 }
  0x1f   :  { %4447 = vmatprep.subr.bf16.mxu1 %v5224_v0 }
  0xdf   :  { %v171_v7 = vpop.f32.mrb[0].mxu0 }
  0xe0   :  { %v4405_v8 = vpop.f32.mrb[1].mxu0  ;;  %v172_v9 = vadd.f32 %v5377_v6, %v171_v7 }
  0xe1   :  { %v5380_v10 = vpop.f32.mrb[2].mxu0 }
  0xe2   :  { %v4406_v11 = vpop.f32.mrb[3].mxu0  ;;  %v175_v47 = vadd.f32 %v5377_v6, %v5380_v10 }
  0xe4   :  { %v276_v12 = vpop.f32.mrb[0].mxu1 }
  0xe5   :  { %v282_v13 = vadd.f32 %v276_v12, %v172_v9  ;;  %v4429_v14 = vpop.f32.mrb[1].mxu1 }
  0xe6   :  { %v279_v15 = vpop.f32.mrb[2].mxu1  ;;  %v4896_v14 = vld [vmem:[%s6462_s8 + $0x8] sm:$0xff]  }
  0xe7   :  { %4915 = vtanh.f32 %v282_v13  ;;  %v4430_v16 = vpop.f32.mrb[3].mxu1  ;;  %v4104_v18 = vmul.f32 -1.442695, %v282_v13  ;;  %4408 = vmatmul.mubr.msk.bf16.gmra.mrb[4].mxu0 %vm121_vm1, %v4896_v14 }
  0xe8   :  { %4411 = vmatprep.mubr.msk.bf16.mxu0 %vm5225_vm0, %v5224_v0  ;;  %v4897_v16 = vld [vmem:[%s6462_s8 + $0x10] sm:$0xff]  }
  0xe9   :  { %4917 = vpow2.f32 %v4104_v18  ;;  %v4898_v18 = vld [vmem:[%s6462_s8 + $0x18] sm:$0xff]  }
  0xec   :  { %v362_v35 = vpop.f32.mrb[4].mxu1 }
  0xed   :  { %v4437_v36 = vpop.f32.mrb[5].mxu1 }
  0xee   :  { %v365_v37 = vpop.f32.mrb[6].mxu1 }
  0xef   :  { %v4438_v38 = vpop.f32.mrb[7].mxu1  ;;  %4412 = vmatmul.mubr.msk.bf16.gmra.mrb[8].mxu0 %vm121_vm1, %v4897_v16 }
  0xf0   :  { %4415 = vmatprep.mubr.msk.bf16.mxu0 %vm5225_vm0, %v5224_v0 }
  0xf1   :  { %v4916_v17 = vpop.eup %4915 }
  0xf2   :  { %292 = vrot.lane.b32.xlu0 %v4916_v17, %s5227_s24 }
  0xf3   :  { %v4918_v19 = vpop.eup %4917 }
  0xf4   :  { %v286_v20 = vadd.f32 1.0, %v4918_v19  ;;  %v4899_v19 = vld [vmem:[%s6462_s8 + $0x20] sm:$0xff]  }
  0xf6   :  { %4919 = vrcp.f32 %v286_v20 }
  0xf7   :  { %4416 = vmatmul.mubr.msk.bf16.gmra.mrb[12].mxu0 %vm121_vm1, %v4898_v18 }
  0xf8   :  { %4419 = vmatprep.mubr.msk.bf16.mxu0 %vm5225_vm0, %v5224_v0 }
  0xff   :  { %4420 = vmatmul.mubr.msk.bf16.gmra.mrb[16].mxu0 %vm121_vm1, %v4899_v19 }
 0x100   :  { %v4920_v21 = vpop.eup %4919  ;;  %4467 = vmatprep.mubr.msk.bf16.mxu0 %vm5225_vm0, %v5224_v0 }
 0x101   :  { %v290_v24 = vmul.f32 0.0, %v4920_v21 }
 0x164   :  { %v293_v22 = vpop.permute.xlu0 %292 }
 0x165   :  { %v295_v23 = vmul.f32 %v4920_v21, %v293_v22 }
 0x167   :  { %297 = vrot.lane.b32.xlu0 %v295_v23, %s5228_s0 }
 0x1d9   :  { %v298_v25 = vpop.permute.xlu0 %297 }
 0x1da   :  { %v5384_v26 = vadd.f32 %v298_v25, %v290_v24 }
 0x1dc   :  { %4921 = vtanh.f32 %v5384_v26 }
 0x1e6   :  { %v4922_v31 = vpop.eup %4921 }
 0x1e7   :  { %303 = vrot.lane.b32.xlu1 %v4922_v31, %s5227_s24 }
 0x259   :  { %v304_v32 = vpop.permute.xlu1 %303 }
 0x25a   :  { %v306_v33 = vmul.f32 %v4920_v21, %v304_v32 }
 0x25c   :  { %v307_v34 = vpack.c.bf16 %v306_v33, %v306_v33 }
 0x25e   :  { %369 = vrot.lane.b32.xlu1 %v307_v34, %s5228_s0 }
 0x2d0   :  { %v370_v39 = vpop.permute.xlu1 %369 }
 0x2d1   :  { %4444 = vmatmul.mubr.msk.bf16.vlgmr.msra.gmra.mrb[8].mxu1 %vm238_vm2, %v370_v39 }
 0x2d2   :  { %4448 = vmatpush3.bf16.msra.mxu1 %v5347_v2  ;;  %4451 = vmatprep.mubr.msk.bf16.mxu1 %vm5225_vm0, %v5224_v0 }
 0x2d3   :  { %4449 = vmatprep.subr.bf16.mxu1 %v5224_v0 }
 0x2d6   :  { %4450 = vmatpush3.bf16.msra.mxu1 %v5361_v5 }
 0x2d7   :  { %4455 = vmatprep.subr.bf16.mxu1 %v5224_v0 }
 0x2d9   :  { %4452 = vmatmul.mubr.msk.bf16.vlgmr.msra.gmra.mrb[12].mxu1 %vm238_vm2, %v370_v39 }
 0x2da   :  { %4456 = vmatpush3.bf16.msra.mxu1 %v5390_v27  ;;  %4459 = vmatprep.mubr.msk.bf16.mxu1 %vm5225_vm0, %v5224_v0 }
 0x2db   :  { %4457 = vmatprep.subr.bf16.mxu1 %v5224_v0 }
 0x2de   :  { %4458 = vmatpush3.bf16.msra.mxu1 %v5395_v28 }
 0x2df   :  { %4471 = vmatprep.subr.bf16.mxu1 %v5224_v0 }
 0x3a4   :  { %v420_v40 = vpop.f32.mrb[8].mxu1 }
 0x3a5   :  { %v421_v42 = vadd.f32 %v420_v40, %v362_v35  ;;  %v4445_v43 = vpop.f32.mrb[9].mxu1 }
 0x3a6   :  { %v423_v44 = vpop.f32.mrb[10].mxu1 }
 0x3a7   :  { %v433_v45 = vadd.f32 %v5441_v41, %v421_v42  ;;  %v4446_v46 = vpop.f32.mrb[11].mxu1 }
 0x3a9   :  { %4923 = vtanh.f32 %v433_v45  ;;  %v4111_v55 = vmul.f32 -1.442695, %v433_v45 }
 0x3ac   :  { %v501_v48 = vpop.f32.mrb[12].mxu1 }
 0x3ad   :  { %v507_v49 = vadd.f32 %v501_v48, %v175_v47  ;;  %v4453_v50 = vpop.f32.mrb[13].mxu1 }
 0x3ae   :  { %v504_v51 = vpop.f32.mrb[14].mxu1 }
 0x3af   :  { %4925 = vtanh.f32 %v507_v49  ;;  %v4454_v52 = vpop.f32.mrb[15].mxu1  ;;  %v4113_v56 = vmul.f32 -1.442695, %v507_v49 }
 0x3b0   :  { %4927 = vpow2.f32 %v4111_v55 }
 0x3b1   :  { %4929 = vpow2.f32 %v4113_v56 }
 0x3b3   :  { %v4924_v53 = vpop.eup %4923 }
 0x3b4   :  { %443 = vrot.lane.b32.xlu0 %v4924_v53, %s5227_s24 }
 0x3b9   :  { %v4926_v54 = vpop.eup %4925 }
 0x3ba   :  { %517 = vrot.lane.b32.xlu1 %v4926_v54, %s5227_s24  ;;  %v4928_v57 = vpop.eup %4927 }
 0x3bb   :  { %v437_v58 = vadd.f32 1.0, %v4928_v57  ;;  %v4930_v59 = vpop.eup %4929 }
 0x3bc   :  { %v511_v60 = vadd.f32 1.0, %v4930_v59 }
 0x3bd   :  { %4931 = vrcp.f32 %v437_v58 }
 0x3be   :  { %4933 = vrcp.f32 %v511_v60 }
 0x3c7   :  { %v4932_v61 = vpop.eup %4931 }
 0x3c8   :  { %v4934_v1 = vpop.eup %4933  ;;  %v441_v8 = vmul.f32 0.0, %v4932_v61 }
 0x3c9   :  { %v515_v11 = vmul.f32 %v4934_v1, %v5384_v26  ;;  %v179_v26 = vpop.f32.mrb[4].mxu0 }
 0x3ca   :  { %v4409_v31 = vpop.f32.mrb[5].mxu0  ;;  %v180_v54 = vadd.f32 %v5377_v6, %v179_v26 }
 0x3cb   :  { %v5489_v32 = vpop.f32.mrb[6].mxu0 }
 0x3cc   :  { %v4410_v33 = vpop.f32.mrb[7].mxu0 }
 0x3cd   :  { %v5491_v34 = vpop.f32.mrb[8].mxu0 }
 0x3ce   :  { %v4413_v35 = vpop.f32.mrb[9].mxu0 }
 0x3cf   :  { %v5493_v36 = vpop.f32.mrb[10].mxu0 }
 0x3d0   :  { %v4414_v37 = vpop.f32.mrb[11].mxu0 }
 0x3d1   :  { %v5495_v38 = vpop.f32.mrb[12].mxu0 }
 0x3d2   :  { %v4417_v39 = vpop.f32.mrb[13].mxu0 }
 0x3d3   :  { %v5497_v40 = vpop.f32.mrb[14].mxu0 }
 0x3d4   :  { %v4418_v42 = vpop.f32.mrb[15].mxu0 }
 0x3d5   :  { %v5500_v44 = vpop.f32.mrb[16].mxu0 }
 0x3d6   :  { %v4421_v45 = vpop.f32.mrb[17].mxu0 }
 0x3d7   :  { %v5506_v46 = vpop.f32.mrb[18].mxu0 }
 0x3d8   :  { %v4422_v47 = vpop.f32.mrb[19].mxu0 }
 0x426   :  { %v444_v62 = vpop.permute.xlu0 %443 }
 0x427   :  { %v446_v63 = vmul.f32 %v4932_v61, %v444_v62 }
 0x429   :  { %448 = vrot.lane.b32.xlu0 %v446_v63, %s5228_s0 }
 0x42c   :  { %v518_v3 = vpop.permute.xlu1 %517 }
 0x42d   :  { %v520_v7 = vmul.f32 %v4934_v1, %v518_v3 }
 0x42f   :  { %522 = vrot.lane.b32.xlu1 %v520_v7, %s5228_s0 }
 0x49b   :  { %v449_v9 = vpop.permute.xlu0 %448 }
 0x49c   :  { %v5450_v10 = vadd.f32 %v449_v9, %v441_v8 }
 0x49e   :  { %4935 = vtanh.f32 %v5450_v10 }
 0x4a1   :  { %v523_v12 = vpop.permute.xlu1 %522 }
 0x4a2   :  { %v5454_v13 = vadd.f32 %v523_v12, %v515_v11 }
 0x4a4   :  { %4937 = vtanh.f32 %v5454_v13 }
 0x4a8   :  { %v4936_v15 = vpop.eup %4935 }
 0x4a9   :  { %454 = vrot.lane.b32.xlu0 %v4936_v15, %s5227_s24 }
 0x4ae   :  { %v4938_v17 = vpop.eup %4937 }
 0x4af   :  { %528 = vrot.lane.b32.xlu1 %v4938_v17, %s5227_s24 }
 0x51b   :  { %v455_v20 = vpop.permute.xlu0 %454 }
 0x51c   :  { %v5483_v21 = vmul.f32 %v4932_v61, %v455_v20 }
 0x51e   :  { %v533_v22 = vpack.c.bf16 %v5483_v21, %v5483_v21 }
 0x520   :  { %535 = vrot.lane.b32.xlu0 %v533_v22, %s5228_s0 }
 0x521   :  { %v529_v23 = vpop.permute.xlu1 %528 }
 0x522   :  { %v531_v24 = vmul.f32 %v4934_v1, %v529_v23 }
 0x524   :  { %v532_v25 = vpack.c.bf16 %v531_v24, %v531_v24 }
 0x526   :  { %581 = vrot.lane.b32.xlu1 %v532_v25, %s5228_s0 }
 0x592   :  { %v536_v43 = vpop.permute.xlu0 %535 }
 0x593   :  { %4460 = vmatmul.mubr.msk.bf16.vlgmr.msra.gmra.mrb[16].mxu1 %vm238_vm2, %v536_v43 }
 0x594   :  { %4472 = vmatpush3.bf16.msra.mxu1 %v5347_v2  ;;  %4475 = vmatprep.mubr.msk.bf16.mxu1 %vm5225_vm0, %v5224_v0 }
 0x595   :  { %4473 = vmatprep.subr.bf16.mxu1 %v5224_v0 }
 0x598   :  { %4474 = vmatpush3.bf16.msra.mxu1 %v5361_v5  ;;  %v582_v48 = vpop.permute.xlu1 %581 }
 0x599   :  { %4468 = vmatmul.mubr.msk.bf16.vlgmr.msra.gmra.mrb[20].mxu0 %vm238_vm2, %v582_v48  ;;  %4487 = vmatprep.subr.bf16.mxu1 %v5224_v0 }
 0x59a   :  { %4480 = vmatpush3.bf16.msra.mxu0 %v5390_v27  ;;  %4483 = vmatprep.mubr.msk.bf16.mxu0 %vm5225_vm0, %v5224_v0 }
 0x59b   :  { %4476 = vmatmul.mubr.msk.bf16.vlgmr.msra.gmra.mrb[20].mxu1 %vm238_vm2, %v582_v48  ;;  %4481 = vmatprep.subr.bf16.mxu0 %v5224_v0 }
 0x59c   :  { %4488 = vmatpush3.bf16.msra.mxu1 %v5401_v29  ;;  %4491 = vmatprep.mubr.msk.bf16.mxu1 %vm5225_vm0, %v5224_v0 }
 0x59d   :  { %4489 = vmatprep.subr.bf16.mxu1 %v5224_v0 }
 0x59e   :  { %4482 = vmatpush3.bf16.msra.mxu0 %v5395_v28 }
 0x59f   :  { %4495 = vmatprep.subr.bf16.mxu0 %v5224_v0 }
 0x5a0   :  { %4490 = vmatpush3.bf16.msra.mxu1 %v5410_v30 }
 0x5a1   :  { %4503 = vmatprep.subr.bf16.mxu1 %v5224_v0 }
 0x666   :  { %v574_v49 = vpop.f32.mrb[16].mxu1 }
 0x667   :  { %v4461_v50 = vpop.f32.mrb[17].mxu1 }
 0x668   :  { %v577_v51 = vpop.f32.mrb[18].mxu1 }
 0x669   :  { %v4462_v52 = vpop.f32.mrb[19].mxu1 }
 0x66c   :  { %v620_v53 = vpop.f32.mrb[20].mxu0 }
 0x66d   :  { %v621_v55 = vadd.f32 %v620_v53, %v574_v49  ;;  %v4469_v56 = vpop.f32.mrb[21].mxu0 }
 0x66e   :  { %v623_v57 = vpop.f32.mrb[22].mxu0  ;;  %v694_v58 = vpop.f32.mrb[20].mxu1 }
 0x66f   :  { %v626_v59 = vadd.f32 %v5441_v41, %v621_v55  ;;  %v700_v60 = vadd.f32 %v694_v58, %v180_v54  ;;  %v4470_v61 = vpop.f32.mrb[23].mxu0  ;;  %v4477_v62 = vpop.f32.mrb[21].mxu1 }
 0x670   :  { %v697_v63 = vpop.f32.mrb[22].mxu1 }
 0x671   :  { %4939 = vtanh.f32 %v626_v59  ;;  %v4478_v1 = vpop.f32.mrb[23].mxu1  ;;  %v4116_v8 = vmul.f32 -1.442695, %v626_v59  ;;  %v4118_v9 = vmul.f32 -1.442695, %v700_v60  ;;  %v183_v59 = vadd.f32 %v5377_v6, %v5489_v32 }
 0x672   :  { %4941 = vtanh.f32 %v700_v60 }
 0x673   :  { %4943 = vpow2.f32 %v4116_v8 }
 0x674   :  { %4945 = vpow2.f32 %v4118_v9 }
 0x67b   :  { %v4940_v3 = vpop.eup %4939 }
 0x67c   :  { %v4942_v7 = vpop.eup %4941  ;;  %636 = vrot.lane.b32.xlu0 %v4940_v3, %s5227_s24 }
 0x67d   :  { %710 = vrot.lane.b32.xlu1 %v4942_v7, %s5227_s24  ;;  %v4944_v11 = vpop.eup %4943 }
 0x67e   :  { %v4946_v12 = vpop.eup %4945  ;;  %v630_v14 = vadd.f32 1.0, %v4944_v11 }
 0x67f   :  { %v704_v15 = vadd.f32 1.0, %v4946_v12 }
 0x680   :  { %4947 = vrcp.f32 %v630_v14 }
 0x681   :  { %4949 = vrcp.f32 %v704_v15 }
 0x68a   :  { %v4948_v16 = vpop.eup %4947 }
 0x68b   :  { %v4950_v18 = vpop.eup %4949  ;;  %v634_v23 = vmul.f32 %v4948_v16, %v5450_v10 }
 0x68c   :  { %v708_v24 = vmul.f32 %v4950_v18, %v5454_v13 }
 0x6ee   :  { %v637_v17 = vpop.permute.xlu0 %636 }
 0x6ef   :  { %v711_v19 = vpop.permute.xlu1 %710  ;;  %v639_v20 = vmul.f32 %v4948_v16, %v637_v17 }
 0x6f0   :  { %v713_v22 = vmul.f32 %v4950_v18, %v711_v19 }
 0x6f1   :  { %641 = vrot.lane.b32.xlu0 %v639_v20, %s5228_s0 }
 0x6f2   :  { %715 = vrot.lane.b32.xlu1 %v713_v22, %s5228_s0 }
 0x763   :  { %v642_v25 = vpop.permute.xlu0 %641 }
 0x764   :  { %v716_v26 = vpop.permute.xlu1 %715  ;;  %v5532_v31 = vadd.f32 %v642_v25, %v634_v23 }
 0x765   :  { %v5534_v33 = vadd.f32 %v716_v26, %v708_v24 }
 0x766   :  { %4951 = vtanh.f32 %v5532_v31 }
 0x767   :  { %4953 = vtanh.f32 %v5534_v33 }
 0x770   :  { %v4952_v35 = vpop.eup %4951 }
 0x771   :  { %v4954_v37 = vpop.eup %4953  ;;  %647 = vrot.lane.b32.xlu0 %v4952_v35, %s5227_s24 }
 0x772   :  { %721 = vrot.lane.b32.xlu1 %v4954_v37, %s5227_s24 }
 0x7e3   :  { %v648_v39 = vpop.permute.xlu0 %647 }
 0x7e4   :  { %v722_v10 = vpop.permute.xlu1 %721  ;;  %v5540_v42 = vmul.f32 %v4948_v16, %v648_v39 }
 0x7e5   :  { %v724_v13 = vmul.f32 %v4950_v18, %v722_v10 }
 0x7e6   :  { %v726_v43 = vpack.c.bf16 %v5540_v42, %v5540_v42 }
 0x7e7   :  { %v725_v45 = vpack.c.bf16 %v724_v13, %v724_v13 }
 0x7e8   :  { %728 = vrot.lane.b32.xlu0 %v726_v43, %s5228_s0 }
 0x7e9   :  { %774 = vrot.lane.b32.xlu1 %v725_v45, %s5228_s0 }
 0x85a   :  { %v729_v47 = vpop.permute.xlu0 %728 }
 0x85b   :  { %v775_v48 = vpop.permute.xlu1 %774  ;;  %4484 = vmatmul.mubr.msk.bf16.vlgmr.msra.gmra.mrb[24].mxu0 %vm238_vm2, %v729_v47 }
 0x85c   :  { %4492 = vmatmul.mubr.msk.bf16.vlgmr.msra.gmra.mrb[24].mxu1 %vm238_vm2, %v775_v48  ;;  %4496 = vmatpush3.bf16.msra.mxu0 %v5347_v2 }
 0x85d   :  { %4497 = vmatprep.subr.bf16.mxu0 %v5224_v0  ;;  %4499 = vmatprep.mubr.msk.bf16.mxu0 %vm5225_vm0, %v5224_v0 }
 0x85e   :  { %4504 = vmatpush3.bf16.msra.mxu1 %v5390_v27  ;;  %4507 = vmatprep.mubr.msk.bf16.mxu1 %vm5225_vm0, %v5224_v0 }
 0x85f   :  { %4505 = vmatprep.subr.bf16.mxu1 %v5224_v0 }
 0x860   :  { %4498 = vmatpush3.bf16.msra.mxu0 %v5361_v5 }
 0x861   :  { %4511 = vmatprep.subr.bf16.mxu0 %v5224_v0 }
 0x862   :  { %4506 = vmatpush3.bf16.msra.mxu1 %v5395_v28 }
 0x863   :  { %4500 = vmatmul.mubr.msk.bf16.vlgmr.msra.gmra.mrb[28].mxu0 %vm238_vm2, %v775_v48  ;;  %4519 = vmatprep.subr.bf16.mxu1 %v5224_v0 }
 0x864   :  { %4512 = vmatpush3.bf16.msra.mxu0 %v5401_v29  ;;  %4515 = vmatprep.mubr.msk.bf16.mxu0 %vm5225_vm0, %v5224_v0 }
 0x865   :  { %4513 = vmatprep.subr.bf16.mxu0 %v5224_v0 }
 0x868   :  { %4514 = vmatpush3.bf16.msra.mxu0 %v5410_v30 }
 0x869   :  { %4527 = vmatprep.subr.bf16.mxu0 %v5224_v0 }
 0x92e   :  { %v767_v49 = vpop.f32.mrb[24].mxu0 }
 0x92f   :  { %v813_v50 = vpop.f32.mrb[24].mxu1  ;;  %v4485_v51 = vpop.f32.mrb[25].mxu0 }
 0x930   :  { %v814_v52 = vadd.f32 %v813_v50, %v767_v49  ;;  %v4493_v53 = vpop.f32.mrb[25].mxu1  ;;  %v770_v54 = vpop.f32.mrb[26].mxu0 }
 0x931   :  { %v816_v55 = vpop.f32.mrb[26].mxu1  ;;  %v4486_v56 = vpop.f32.mrb[27].mxu0 }
 0x932   :  { %v819_v57 = vadd.f32 %v5441_v41, %v814_v52  ;;  %v4494_v58 = vpop.f32.mrb[27].mxu1  ;;  %v188_v56 = vadd.f32 %v5377_v6, %v5491_v34 }
 0x934   :  { %4955 = vtanh.f32 %v819_v57  ;;  %v4121_v8 = vmul.f32 -1.442695, %v819_v57 }
 0x936   :  { %v887_v60 = vpop.f32.mrb[28].mxu0 }
 0x937   :  { %v893_v61 = vadd.f32 %v887_v60, %v183_v59  ;;  %v4501_v62 = vpop.f32.mrb[29].mxu0 }
 0x938   :  { %v890_v63 = vpop.f32.mrb[30].mxu0 }
 0x939   :  { %4957 = vtanh.f32 %v893_v61  ;;  %v4502_v1 = vpop.f32.mrb[31].mxu0  ;;  %v4123_v9 = vmul.f32 -1.442695, %v893_v61 }
 0x93a   :  { %4959 = vpow2.f32 %v4121_v8 }
 0x93b   :  { %4961 = vpow2.f32 %v4123_v9 }
 0x93e   :  { %v4956_v3 = vpop.eup %4955 }
 0x93f   :  { %829 = vrot.lane.b32.xlu0 %v4956_v3, %s5227_s24 }
 0x943   :  { %v4958_v7 = vpop.eup %4957 }
 0x944   :  { %903 = vrot.lane.b32.xlu1 %v4958_v7, %s5227_s24  ;;  %v4960_v11 = vpop.eup %4959 }
 0x945   :  { %v823_v12 = vadd.f32 1.0, %v4960_v11  ;;  %v4962_v14 = vpop.eup %4961 }
 0x946   :  { %v897_v32 = vadd.f32 1.0, %v4962_v14 }
 0x947   :  { %4963 = vrcp.f32 %v823_v12 }
 0x948   :  { %4965 = vrcp.f32 %v897_v32 }
 0x951   :  { %v4964_v15 = vpop.eup %4963 }
 0x952   :  { %v4966_v18 = vpop.eup %4965  ;;  %v827_v22 = vmul.f32 %v4964_v15, %v5532_v31 }
 0x953   :  { %v901_v25 = vmul.f32 %v4966_v18, %v5534_v33 }
 0x9b1   :  { %v830_v16 = vpop.permute.xlu0 %829 }
 0x9b2   :  { %v832_v17 = vmul.f32 %v4964_v15, %v830_v16 }
 0x9b4   :  { %834 = vrot.lane.b32.xlu0 %v832_v17, %s5228_s0 }
 0x9b6   :  { %v904_v19 = vpop.permute.xlu1 %903 }
 0x9b7   :  { %v906_v20 = vmul.f32 %v4966_v18, %v904_v19 }
 0x9b9   :  { %908 = vrot.lane.b32.xlu1 %v906_v20, %s5228_s0 }
 0xa26   :  { %v835_v23 = vpop.permute.xlu0 %834 }
 0xa27   :  { %v5575_v24 = vadd.f32 %v835_v23, %v827_v22 }
 0xa29   :  { %4967 = vtanh.f32 %v5575_v24 }
 0xa2b   :  { %v909_v26 = vpop.permute.xlu1 %908 }
 0xa2c   :  { %v5579_v35 = vadd.f32 %v909_v26, %v901_v25 }
 0xa2e   :  { %4969 = vtanh.f32 %v5579_v35 }
 0xa33   :  { %v4968_v37 = vpop.eup %4967 }
 0xa34   :  { %840 = vrot.lane.b32.xlu0 %v4968_v37, %s5227_s24 }
 0xa38   :  { %v4970_v39 = vpop.eup %4969 }
 0xa39   :  { %914 = vrot.lane.b32.xlu1 %v4970_v39, %s5227_s24 }
 0xaa6   :  { %v841_v10 = vpop.permute.xlu0 %840 }
 0xaa7   :  { %v5584_v31 = vmul.f32 %v4964_v15, %v841_v10 }
 0xaa9   :  { %v919_v13 = vpack.c.bf16 %v5584_v31, %v5584_v31 }
 0xaab   :  { %921 = vrot.lane.b32.xlu0 %v919_v13, %s5228_s0  ;;  %v915_v33 = vpop.permute.xlu1 %914 }
 0xaac   :  { %v917_v43 = vmul.f32 %v4966_v18, %v915_v33 }
 0xaae   :  { %v918_v45 = vpack.c.bf16 %v917_v43, %v917_v43 }
 0xab0   :  { %967 = vrot.lane.b32.xlu1 %v918_v45, %s5228_s0 }
 0xb1d   :  { %v922_v47 = vpop.permute.xlu0 %921 }
 0xb1e   :  { %4508 = vmatmul.mubr.msk.bf16.vlgmr.msra.gmra.mrb[28].mxu1 %vm238_vm2, %v922_v47 }
 0xb1f   :  { %4520 = vmatpush3.bf16.msra.mxu1 %v5347_v2  ;;  %4523 = vmatprep.mubr.msk.bf16.mxu1 %vm5225_vm0, %v5224_v0 }
 0xb20   :  { %4521 = vmatprep.subr.bf16.mxu1 %v5224_v0 }
 0xb22   :  { %v968_v48 = vpop.permute.xlu1 %967 }
 0xb23   :  { %4522 = vmatpush3.bf16.msra.mxu1 %v5361_v5  ;;  %4516 = vmatmul.mubr.msk.bf16.vlgmr.msra.gmra.mrb[32].mxu0 %vm238_vm2, %v968_v48 }
 0xb24   :  { %4528 = vmatpush3.bf16.msra.mxu0 %v5390_v27  ;;  %4535 = vmatprep.subr.bf16.mxu1 %v5224_v0 }
 0xb25   :  { %4529 = vmatprep.subr.bf16.mxu0 %v5224_v0  ;;  %4531 = vmatprep.mubr.msk.bf16.mxu0 %vm5225_vm0, %v5224_v0 }
 0xb26   :  { %4524 = vmatmul.mubr.msk.bf16.vlgmr.msra.gmra.mrb[32].mxu1 %vm238_vm2, %v968_v48 }
 0xb27   :  { %4536 = vmatpush3.bf16.msra.mxu1 %v5401_v29  ;;  %4539 = vmatprep.mubr.msk.bf16.mxu1 %vm5225_vm0, %v5224_v0 }
 0xb28   :  { %4530 = vmatpush3.bf16.msra.mxu0 %v5395_v28  ;;  %4537 = vmatprep.subr.bf16.mxu1 %v5224_v0 }
 0xb29   :  { %4543 = vmatprep.subr.bf16.mxu0 %v5224_v0 }
 0xb2b   :  { %4538 = vmatpush3.bf16.msra.mxu1 %v5410_v30 }
 0xb2c   :  { %4551 = vmatprep.subr.bf16.mxu1 %v5224_v0 }
 0xbf1   :  { %v960_v49 = vpop.f32.mrb[28].mxu1 }
 0xbf2   :  { %v4509_v50 = vpop.f32.mrb[29].mxu1 }
 0xbf3   :  { %v963_v51 = vpop.f32.mrb[30].mxu1 }
 0xbf4   :  { %v4510_v52 = vpop.f32.mrb[31].mxu1 }
 0xbf6   :  { %v1006_v53 = vpop.f32.mrb[32].mxu0 }
 0xbf7   :  { %v1007_v54 = vadd.f32 %v1006_v53, %v960_v49  ;;  %v4517_v55 = vpop.f32.mrb[33].mxu0 }
 0xbf8   :  { %v1009_v57 = vpop.f32.mrb[34].mxu0 }
 0xbf9   :  { %v1012_v58 = vadd.f32 %v5441_v41, %v1007_v54  ;;  %v1080_v59 = vpop.f32.mrb[32].mxu1  ;;  %v4518_v60 = vpop.f32.mrb[35].mxu0  ;;  %v191_v57 = vadd.f32 %v5377_v6, %v5493_v36 }
 0xbfa   :  { %v1086_v61 = vadd.f32 %v1080_v59, %v188_v56  ;;  %v4525_v62 = vpop.f32.mrb[33].mxu1 }
 0xbfb   :  { %4971 = vtanh.f32 %v1012_v58  ;;  %v1083_v63 = vpop.f32.mrb[34].mxu1  ;;  %v4126_v8 = vmul.f32 -1.442695, %v1012_v58 }
 0xbfc   :  { %4973 = vtanh.f32 %v1086_v61  ;;  %v4526_v1 = vpop.f32.mrb[35].mxu1  ;;  %v4128_v9 = vmul.f32 -1.442695, %v1086_v61 }
 0xbfd   :  { %4975 = vpow2.f32 %v4126_v8 }
 0xbfe   :  { %4977 = vpow2.f32 %v4128_v9 }
 0xc05   :  { %v4972_v3 = vpop.eup %4971 }
 0xc06   :  { %v4974_v7 = vpop.eup %4973  ;;  %1022 = vrot.lane.b32.xlu0 %v4972_v3, %s5227_s24 }
 0xc07   :  { %1096 = vrot.lane.b32.xlu1 %v4974_v7, %s5227_s24  ;;  %v4976_v34 = vpop.eup %4975 }
 0xc08   :  { %v4978_v11 = vpop.eup %4977  ;;  %v1016_v12 = vadd.f32 1.0, %v4976_v34 }
 0xc09   :  { %v1090_v14 = vadd.f32 1.0, %v4978_v11 }
 0xc0a   :  { %4979 = vrcp.f32 %v1016_v12 }
 0xc0b   :  { %4981 = vrcp.f32 %v1090_v14 }
 0xc14   :  { %v4980_v32 = vpop.eup %4979 }
 0xc15   :  { %v4982_v16 = vpop.eup %4981  ;;  %v1020_v20 = vmul.f32 %v4980_v32, %v5575_v24 }
 0xc16   :  { %v1094_v22 = vmul.f32 %v4982_v16, %v5579_v35 }
 0xc78   :  { %v1023_v15 = vpop.permute.xlu0 %1022 }
 0xc79   :  { %v1097_v17 = vpop.permute.xlu1 %1096  ;;  %v1025_v18 = vmul.f32 %v4980_v32, %v1023_v15 }
 0xc7a   :  { %v1099_v19 = vmul.f32 %v4982_v16, %v1097_v17 }
 0xc7b   :  { %1027 = vrot.lane.b32.xlu0 %v1025_v18, %s5228_s0 }
 0xc7c   :  { %1101 = vrot.lane.b32.xlu1 %v1099_v19, %s5228_s0 }
 0xced   :  { %v1028_v23 = vpop.permute.xlu0 %1027 }
 0xcee   :  { %v1102_v25 = vpop.permute.xlu1 %1101  ;;  %v5620_v26 = vadd.f32 %v1028_v23, %v1020_v20 }
 0xcef   :  { %v5622_v37 = vadd.f32 %v1102_v25, %v1094_v22 }
 0xcf0   :  { %4983 = vtanh.f32 %v5620_v26 }
 0xcf1   :  { %4985 = vtanh.f32 %v5622_v37 }
 0xcfa   :  { %v4984_v39 = vpop.eup %4983 }
 0xcfb   :  { %v4986_v10 = vpop.eup %4985  ;;  %1033 = vrot.lane.b32.xlu0 %v4984_v39, %s5227_s24 }
 0xcfc   :  { %1107 = vrot.lane.b32.xlu1 %v4986_v10, %s5227_s24 }
 0xd6d   :  { %v1034_v13 = vpop.permute.xlu0 %1033 }
 0xd6e   :  { %v1108_v24 = vpop.permute.xlu1 %1107  ;;  %v5628_v33 = vmul.f32 %v4980_v32, %v1034_v13 }
 0xd6f   :  { %v1110_v35 = vmul.f32 %v4982_v16, %v1108_v24 }
 0xd70   :  { %v1112_v43 = vpack.c.bf16 %v5628_v33, %v5628_v33 }
 0xd71   :  { %v1111_v45 = vpack.c.bf16 %v1110_v35, %v1110_v35 }
 0xd72   :  { %1114 = vrot.lane.b32.xlu0 %v1112_v43, %s5228_s0  ;;  %v5682_v43 = vld [vmem:[%s6461_s28] sm:$0xff]  }
 0xd73   :  { %1160 = vrot.lane.b32.xlu1 %v1111_v45, %s5228_s0 }
 0xde4   :  { %v1115_v47 = vpop.permute.xlu0 %1114 }
 0xde5   :  { %v1161_v48 = vpop.permute.xlu1 %1160  ;;  %4532 = vmatmul.mubr.msk.bf16.vlgmr.msra.gmra.mrb[36].mxu0 %vm238_vm2, %v1115_v47  ;;  %v5691_v47 = vld [vmem:[%s6461_s28 + $0x8] sm:$0xff]  }
 0xde6   :  { %4540 = vmatmul.mubr.msk.bf16.vlgmr.msra.gmra.mrb[36].mxu1 %vm238_vm2, %v1161_v48  ;;  %4544 = vmatpush3.bf16.msra.mxu0 %v5347_v2 }
 0xde7   :  { %4545 = vmatprep.subr.bf16.mxu0 %v5224_v0  ;;  %4547 = vmatprep.mubr.msk.bf16.mxu0 %vm5225_vm0, %v5224_v0 }
 0xde8   :  { %4552 = vmatpush3.bf16.msra.mxu1 %v5390_v27  ;;  %4555 = vmatprep.mubr.msk.bf16.mxu1 %vm5225_vm0, %v5224_v0 }
 0xde9   :  { %4553 = vmatprep.subr.bf16.mxu1 %v5224_v0 }
 0xdea   :  { %4546 = vmatpush3.bf16.msra.mxu0 %v5361_v5 }
 0xdeb   :  { %4559 = vmatprep.subr.bf16.mxu0 %v5224_v0 }
 0xdec   :  { %4554 = vmatpush3.bf16.msra.mxu1 %v5395_v28 }
 0xded   :  { %4548 = vmatmul.mubr.msk.bf16.vlgmr.msra.gmra.mrb[40].mxu0 %vm238_vm2, %v1161_v48  ;;  %4567 = vmatprep.subr.bf16.mxu1 %v5224_v0 }
 0xdee   :  { %4560 = vmatpush3.bf16.msra.mxu0 %v5401_v29  ;;  %4563 = vmatprep.mubr.msk.bf16.mxu0 %vm5225_vm0, %v5224_v0 }
 0xdef   :  { %4561 = vmatprep.subr.bf16.mxu0 %v5224_v0 }
 0xdf2   :  { %4562 = vmatpush3.bf16.msra.mxu0 %v5410_v30 }
 0xdf3   :  { %4575 = vmatprep.subr.bf16.mxu0 %v5224_v0 }
 0xeb8   :  { %v1153_v2 = vpop.f32.mrb[36].mxu0 }
 0xeb9   :  { %v1199_v5 = vpop.f32.mrb[36].mxu1  ;;  %v4533_v49 = vpop.f32.mrb[37].mxu0 }
 0xeba   :  { %v1200_v50 = vadd.f32 %v1199_v5, %v1153_v2  ;;  %v4541_v51 = vpop.f32.mrb[37].mxu1  ;;  %v1156_v52 = vpop.f32.mrb[38].mxu0 }
 0xebb   :  { %v1202_v53 = vpop.f32.mrb[38].mxu1  ;;  %v4534_v54 = vpop.f32.mrb[39].mxu0  ;;  %v5712_v51 = vld [vmem:[%s6463_s5] ss:$0 sm:$0xff] }
 0xebc   :  { %v1205_v55 = vadd.f32 %v5441_v41, %v1200_v50  ;;  %v4542_v56 = vpop.f32.mrb[39].mxu1 }
 0xebe   :  { %4987 = vtanh.f32 %v1205_v55  ;;  %v4131_v3 = vmul.f32 -1.442695, %v1205_v55 }
 0xec0   :  { %v1273_v58 = vpop.f32.mrb[40].mxu0 }
 0xec1   :  { %v1279_v59 = vadd.f32 %v1273_v58, %v191_v57  ;;  %v4549_v60 = vpop.f32.mrb[41].mxu0 }
 0xec2   :  { %v1276_v61 = vpop.f32.mrb[42].mxu0 }
 0xec3   :  { %4989 = vtanh.f32 %v1279_v59  ;;  %v4550_v62 = vpop.f32.mrb[43].mxu0  ;;  %v4133_v7 = vmul.f32 -1.442695, %v1279_v59 }
 0xec4   :  { %4991 = vpow2.f32 %v4131_v3 }
 0xec5   :  { %4993 = vpow2.f32 %v4133_v7 }
 0xec8   :  { %v4988_v63 = vpop.eup %4987 }
 0xec9   :  { %1215 = vrot.lane.b32.xlu0 %v4988_v63, %s5227_s24 }
 0xecd   :  { %v4990_v1 = vpop.eup %4989 }
 0xece   :  { %1289 = vrot.lane.b32.xlu1 %v4990_v1, %s5227_s24  ;;  %v4992_v8 = vpop.eup %4991 }
 0xecf   :  { %v1209_v9 = vadd.f32 1.0, %v4992_v8  ;;  %v4994_v34 = vpop.eup %4993 }
 0xed0   :  { %v1283_v6 = vadd.f32 1.0, %v4994_v34 }
 0xed1   :  { %4995 = vrcp.f32 %v1209_v9 }
 0xed2   :  { %4997 = vrcp.f32 %v1283_v6 }
 0xedb   :  { %v4996_v36 = vpop.eup %4995 }
 0xedc   :  { %v4998_v14 = vpop.eup %4997  ;;  %v1213_v16 = vmul.f32 %v4996_v36, %v5620_v26 }
 0xedd   :  { %v1287_v19 = vmul.f32 %v4998_v14, %v5622_v37 }
 0xf3b   :  { %v1216_v11 = vpop.permute.xlu0 %1215 }
 0xf3c   :  { %v1218_v12 = vmul.f32 %v4996_v36, %v1216_v11 }
 0xf3e   :  { %1220 = vrot.lane.b32.xlu0 %v1218_v12, %s5228_s0 }
 0xf40   :  { %v1290_v32 = vpop.permute.xlu1 %1289 }
 0xf41   :  { %v1292_v15 = vmul.f32 %v4998_v14, %v1290_v32 }
 0xf43   :  { %1294 = vrot.lane.b32.xlu1 %v1292_v15, %s5228_s0 }
 0xfb0   :  { %v1221_v17 = vpop.permute.xlu0 %1220 }
 0xfb1   :  { %v5663_v18 = vadd.f32 %v1221_v17, %v1213_v16 }
 0xfb3   :  { %4999 = vtanh.f32 %v5663_v18 }
 0xfb5   :  { %v1295_v20 = vpop.permute.xlu1 %1294 }
 0xfb6   :  { %v5667_v22 = vadd.f32 %v1295_v20, %v1287_v19 }
 0xfb8   :  { %5001 = vtanh.f32 %v5667_v22 }
 0xfbd   :  { %v5000_v23 = vpop.eup %4999 }
 0xfbe   :  { %1226 = vrot.lane.b32.xlu0 %v5000_v23, %s5227_s24 }
 0xfc2   :  { %v5002_v25 = vpop.eup %5001 }
 0xfc3   :  { %1300 = vrot.lane.b32.xlu1 %v5002_v25, %s5227_s24 }
0x1030   :  { %v1227_v39 = vpop.permute.xlu0 %1226 }
0x1031   :  { %v5672_v26 = vmul.f32 %v4996_v36, %v1227_v39 }
0x1033   :  { %v1305_v10 = vpack.c.bf16 %v5672_v26, %v5672_v26 }
0x1035   :  { %1307 = vrot.lane.b32.xlu0 %v1305_v10, %s5228_s0  ;;  %v1301_v37 = vpop.permute.xlu1 %1300 }
0x1036   :  { %v1303_v13 = vmul.f32 %v4998_v14, %v1301_v37  ;;  %v5746_v37 = vld [vmem:[%s6464_s27] sm:$0xff]  }
0x1038   :  { %v1304_v24 = vpack.c.bf16 %v1303_v13, %v1303_v13  ;;  %v5757_v13 = vld [vmem:[%s6464_s27 + $0x8] sm:$0xff]  }
0x103a   :  { %1353 = vrot.lane.b32.xlu1 %v1304_v24, %s5228_s0  ;;  %v5765_v24 = vld [vmem:[%s6465_s7] sm:$0xff]  }
0x10a7   :  { %v1308_v35 = vpop.permute.xlu0 %1307 }
0x10a8   :  { %4556 = vmatmul.mubr.msk.bf16.vlgmr.msra.gmra.mrb[40].mxu1 %vm238_vm2, %v1308_v35  ;;  %v5774_v35 = vld [vmem:[%s6465_s7 + $0x8] sm:$0xff]  }
0x10a9   :  { %4568 = vmatpush3.bf16.msra.mxu1 %v5682_v43  ;;  %4571 = vmatprep.mubr.msk.bf16.mxu1 %vm5225_vm0, %v5224_v0 }
0x10aa   :  { %4569 = vmatprep.subr.bf16.mxu1 %v5224_v0 }
0x10ac   :  { %v1354_v45 = vpop.permute.xlu1 %1353 }
0x10ad   :  { %4570 = vmatpush3.bf16.msra.mxu1 %v5691_v47  ;;  %4564 = vmatmul.mubr.msk.bf16.vlgmr.msra.gmra.mrb[44].mxu0 %vm238_vm2, %v1354_v45 }
0x10ae   :  { %4576 = vmatpush3.bf16.msra.mxu0 %v5390_v27  ;;  %4583 = vmatprep.subr.bf16.mxu1 %v5224_v0 }
0x10af   :  { %4577 = vmatprep.subr.bf16.mxu0 %v5224_v0  ;;  %4579 = vmatprep.mubr.msk.bf16.mxu0 %vm5225_vm0, %v5224_v0 }
0x10b0   :  { %4572 = vmatmul.mubr.msk.bf16.vlgmr.msra.gmra.mrb[44].mxu1 %vm238_vm2, %v1354_v45 }
0x10b1   :  { %4584 = vmatpush3.bf16.msra.mxu1 %v5401_v29  ;;  %4587 = vmatprep.mubr.msk.bf16.mxu1 %vm5225_vm0, %v5224_v0 }
0x10b2   :  { %4578 = vmatpush3.bf16.msra.mxu0 %v5395_v28  ;;  %4585 = vmatprep.subr.bf16.mxu1 %v5224_v0  ;;  %v196_v28 = vadd.f32 %v5712_v51, %v5495_v38 }
0x10b3   :  { %4591 = vmatprep.subr.bf16.mxu0 %v5224_v0 }
0x10b5   :  { %4586 = vmatpush3.bf16.msra.mxu1 %v5410_v30 }
0x10b6   :  { %4599 = vmatprep.subr.bf16.mxu1 %v5224_v0 }
0x117b   :  { %v1346_v27 = vpop.f32.mrb[40].mxu1 }
0x117c   :  { %v4557_v48 = vpop.f32.mrb[41].mxu1 }
0x117d   :  { %v1349_v2 = vpop.f32.mrb[42].mxu1 }
0x117e   :  { %v4558_v5 = vpop.f32.mrb[43].mxu1 }
0x1180   :  { %v1392_v49 = vpop.f32.mrb[44].mxu0 }
0x1181   :  { %v1393_v50 = vadd.f32 %v1392_v49, %v1346_v27  ;;  %v4565_v29 = vpop.f32.mrb[45].mxu0 }
0x1182   :  { %v1395_v52 = vpop.f32.mrb[46].mxu0 }
0x1183   :  { %v1398_v30 = vadd.f32 %v5441_v41, %v1393_v50  ;;  %v1466_v53 = vpop.f32.mrb[44].mxu1  ;;  %v4566_v54 = vpop.f32.mrb[47].mxu0 }
0x1184   :  { %v1472_v55 = vadd.f32 %v1466_v53, %v196_v28  ;;  %v4573_v56 = vpop.f32.mrb[45].mxu1  ;;  %v5781_v28 = vld [vmem:[%s6433_s9] ss:$0 sm:$0xff]  ;;  %v199_v53 = vadd.f32 %v5712_v51, %v5497_v40 }
0x1185   :  { %5003 = vtanh.f32 %v1398_v30  ;;  %v1469_v57 = vpop.f32.mrb[46].mxu1  ;;  %v4136_v61 = vmul.f32 -1.442695, %v1398_v30 }
0x1186   :  { %5005 = vtanh.f32 %v1472_v55  ;;  %v4574_v58 = vpop.f32.mrb[47].mxu1  ;;  %v4138_v62 = vmul.f32 -1.442695, %v1472_v55 }
0x1187   :  { %5007 = vpow2.f32 %v4136_v61 }
0x1188   :  { %5009 = vpow2.f32 %v4138_v62 }
0x118f   :  { %v5004_v59 = vpop.eup %5003 }
0x1190   :  { %v5006_v60 = vpop.eup %5005  ;;  %1408 = vrot.lane.b32.xlu0 %v5004_v59, %s5227_s24 }
0x1191   :  { %1482 = vrot.lane.b32.xlu1 %v5006_v60, %s5227_s24  ;;  %v5008_v38 = vpop.eup %5007 }
0x1192   :  { %v5010_v41 = vpop.eup %5009  ;;  %v1402_v63 = vadd.f32 1.0, %v5008_v38 }
0x1193   :  { %v1476_v1 = vadd.f32 1.0, %v5010_v41 }
0x1194   :  { %5011 = vrcp.f32 %v1402_v63 }
0x1195   :  { %5013 = vrcp.f32 %v1476_v1 }
0x119e   :  { %v5012_v3 = vpop.eup %5011 }
0x119f   :  { %v5014_v8 = vpop.eup %5013  ;;  %v1406_v36 = vmul.f32 %v5012_v3, %v5663_v18 }
0x11a0   :  { %v1480_v11 = vmul.f32 %v5014_v8, %v5667_v22 }
0x1202   :  { %v1409_v7 = vpop.permute.xlu0 %1408 }
0x1203   :  { %v1483_v9 = vpop.permute.xlu1 %1482  ;;  %v1411_v34 = vmul.f32 %v5012_v3, %v1409_v7 }
0x1204   :  { %v1485_v6 = vmul.f32 %v5014_v8, %v1483_v9 }
0x1205   :  { %1413 = vrot.lane.b32.xlu0 %v1411_v34, %s5228_s0 }
0x1206   :  { %1487 = vrot.lane.b32.xlu1 %v1485_v6, %s5228_s0 }
0x1277   :  { %v1414_v12 = vpop.permute.xlu0 %1413 }
0x1278   :  { %v1488_v14 = vpop.permute.xlu1 %1487  ;;  %v5723_v32 = vadd.f32 %v1414_v12, %v1406_v36 }
0x1279   :  { %v5725_v15 = vadd.f32 %v1488_v14, %v1480_v11 }
0x127a   :  { %5015 = vtanh.f32 %v5723_v32 }
0x127b   :  { %5017 = vtanh.f32 %v5725_v15 }
0x1284   :  { %v5016_v16 = vpop.eup %5015 }
0x1285   :  { %v5018_v17 = vpop.eup %5017  ;;  %1419 = vrot.lane.b32.xlu0 %v5016_v16, %s5227_s24 }
0x1286   :  { %1493 = vrot.lane.b32.xlu1 %v5018_v17, %s5227_s24 }
0x12f7   :  { %v1420_v19 = vpop.permute.xlu0 %1419 }
0x12f8   :  { %v1494_v18 = vpop.permute.xlu1 %1493  ;;  %v5731_v20 = vmul.f32 %v5012_v3, %v1420_v19 }
0x12f9   :  { %v1496_v22 = vmul.f32 %v5014_v8, %v1494_v18 }
0x12fa   :  { %v1498_v23 = vpack.c.bf16 %v5731_v20, %v5731_v20 }
0x12fb   :  { %v1497_v25 = vpack.c.bf16 %v1496_v22, %v1496_v22 }
0x12fc   :  { %1500 = vrot.lane.b32.xlu0 %v1498_v23, %s5228_s0 }
0x12fd   :  { %1546 = vrot.lane.b32.xlu1 %v1497_v25, %s5228_s0 }
0x136e   :  { %v1501_v39 = vpop.permute.xlu0 %1500 }
0x136f   :  { %v1547_v10 = vpop.permute.xlu1 %1546  ;;  %4580 = vmatmul.mubr.msk.bf16.vlgmr.msra.gmra.mrb[48].mxu0 %vm238_vm2, %v1501_v39 }
0x1370   :  { %4588 = vmatmul.mubr.msk.bf16.vlgmr.msra.gmra.mrb[48].mxu1 %vm238_vm2, %v1547_v10  ;;  %4592 = vmatpush3.bf16.msra.mxu0 %v5682_v43 }
0x1371   :  { %4593 = vmatprep.subr.bf16.mxu0 %v5224_v0  ;;  %4595 = vmatprep.mubr.msk.bf16.mxu0 %vm5225_vm0, %v5224_v0 }
0x1372   :  { %4600 = vmatpush3.bf16.msra.mxu1 %v5746_v37  ;;  %4603 = vmatprep.mubr.msk.bf16.mxu1 %vm5225_vm0, %v5224_v0 }
0x1373   :  { %4601 = vmatprep.subr.bf16.mxu1 %v5224_v0 }
0x1374   :  { %4594 = vmatpush3.bf16.msra.mxu0 %v5691_v47 }
0x1375   :  { %4607 = vmatprep.subr.bf16.mxu0 %v5224_v0 }
0x1376   :  { %4602 = vmatpush3.bf16.msra.mxu1 %v5757_v13 }
0x1377   :  { %4596 = vmatmul.mubr.msk.bf16.vlgmr.msra.gmra.mrb[52].mxu0 %vm238_vm2, %v1547_v10  ;;  %4615 = vmatprep.subr.bf16.mxu1 %v5224_v0 }
0x1378   :  { %4608 = vmatpush3.bf16.msra.mxu0 %v5765_v24  ;;  %4611 = vmatprep.mubr.msk.bf16.mxu0 %vm5225_vm0, %v5224_v0 }
0x1379   :  { %4609 = vmatprep.subr.bf16.mxu0 %v5224_v0 }
0x137c   :  { %4610 = vmatpush3.bf16.msra.mxu0 %v5774_v35 }
0x137d   :  { %4623 = vmatprep.subr.bf16.mxu0 %v5224_v0 }
0x1442   :  { %v1539_v45 = vpop.f32.mrb[48].mxu0 }
0x1443   :  { %v1585_v27 = vpop.f32.mrb[48].mxu1  ;;  %v4581_v48 = vpop.f32.mrb[49].mxu0 }
0x1444   :  { %v1586_v2 = vadd.f32 %v1585_v27, %v1539_v45  ;;  %v4589_v5 = vpop.f32.mrb[49].mxu1  ;;  %v1542_v49 = vpop.f32.mrb[50].mxu0 }
0x1445   :  { %v1588_v50 = vpop.f32.mrb[50].mxu1  ;;  %v4582_v29 = vpop.f32.mrb[51].mxu0 }
0x1446   :  { %v1591_v52 = vadd.f32 %v5781_v28, %v1586_v2  ;;  %v4590_v30 = vpop.f32.mrb[51].mxu1  ;;  %v204_v29 = vadd.f32 %v5712_v51, %v5500_v44 }
0x1448   :  { %5019 = vtanh.f32 %v1591_v52  ;;  %v4141_v61 = vmul.f32 -1.442695, %v1591_v52 }
0x144a   :  { %v1659_v54 = vpop.f32.mrb[52].mxu0 }
0x144b   :  { %v1665_v55 = vadd.f32 %v1659_v54, %v199_v53  ;;  %v4597_v56 = vpop.f32.mrb[53].mxu0 }
0x144c   :  { %v1662_v57 = vpop.f32.mrb[54].mxu0 }
0x144d   :  { %5021 = vtanh.f32 %v1665_v55  ;;  %v4598_v58 = vpop.f32.mrb[55].mxu0  ;;  %v4143_v62 = vmul.f32 -1.442695, %v1665_v55 }
0x144e   :  { %5023 = vpow2.f32 %v4141_v61 }
0x144f   :  { %5025 = vpow2.f32 %v4143_v62 }
0x1452   :  { %v5020_v59 = vpop.eup %5019 }
0x1453   :  { %1601 = vrot.lane.b32.xlu0 %v5020_v59, %s5227_s24 }
0x1457   :  { %v5022_v60 = vpop.eup %5021 }
0x1458   :  { %1675 = vrot.lane.b32.xlu1 %v5022_v60, %s5227_s24  ;;  %v5024_v38 = vpop.eup %5023 }
0x1459   :  { %v1595_v41 = vadd.f32 1.0, %v5024_v38  ;;  %v5026_v63 = vpop.eup %5025 }
0x145a   :  { %v1669_v40 = vadd.f32 1.0, %v5026_v63 }
0x145b   :  { %5027 = vrcp.f32 %v1595_v41 }
0x145c   :  { %5029 = vrcp.f32 %v1669_v40 }
0x1465   :  { %v5028_v1 = vpop.eup %5027 }
0x1466   :  { %v5030_v8 = vpop.eup %5029  ;;  %v1599_v6 = vmul.f32 %v5028_v1, %v5723_v32 }
0x1467   :  { %v1673_v12 = vmul.f32 %v5030_v8, %v5725_v15 }
0x14c5   :  { %v1602_v3 = vpop.permute.xlu0 %1601 }
0x14c6   :  { %v1604_v7 = vmul.f32 %v5028_v1, %v1602_v3 }
0x14c8   :  { %1606 = vrot.lane.b32.xlu0 %v1604_v7, %s5228_s0 }
0x14ca   :  { %v1676_v9 = vpop.permute.xlu1 %1675 }
0x14cb   :  { %v1678_v34 = vmul.f32 %v5030_v8, %v1676_v9 }
0x14cd   :  { %1680 = vrot.lane.b32.xlu1 %v1678_v34, %s5228_s0 }
0x153a   :  { %v1607_v36 = vpop.permute.xlu0 %1606 }
0x153b   :  { %v5791_v11 = vadd.f32 %v1607_v36, %v1599_v6 }
0x153d   :  { %5031 = vtanh.f32 %v5791_v11 }
0x153f   :  { %v1681_v14 = vpop.permute.xlu1 %1680 }
0x1540   :  { %v5795_v16 = vadd.f32 %v1681_v14, %v1673_v12 }
0x1542   :  { %5033 = vtanh.f32 %v5795_v16 }
0x1547   :  { %v5032_v17 = vpop.eup %5031 }
0x1548   :  { %1612 = vrot.lane.b32.xlu0 %v5032_v17, %s5227_s24 }
0x154c   :  { %v5034_v19 = vpop.eup %5033 }
0x154d   :  { %1686 = vrot.lane.b32.xlu1 %v5034_v19, %s5227_s24 }
0x15ba   :  { %v1613_v18 = vpop.permute.xlu0 %1612 }
0x15bb   :  { %v5800_v32 = vmul.f32 %v5028_v1, %v1613_v18 }
0x15bd   :  { %v1691_v22 = vpack.c.bf16 %v5800_v32, %v5800_v32 }
0x15bf   :  { %1693 = vrot.lane.b32.xlu0 %v1691_v22, %s5228_s0  ;;  %v1687_v15 = vpop.permute.xlu1 %1686 }
0x15c0   :  { %v1689_v23 = vmul.f32 %v5030_v8, %v1687_v15 }
0x15c2   :  { %v1690_v25 = vpack.c.bf16 %v1689_v23, %v1689_v23 }
0x15c4   :  { %1739 = vrot.lane.b32.xlu1 %v1690_v25, %s5228_s0 }
0x1631   :  { %v1694_v39 = vpop.permute.xlu0 %1693 }
0x1632   :  { %4604 = vmatmul.mubr.msk.bf16.vlgmr.msra.gmra.mrb[52].mxu1 %vm238_vm2, %v1694_v39 }
0x1633   :  { %4616 = vmatpush3.bf16.msra.mxu1 %v5682_v43  ;;  %4619 = vmatprep.mubr.msk.bf16.mxu1 %vm5225_vm0, %v5224_v0 }
0x1634   :  { %4617 = vmatprep.subr.bf16.mxu1 %v5224_v0 }
0x1636   :  { %v1740_v10 = vpop.permute.xlu1 %1739 }
0x1637   :  { %4618 = vmatpush3.bf16.msra.mxu1 %v5691_v47  ;;  %4612 = vmatmul.mubr.msk.bf16.vlgmr.msra.gmra.mrb[56].mxu0 %vm238_vm2, %v1740_v10 }
0x1638   :  { %4624 = vmatpush3.bf16.msra.mxu0 %v5746_v37  ;;  %4631 = vmatprep.subr.bf16.mxu1 %v5224_v0 }
0x1639   :  { %4625 = vmatprep.subr.bf16.mxu0 %v5224_v0  ;;  %4627 = vmatprep.mubr.msk.bf16.mxu0 %vm5225_vm0, %v5224_v0 }
0x163a   :  { %4620 = vmatmul.mubr.msk.bf16.vlgmr.msra.gmra.mrb[56].mxu1 %vm238_vm2, %v1740_v10 }
0x163b   :  { %4632 = vmatpush3.bf16.msra.mxu1 %v5765_v24  ;;  %4635 = vmatprep.mubr.msk.bf16.mxu1 %vm5225_vm0, %v5224_v0 }
0x163c   :  { %4626 = vmatpush3.bf16.msra.mxu0 %v5757_v13  ;;  %4633 = vmatprep.subr.bf16.mxu1 %v5224_v0 }
0x163d   :  { %4639 = vmatprep.subr.bf16.mxu0 %v5224_v0 }
0x163f   :  { %4634 = vmatpush3.bf16.msra.mxu1 %v5774_v35 }
0x1640   :  { %4647 = vmatprep.subr.bf16.mxu1 %v5224_v0 }
0x1705   :  { %v1732_v45 = vpop.f32.mrb[52].mxu1 }
0x1706   :  { %v4605_v27 = vpop.f32.mrb[53].mxu1 }
0x1707   :  { %v1735_v48 = vpop.f32.mrb[54].mxu1 }
0x1708   :  { %v4606_v2 = vpop.f32.mrb[55].mxu1 }
0x170a   :  { %v1778_v5 = vpop.f32.mrb[56].mxu0 }
0x170b   :  { %v1779_v49 = vadd.f32 %v1778_v5, %v1732_v45  ;;  %v4613_v50 = vpop.f32.mrb[57].mxu0 }
0x170c   :  { %v1781_v52 = vpop.f32.mrb[58].mxu0 }
0x170d   :  { %v1784_v30 = vadd.f32 %v5781_v28, %v1779_v49  ;;  %v1852_v53 = vpop.f32.mrb[56].mxu1  ;;  %v4614_v54 = vpop.f32.mrb[59].mxu0  ;;  %v207_v49 = vadd.f32 %v5712_v51, %v5506_v46 }
0x170e   :  { %v1858_v55 = vadd.f32 %v1852_v53, %v204_v29  ;;  %v4621_v56 = vpop.f32.mrb[57].mxu1 }
0x170f   :  { %5035 = vtanh.f32 %v1784_v30  ;;  %v1855_v57 = vpop.f32.mrb[58].mxu1  ;;  %v4146_v61 = vmul.f32 -1.442695, %v1784_v30 }
0x1710   :  { %5037 = vtanh.f32 %v1858_v55  ;;  %v4622_v58 = vpop.f32.mrb[59].mxu1  ;;  %v4148_v62 = vmul.f32 -1.442695, %v1858_v55 }
0x1711   :  { %5039 = vpow2.f32 %v4146_v61 }
0x1712   :  { %5041 = vpow2.f32 %v4148_v62 }
0x1719   :  { %v5036_v59 = vpop.eup %5035 }
0x171a   :  { %v5038_v60 = vpop.eup %5037  ;;  %1794 = vrot.lane.b32.xlu0 %v5036_v59, %s5227_s24 }
0x171b   :  { %1868 = vrot.lane.b32.xlu1 %v5038_v60, %s5227_s24  ;;  %v5040_v44 = vpop.eup %5039 }
0x171c   :  { %v5042_v38 = vpop.eup %5041  ;;  %v1788_v41 = vadd.f32 1.0, %v5040_v44 }
0x171d   :  { %v1862_v63 = vadd.f32 1.0, %v5042_v38 }
0x171e   :  { %5043 = vrcp.f32 %v1788_v41 }
0x171f   :  { %5045 = vrcp.f32 %v1862_v63 }
0x1728   :  { %v5044_v40 = vpop.eup %5043 }
0x1729   :  { %v5046_v3 = vpop.eup %5045  ;;  %v1792_v34 = vmul.f32 %v5044_v40, %v5791_v11 }
0x172a   :  { %v1866_v6 = vmul.f32 %v5046_v3, %v5795_v16 }
0x178c   :  { %v1795_v1 = vpop.permute.xlu0 %1794 }
0x178d   :  { %v1869_v7 = vpop.permute.xlu1 %1868  ;;  %v1797_v8 = vmul.f32 %v5044_v40, %v1795_v1 }
0x178e   :  { %v1871_v9 = vmul.f32 %v5046_v3, %v1869_v7 }
0x178f   :  { %1799 = vrot.lane.b32.xlu0 %v1797_v8, %s5228_s0 }
0x1790   :  { %1873 = vrot.lane.b32.xlu1 %v1871_v9, %s5228_s0  ;;  %v4900_v9 = vld [vmem:[%s6434_s10] sm:$0xff]  }
0x1801   :  { %v1800_v36 = vpop.permute.xlu0 %1799 }
0x1802   :  { %v1874_v12 = vpop.permute.xlu1 %1873  ;;  %v5836_v14 = vadd.f32 %v1800_v36, %v1792_v34 }
0x1803   :  { %v5838_v17 = vadd.f32 %v1874_v12, %v1866_v6 }
0x1804   :  { %5047 = vtanh.f32 %v5836_v14 }
0x1805   :  { %5049 = vtanh.f32 %v5838_v17 }
0x180e   :  { %v5048_v19 = vpop.eup %5047 }
0x180f   :  { %v5050_v18 = vpop.eup %5049  ;;  %1805 = vrot.lane.b32.xlu0 %v5048_v19, %s5227_s24  ;;  %v4902_v19 = vld [vmem:[%s6436_s2] sm:$0xff]  }
0x1810   :  { %1879 = vrot.lane.b32.xlu1 %v5050_v18, %s5227_s24 }
0x1881   :  { %v1806_v22 = vpop.permute.xlu0 %1805 }
0x1882   :  { %v1880_v11 = vpop.permute.xlu1 %1879  ;;  %v5844_v15 = vmul.f32 %v5044_v40, %v1806_v22  ;;  %v5901_v22 = vld [vmem:[%s6435_s11] sm:$0xff]  }
0x1883   :  { %v1882_v16 = vmul.f32 %v5046_v3, %v1880_v11 }
0x1884   :  { %v1884_v23 = vpack.c.bf16 %v5844_v15, %v5844_v15 }
0x1885   :  { %v1883_v25 = vpack.c.bf16 %v1882_v16, %v1882_v16  ;;  %v4903_v16 = vld [vmem:[%s6436_s2 + $0x8] sm:$0xff]  }
0x1886   :  { %1886 = vrot.lane.b32.xlu0 %v1884_v23, %s5228_s0  ;;  %v5912_v23 = vld [vmem:[%s6435_s11 + $0x8] sm:$0xff]  }
0x1887   :  { %1932 = vrot.lane.b32.xlu1 %v1883_v25, %s5228_s0 }
0x18f8   :  { %v1887_v39 = vpop.permute.xlu0 %1886 }
0x18f9   :  { %v1933_v10 = vpop.permute.xlu1 %1932  ;;  %4628 = vmatmul.mubr.msk.bf16.vlgmr.msra.gmra.mrb[60].mxu0 %vm238_vm2, %v1887_v39 }
0x18fa   :  { %4636 = vmatmul.mubr.msk.bf16.vlgmr.msra.gmra.mrb[60].mxu1 %vm238_vm2, %v1933_v10  ;;  %4640 = vmatpush3.bf16.msra.mxu0 %v5682_v43 }
0x18fb   :  { %4641 = vmatprep.subr.bf16.mxu0 %v5224_v0  ;;  %4643 = vmatprep.mubr.msk.bf16.mxu0 %vm5225_vm0, %v5224_v0 }
0x18fc   :  { %4648 = vmatpush3.bf16.msra.mxu1 %v5746_v37  ;;  %4651 = vmatprep.mubr.msk.bf16.mxu1 %vm5225_vm0, %v5224_v0 }
0x18fd   :  { %4649 = vmatprep.subr.bf16.mxu1 %v5224_v0 }
0x18fe   :  { %4642 = vmatpush3.bf16.msra.mxu0 %v5691_v47 }
0x18ff   :  { %4655 = vmatprep.subr.bf16.mxu0 %v5224_v0 }
0x1900   :  { %4650 = vmatpush3.bf16.msra.mxu1 %v5757_v13 }
0x1901   :  { %4644 = vmatmul.mubr.msk.bf16.vlgmr.msra.gmra.mrb[64].mxu0 %vm238_vm2, %v1933_v10  ;;  %4663 = vmatprep.subr.bf16.mxu1 %v4900_v9 }
0x1902   :  { %4656 = vmatpush3.bf16.msra.mxu0 %v5765_v24  ;;  %4659 = vmatprep.mubr.msk.bf16.mxu0 %vm5225_vm0, %v5224_v0 }
0x1903   :  { %4657 = vmatprep.subr.bf16.mxu0 %v5224_v0 }
0x1906   :  { %4658 = vmatpush3.bf16.msra.mxu0 %v5774_v35 }
0x1907   :  { %4673 = vmatprep.subr.bf16.mxu0 %v5224_v0 }
0x19cc   :  { %v1925_v43 = vpop.f32.mrb[60].mxu0 }
0x19cd   :  { %v1971_v37 = vpop.f32.mrb[60].mxu1  ;;  %v4629_v47 = vpop.f32.mrb[61].mxu0 }
0x19ce   :  { %v1972_v45 = vadd.f32 %v1971_v37, %v1925_v43  ;;  %v4637_v27 = vpop.f32.mrb[61].mxu1  ;;  %v1928_v48 = vpop.f32.mrb[62].mxu0 }
0x19cf   :  { %v1974_v13 = vpop.f32.mrb[62].mxu1  ;;  %v4630_v2 = vpop.f32.mrb[63].mxu0  ;;  %v5928_v48 = vld [vmem:[%s6437_s12] ss:$0 sm:$0xff] }
0x19d0   :  { %v1977_v5 = vadd.f32 %v5781_v28, %v1972_v45  ;;  %v4638_v24 = vpop.f32.mrb[63].mxu1 }
0x19d2   :  { %5051 = vtanh.f32 %v1977_v5  ;;  %v4151_v55 = vmul.f32 -1.442695, %v1977_v5 }
0x19d4   :  { %v2045_v50 = vpop.f32.mrb[64].mxu0 }
0x19d5   :  { %v2051_v29 = vadd.f32 %v2045_v50, %v207_v49  ;;  %v4645_v35 = vpop.f32.mrb[65].mxu0 }
0x19d6   :  { %v2048_v52 = vpop.f32.mrb[66].mxu0 }
0x19d7   :  { %5053 = vtanh.f32 %v2051_v29  ;;  %v4646_v30 = vpop.f32.mrb[67].mxu0  ;;  %v4153_v28 = vmul.f32 -1.442695, %v2051_v29 }
0x19d8   :  { %5055 = vpow2.f32 %v4151_v55 }
0x19d9   :  { %5057 = vpow2.f32 %v4153_v28 }
0x19dc   :  { %v5052_v53 = vpop.eup %5051 }
0x19dd   :  { %1987 = vrot.lane.b32.xlu0 %v5052_v53, %s5227_s24 }
0x19e1   :  { %v5054_v54 = vpop.eup %5053 }
0x19e2   :  { %2061 = vrot.lane.b32.xlu1 %v5054_v54, %s5227_s24  ;;  %v5056_v56 = vpop.eup %5055 }
0x19e3   :  { %v1981_v57 = vadd.f32 1.0, %v5056_v56  ;;  %v5058_v58 = vpop.eup %5057 }
0x19e4   :  { %v2055_v46 = vadd.f32 1.0, %v5058_v58 }
0x19e5   :  { %5059 = vrcp.f32 %v1981_v57 }
0x19e6   :  { %5061 = vrcp.f32 %v2055_v46 }
0x19ef   :  { %v5060_v51 = vpop.eup %5059 }
0x19f0   :  { %v5062_v61 = vpop.eup %5061  ;;  %v1985_v38 = vmul.f32 %v5060_v51, %v5836_v14 }
0x19f1   :  { %v2059_v40 = vmul.f32 %v5062_v61, %v5838_v17 }
0x1a4f   :  { %v1988_v59 = vpop.permute.xlu0 %1987 }
0x1a50   :  { %v1990_v60 = vmul.f32 %v5060_v51, %v1988_v59 }
0x1a52   :  { %1992 = vrot.lane.b32.xlu0 %v1990_v60, %s5228_s0 }
0x1a54   :  { %v2062_v62 = vpop.permute.xlu1 %2061 }
0x1a55   :  { %v2064_v44 = vmul.f32 %v5062_v61, %v2062_v62  ;;  %v4909_v62 = vld [vmem:[%s6436_s2 + $0x18] sm:$0xff]  }
0x1a57   :  { %2066 = vrot.lane.b32.xlu1 %v2064_v44, %s5228_s0  ;;  %v5951_v44 = vld [vmem:[%s6438_s14] sm:$0xff]  }
0x1ac4   :  { %v1993_v41 = vpop.permute.xlu0 %1992 }
0x1ac5   :  { %v5878_v63 = vadd.f32 %v1993_v41, %v1985_v38  ;;  %v5956_v38 = vld [vmem:[%s6439_s13] sm:$0xff]   ;;  %v5963_v41 = vld [vmem:[%s6438_s14 + $0x8] sm:$0xff]  }
0x1ac7   :  { %5063 = vtanh.f32 %v5878_v63 }
0x1ac9   :  { %v2067_v1 = vpop.permute.xlu1 %2066 }
0x1aca   :  { %v2069_v3 = vadd.f32 %v2067_v1, %v2059_v40  ;;  %v5971_v40 = vld [vmem:[%s6439_s13 + $0x8] sm:$0xff]  }
0x1acc   :  { %5065 = vtanh.f32 %v2069_v3 }
0x1ad1   :  { %v5064_v7 = vpop.eup %5063 }
0x1ad2   :  { %1998 = vrot.lane.b32.xlu0 %v5064_v7, %s5227_s24 }
0x1ad6   :  { %v5066_v8 = vpop.eup %5065 }
0x1ad7   :  { %2072 = vrot.lane.b32.xlu1 %v5066_v8, %s5227_s24 }
0x1b44   :  { %v1999_v34 = vpop.permute.xlu0 %1998 }
0x1b45   :  { %v5887_v6 = vmul.f32 %v5060_v51, %v1999_v34 }
0x1b47   :  { %v2077_v36 = vpack.c.bf16 %v5887_v6, %v5887_v6 }
0x1b49   :  { %2079 = vrot.lane.b32.xlu0 %v2077_v36, %s5228_s0  ;;  %v2073_v12 = vpop.permute.xlu1 %2072 }
0x1b4a   :  { %v2075_v14 = vmul.f32 %v5062_v61, %v2073_v12  ;;  %v4907_v61 = vld [vmem:[%s6436_s2 + $0x10] sm:$0xff]  }
0x1b4c   :  { %v2076_v17 = vpack.c.bf16 %v2075_v14, %v2075_v14 }
0x1b4e   :  { %2125 = vrot.lane.b32.xlu1 %v2076_v17, %s5228_s0 }
0x1bbb   :  { %v2080_v18 = vpop.permute.xlu0 %2079 }
0x1bbc   :  { %4652 = vmatmul.mubr.msk.bf16.vlgmr.msra.gmra.mrb[64].mxu1 %vm238_vm2, %v2080_v18 }
0x1bbd   :  { %4664 = vmatpush3.bf16.msra.mxu1 %v4900_v9  ;;  %4665 = vmatprep.mubr.msk.bf16.mxu1 %vm121_vm1, %v4902_v19 }
0x1bbe   :  { %4689 = vmatprep.subr.bf16.mxu1 %v5224_v0 }
0x1bc0   :  { %v2126_v11 = vpop.permute.xlu1 %2125 }
0x1bc1   :  { %4660 = vmatmul.mubr.msk.bf16.vlgmr.msra.gmra.mrb[68].mxu0 %vm238_vm2, %v2126_v11 }
0x1bc2   :  { %4674 = vmatpush3.bf16.msra.mxu0 %v5901_v22  ;;  %4677 = vmatprep.mubr.msk.bf16.mxu0 %vm5225_vm0, %v5224_v0 }
0x1bc3   :  { %4675 = vmatprep.subr.bf16.mxu0 %v5224_v0 }
0x1bc4   :  { %4666 = vmatmul.mubr.msk.bf16.vlgmr.msra.gmra.mrb[68].mxu1 %vm121_vm1, %v4903_v16 }
0x1bc5   :  { %4669 = vmatprep.mubr.msk.bf16.mxu1 %vm121_vm1, %v4907_v61  ;;  %4690 = vmatpush3.bf16.msra.mxu1 %v5956_v38 }
0x1bc6   :  { %4676 = vmatpush3.bf16.msra.mxu0 %v5912_v23  ;;  %4691 = vmatprep.subr.bf16.mxu1 %v5224_v0 }
0x1bc7   :  { %4681 = vmatprep.subr.bf16.mxu0 %v5224_v0 }
0x1bc9   :  { %4678 = vmatmul.mubr.bf16.vlgmr.msra.gmra.mrb[72].mxu0 %v5226_v4  ;;  %4692 = vmatpush3.bf16.msra.mxu1 %v5971_v40 }
0x1bca   :  { %4685 = vmatprep.mubr.msk.bf16.mxu0 %vm5225_vm0, %v5224_v0  ;;  %4682 = vmatpush3.bf16.msra.mxu0 %v5951_v44 }
0x1bcb   :  { %4683 = vmatprep.subr.bf16.mxu0 %v5224_v0  ;;  %4705 = vmatprep.subr.bf16.mxu1 %v5224_v0 }
0x1bcc   :  { %4670 = vmatmul.mubr.msk.bf16.gmra.mrb[72].mxu1 %vm121_vm1, %v4909_v62 }
0x1bcd   :  { %4693 = vmatprep.mubr.msk.bf16.mxu1 %vm5225_vm0, %v5224_v0 }
0x1bce   :  { %4684 = vmatpush3.bf16.msra.mxu0 %v5963_v41 }
0x1bcf   :  { %4697 = vmatprep.subr.bf16.mxu0 %v5224_v0 }
0x1bd1   :  { %4686 = vmatmul.mubr.bf16.vlgmr.msra.gmra.mrb[76].mxu0 %v5226_v4 }
0x1bd2   :  { %4698 = vmatpush3.bf16.msra.mxu0 %v5901_v22  ;;  %4701 = vmatprep.mubr.msk.bf16.mxu0 %vm5225_vm0, %v5224_v0 }
0x1bd3   :  { %4699 = vmatprep.subr.bf16.mxu0 %v5224_v0 }
0x1bd6   :  { %4700 = vmatpush3.bf16.msra.mxu0 %v5912_v23 }
0x1bd7   :  { %4713 = vmatprep.subr.bf16.mxu0 %v5224_v0 }
0x1c8f   :  { %v2118_v25 = vpop.f32.mrb[64].mxu1 }
0x1c90   :  { %v4653_v39 = vpop.f32.mrb[65].mxu1 }
0x1c91   :  { %v2121_v10 = vpop.f32.mrb[66].mxu1  ;;  %v6016_v39 = vld [vmem:[%s6440_s15] ss:$0 sm:$0xff] }
0x1c92   :  { %v4654_v43 = vpop.f32.mrb[67].mxu1 }
0x1c94   :  { %v2164_v37 = vpop.f32.mrb[68].mxu0 }
0x1c95   :  { %v5923_v47 = vadd.f32 %v2164_v37, %v2118_v25  ;;  %v4661_v45 = vpop.f32.mrb[69].mxu0 }
0x1c96   :  { %v2167_v27 = vpop.f32.mrb[70].mxu0 }
0x1c97   :  { %v5930_v13 = vpop.f32.mrb[68].mxu1  ;;  %v4662_v2 = vpop.f32.mrb[71].mxu0 }
0x1c98   :  { %v2291_v5 = vpop.f32.mrb[69].mxu1 }
0x1c99   :  { %v2292_v24 = vadd.f32 %v5928_v48, %v2291_v5  ;;  %v5933_v49 = vpop.f32.mrb[70].mxu1 }
0x1c9a   :  { %v5935_v50 = vpop.f32.mrb[71].mxu1 }
0x1c9b   :  { %v2295_v16 = vadd.f32 %v5928_v48, %v5935_v50 }
0x1c9c   :  { %v2382_v29 = vpop.f32.mrb[72].mxu0 }
0x1c9d   :  { %v2388_v35 = vadd.f32 %v2382_v29, %v2292_v24  ;;  %v4679_v52 = vpop.f32.mrb[73].mxu0 }
0x1c9e   :  { %v2385_v30 = vpop.f32.mrb[74].mxu0 }
0x1c9f   :  { %5067 = vtanh.f32 %v2388_v35  ;;  %v4680_v53 = vpop.f32.mrb[75].mxu0  ;;  %v4169_v55 = vmul.f32 -1.442695, %v2388_v35  ;;  %v5989_v9 = vpop.f32.mrb[72].mxu1 }
0x1ca0   :  { %v5991_v34 = vpop.f32.mrb[73].mxu1 }
0x1ca1   :  { %5069 = vpow2.f32 %v4169_v55  ;;  %v5993_v36 = vpop.f32.mrb[74].mxu1 }
0x1ca2   :  { %v5995_v12 = vpop.f32.mrb[75].mxu1 }
0x1ca4   :  { %v2468_v14 = vpop.f32.mrb[76].mxu0 }
0x1ca5   :  { %v4687_v17 = vpop.f32.mrb[77].mxu0 }
0x1ca6   :  { %v2471_v19 = vpop.f32.mrb[78].mxu0 }
0x1ca7   :  { %v4688_v18 = vpop.f32.mrb[79].mxu0 }
0x1ca9   :  { %v5068_v54 = vpop.eup %5067 }
0x1caa   :  { %2398 = vrot.lane.b32.xlu0 %v5068_v54, %s5227_s24 }
0x1cab   :  { %v5070_v28 = vpop.eup %5069 }
0x1cac   :  { %v2392_v56 = vadd.f32 1.0, %v5070_v28 }
0x1cae   :  { %5071 = vrcp.f32 %v2392_v56 }
0x1cb8   :  { %v5072_v57 = vpop.eup %5071 }
0x1cb9   :  { %v2396_v51 = vmul.f32 0.0, %v5072_v57 }
0x1d1c   :  { %v2399_v58 = vpop.permute.xlu0 %2398 }
0x1d1d   :  { %v2401_v46 = vmul.f32 %v5072_v57, %v2399_v58 }
0x1d1f   :  { %2403 = vrot.lane.b32.xlu1 %v2401_v46, %s5228_s0 }
0x1d91   :  { %v2404_v59 = vpop.permute.xlu1 %2403 }
0x1d92   :  { %v5939_v60 = vadd.f32 %v2404_v59, %v2396_v51 }
0x1d94   :  { %5073 = vtanh.f32 %v5939_v60 }
0x1d9e   :  { %v5074_v1 = vpop.eup %5073 }
0x1d9f   :  { %2409 = vrot.lane.b32.xlu0 %v5074_v1, %s5227_s24 }
0x1e11   :  { %v2410_v3 = vpop.permute.xlu0 %2409 }
0x1e12   :  { %v2412_v7 = vmul.f32 %v5072_v57, %v2410_v3 }
0x1e14   :  { %v2413_v8 = vpack.c.bf16 %v2412_v7, %v2412_v7 }
0x1e16   :  { %2475 = vrot.lane.b32.xlu1 %v2413_v8, %s5228_s0 }
0x1e88   :  { %v2476_v11 = vpop.permute.xlu1 %2475 }
0x1e89   :  { %4694 = vmatmul.mubr.msk.bf16.vlgmr.msra.gmra.mrb[76].mxu1 %vm238_vm2, %v2476_v11  ;;  %4702 = vmatmul.mubr.msk.bf16.vlgmr.msra.gmra.mrb[80].mxu0 %vm238_vm2, %v2476_v11 }
0x1e8a   :  { %4714 = vmatpush3.bf16.msra.mxu0 %v5956_v38  ;;  %4706 = vmatpush3.bf16.msra.mxu1 %v5951_v44 }
0x1e8b   :  { %4715 = vmatprep.subr.bf16.mxu0 %v5224_v0  ;;  %4707 = vmatprep.subr.bf16.mxu1 %v5224_v0 }
0x1e8c   :  { %4717 = vmatprep.mubr.msk.bf16.mxu0 %vm5225_vm0, %v5224_v0  ;;  %4709 = vmatprep.mubr.msk.bf16.mxu1 %vm5225_vm0, %v5224_v0 }
0x1e8e   :  { %4716 = vmatpush3.bf16.msra.mxu0 %v5971_v40  ;;  %4708 = vmatpush3.bf16.msra.mxu1 %v5963_v41 }
0x1e8f   :  { %4721 = vmatprep.subr.bf16.mxu1 %v5224_v0  ;;  %4729 = vmatprep.subr.bf16.mxu0 %v5224_v0 }
0x1f5c   :  { %v2526_v25 = vpop.f32.mrb[76].mxu1  ;;  %v2607_v10 = vpop.f32.mrb[80].mxu0 }
0x1f5d   :  { %v2527_v43 = vadd.f32 %v2526_v25, %v2468_v14  ;;  %v2613_v37 = vadd.f32 %v2607_v10, %v2295_v16  ;;  %v4695_v45 = vpop.f32.mrb[77].mxu1  ;;  %v4703_v27 = vpop.f32.mrb[81].mxu0 }
0x1f5e   :  { %v2529_v2 = vpop.f32.mrb[78].mxu1  ;;  %v2610_v5 = vpop.f32.mrb[82].mxu0 }
0x1f5f   :  { %v2539_v24 = vadd.f32 %v6016_v39, %v2527_v43  ;;  %5075 = vtanh.f32 %v2613_v37  ;;  %v4696_v29 = vpop.f32.mrb[79].mxu1  ;;  %v4704_v35 = vpop.f32.mrb[83].mxu0  ;;  %v4178_v30 = vmul.f32 -1.442695, %v2613_v37 }
0x1f61   :  { %5077 = vtanh.f32 %v2539_v24  ;;  %v4176_v53 = vmul.f32 -1.442695, %v2539_v24 }
0x1f62   :  { %5079 = vpow2.f32 %v4178_v30 }
0x1f63   :  { %5081 = vpow2.f32 %v4176_v53  ;;  %v2300_v53 = vadd.f32 %v5930_v13, %v5928_v48 }
0x1f69   :  { %v5076_v50 = vpop.eup %5075 }
0x1f6a   :  { %2623 = vrot.lane.b32.xlu1 %v5076_v50, %s5227_s24 }
0x1f6b   :  { %v5078_v52 = vpop.eup %5077 }
0x1f6c   :  { %2549 = vrot.lane.b32.xlu0 %v5078_v52, %s5227_s24  ;;  %v5080_v54 = vpop.eup %5079 }
0x1f6d   :  { %v5082_v55 = vpop.eup %5081  ;;  %v2617_v28 = vadd.f32 1.0, %v5080_v54 }
0x1f6e   :  { %v2543_v56 = vadd.f32 1.0, %v5082_v55 }
0x1f6f   :  { %5083 = vrcp.f32 %v2617_v28 }
0x1f70   :  { %5085 = vrcp.f32 %v2543_v56 }
0x1f79   :  { %v5084_v57 = vpop.eup %5083 }
0x1f7a   :  { %v5086_v51 = vpop.eup %5085  ;;  %v2621_v62 = vmul.f32 %v5084_v57, %v5939_v60 }
0x1f7b   :  { %v2547_v7 = vmul.f32 0.0, %v5086_v51 }
0x1fdc   :  { %v2624_v58 = vpop.permute.xlu1 %2623 }
0x1fdd   :  { %v2626_v46 = vmul.f32 %v5084_v57, %v2624_v58 }
0x1fde   :  { %v2550_v59 = vpop.permute.xlu0 %2549 }
0x1fdf   :  { %v2552_v61 = vmul.f32 %v5086_v51, %v2550_v59  ;;  %2628 = vrot.lane.b32.xlu1 %v2626_v46, %s5228_s0 }
0x1fe1   :  { %2554 = vrot.lane.b32.xlu0 %v2552_v61, %s5228_s0 }
0x2051   :  { %v2629_v1 = vpop.permute.xlu1 %2628 }
0x2052   :  { %v6024_v3 = vadd.f32 %v2629_v1, %v2621_v62 }
0x2053   :  { %v2555_v8 = vpop.permute.xlu0 %2554 }
0x2054   :  { %5087 = vtanh.f32 %v6024_v3  ;;  %v6027_v14 = vadd.f32 %v2555_v8, %v2547_v7 }
0x2056   :  { %5089 = vtanh.f32 %v6027_v14 }
0x205e   :  { %v5088_v17 = vpop.eup %5087 }
0x205f   :  { %2634 = vrot.lane.b32.xlu1 %v5088_v17, %s5227_s24 }
0x2060   :  { %v5090_v19 = vpop.eup %5089 }
0x2061   :  { %2560 = vrot.lane.b32.xlu0 %v5090_v19, %s5227_s24 }
0x20d1   :  { %v2635_v18 = vpop.permute.xlu1 %2634 }
0x20d2   :  { %v2637_v11 = vmul.f32 %v5084_v57, %v2635_v18 }
0x20d3   :  { %v2561_v60 = vpop.permute.xlu0 %2560 }
0x20d4   :  { %v2638_v16 = vpack.c.bf16 %v2637_v11, %v2637_v11  ;;  %v6032_v25 = vmul.f32 %v5086_v51, %v2561_v60 }
0x20d6   :  { %v2639_v10 = vpack.c.bf16 %v6032_v25, %v6032_v25  ;;  %2687 = vrot.lane.b32.xlu1 %v2638_v16, %s5228_s0 }
0x20d8   :  { %2641 = vrot.lane.b32.xlu0 %v2639_v10, %s5228_s0 }
0x2148   :  { %v2688_v43 = vpop.permute.xlu1 %2687 }
0x2149   :  { %4718 = vmatmul.mubr.msk.bf16.vlgmr.msra.gmra.mrb[84].mxu0 %vm238_vm2, %v2688_v43 }
0x214a   :  { %v2642_v37 = vpop.permute.xlu0 %2641  ;;  %4730 = vmatpush3.bf16.msra.mxu0 %v5951_v44  ;;  %4733 = vmatprep.mubr.msk.bf16.mxu0 %vm5225_vm0, %v5224_v0 }
0x214b   :  { %4710 = vmatmul.mubr.msk.bf16.vlgmr.msra.gmra.mrb[80].mxu1 %vm238_vm2, %v2642_v37  ;;  %4731 = vmatprep.subr.bf16.mxu0 %v5224_v0 }
0x214c   :  { %4722 = vmatpush3.bf16.msra.mxu1 %v5901_v22  ;;  %4725 = vmatprep.mubr.msk.bf16.mxu1 %vm5225_vm0, %v5224_v0 }
0x214d   :  { %4723 = vmatprep.subr.bf16.mxu1 %v5224_v0 }
0x214e   :  { %4732 = vmatpush3.bf16.msra.mxu0 %v5963_v41 }
0x214f   :  { %4745 = vmatprep.subr.bf16.mxu0 %v5224_v0 }
0x2150   :  { %4724 = vmatpush3.bf16.msra.mxu1 %v5912_v23 }
0x2151   :  { %4737 = vmatprep.subr.bf16.mxu1 %v5224_v0 }
0x2153   :  { %4726 = vmatmul.mubr.msk.bf16.vlgmr.msra.gmra.mrb[84].mxu1 %vm238_vm2, %v2688_v43 }
0x2154   :  { %4738 = vmatpush3.bf16.msra.mxu1 %v5956_v38  ;;  %4741 = vmatprep.mubr.msk.bf16.mxu1 %vm5225_vm0, %v5224_v0 }
0x2155   :  { %4739 = vmatprep.subr.bf16.mxu1 %v5224_v0 }
0x2158   :  { %4740 = vmatpush3.bf16.msra.mxu1 %v5971_v40 }
0x2159   :  { %4753 = vmatprep.subr.bf16.mxu1 %v5224_v0 }
0x221c   :  { %v2726_v45 = vpop.f32.mrb[84].mxu0 }
0x221d   :  { %v4719_v27 = vpop.f32.mrb[85].mxu0 }
0x221e   :  { %v2680_v2 = vpop.f32.mrb[80].mxu1  ;;  %v2729_v5 = vpop.f32.mrb[86].mxu0 }
0x221f   :  { %v2727_v24 = vadd.f32 %v2726_v45, %v2680_v2  ;;  %v4711_v29 = vpop.f32.mrb[81].mxu1  ;;  %v4720_v35 = vpop.f32.mrb[87].mxu0 }
0x2220   :  { %v2683_v50 = vpop.f32.mrb[82].mxu1 }
0x2221   :  { %v2732_v52 = vadd.f32 %v6016_v39, %v2727_v24  ;;  %v4712_v30 = vpop.f32.mrb[83].mxu1 }
0x2223   :  { %5091 = vtanh.f32 %v2732_v52  ;;  %v4181_v51 = vmul.f32 -1.442695, %v2732_v52 }
0x2226   :  { %v2800_v54 = vpop.f32.mrb[84].mxu1 }
0x2227   :  { %v2806_v55 = vadd.f32 %v2800_v54, %v2300_v53  ;;  %v4727_v28 = vpop.f32.mrb[85].mxu1 }
0x2228   :  { %v2803_v56 = vpop.f32.mrb[86].mxu1 }
0x2229   :  { %5093 = vtanh.f32 %v2806_v55  ;;  %v4728_v57 = vpop.f32.mrb[87].mxu1  ;;  %v4183_v59 = vmul.f32 -1.442695, %v2806_v55  ;;  %v2303_v56 = vadd.f32 %v5933_v49, %v5928_v48 }
0x222a   :  { %5095 = vpow2.f32 %v4181_v51 }
0x222b   :  { %5097 = vpow2.f32 %v4183_v59 }
0x222d   :  { %v5092_v58 = vpop.eup %5091 }
0x222e   :  { %2742 = vrot.lane.b32.xlu0 %v5092_v58, %s5227_s24 }
0x2233   :  { %v5094_v46 = vpop.eup %5093 }
0x2234   :  { %2816 = vrot.lane.b32.xlu1 %v5094_v46, %s5227_s24  ;;  %v5096_v61 = vpop.eup %5095 }
0x2235   :  { %v2736_v62 = vadd.f32 1.0, %v5096_v61  ;;  %v5098_v1 = vpop.eup %5097 }
0x2236   :  { %v2810_v13 = vadd.f32 1.0, %v5098_v1 }
0x2237   :  { %5099 = vrcp.f32 %v2736_v62 }
0x2238   :  { %5101 = vrcp.f32 %v2810_v13 }
0x2241   :  { %v5100_v7 = vpop.eup %5099 }
0x2242   :  { %v5102_v19 = vpop.eup %5101  ;;  %v2740_v60 = vmul.f32 %v5100_v7, %v6027_v14 }
0x2243   :  { %v2814_v43 = vmul.f32 %v5102_v19, %v6024_v3 }
0x22a0   :  { %v2743_v8 = vpop.permute.xlu0 %2742 }
0x22a1   :  { %v2745_v17 = vmul.f32 %v5100_v7, %v2743_v8 }
0x22a3   :  { %2747 = vrot.lane.b32.xlu0 %v2745_v17, %s5228_s0 }
0x22a6   :  { %v2817_v18 = vpop.permute.xlu1 %2816 }
0x22a7   :  { %v2819_v11 = vmul.f32 %v5102_v19, %v2817_v18 }
0x22a9   :  { %2821 = vrot.lane.b32.xlu1 %v2819_v11, %s5228_s0 }
0x2315   :  { %v2748_v16 = vpop.permute.xlu0 %2747 }
0x2316   :  { %v6067_v10 = vadd.f32 %v2748_v16, %v2740_v60 }
0x2318   :  { %5103 = vtanh.f32 %v6067_v10 }
0x231b   :  { %v2822_v37 = vpop.permute.xlu1 %2821 }
0x231c   :  { %v6071_v45 = vadd.f32 %v2822_v37, %v2814_v43 }
0x231e   :  { %5105 = vtanh.f32 %v6071_v45 }
0x2322   :  { %v5104_v27 = vpop.eup %5103 }
0x2323   :  { %2753 = vrot.lane.b32.xlu0 %v5104_v27, %s5227_s24 }
0x2328   :  { %v5106_v2 = vpop.eup %5105 }
0x2329   :  { %2827 = vrot.lane.b32.xlu1 %v5106_v2, %s5227_s24 }
0x2395   :  { %v2754_v5 = vpop.permute.xlu0 %2753 }
0x2396   :  { %v6076_v14 = vmul.f32 %v5100_v7, %v2754_v5 }
0x2398   :  { %v2832_v24 = vpack.c.bf16 %v6076_v14, %v6076_v14 }
0x239a   :  { %2834 = vrot.lane.b32.xlu0 %v2832_v24, %s5228_s0 }
0x239b   :  { %v2828_v3 = vpop.permute.xlu1 %2827 }
0x239c   :  { %v2830_v29 = vmul.f32 %v5102_v19, %v2828_v3 }
0x239e   :  { %v2831_v35 = vpack.c.bf16 %v2830_v29, %v2830_v29 }
0x23a0   :  { %2880 = vrot.lane.b32.xlu1 %v2831_v35, %s5228_s0 }
0x240c   :  { %v2835_v50 = vpop.permute.xlu0 %2834 }
0x240d   :  { %4734 = vmatmul.mubr.msk.bf16.vlgmr.msra.gmra.mrb[88].mxu0 %vm238_vm2, %v2835_v50 }
0x240e   :  { %4746 = vmatpush3.bf16.msra.mxu0 %v5901_v22  ;;  %4749 = vmatprep.mubr.msk.bf16.mxu0 %vm5225_vm0, %v5224_v0 }
0x240f   :  { %4747 = vmatprep.subr.bf16.mxu0 %v5224_v0 }
0x2412   :  { %4748 = vmatpush3.bf16.msra.mxu0 %v5912_v23  ;;  %v2881_v52 = vpop.permute.xlu1 %2880 }
0x2413   :  { %4742 = vmatmul.mubr.msk.bf16.vlgmr.msra.gmra.mrb[88].mxu1 %vm238_vm2, %v2881_v52  ;;  %4761 = vmatprep.subr.bf16.mxu0 %v5224_v0 }
0x2414   :  { %4754 = vmatpush3.bf16.msra.mxu1 %v5951_v44  ;;  %4757 = vmatprep.mubr.msk.bf16.mxu1 %vm5225_vm0, %v5224_v0 }
0x2415   :  { %4750 = vmatmul.mubr.msk.bf16.vlgmr.msra.gmra.mrb[92].mxu0 %vm238_vm2, %v2881_v52  ;;  %4755 = vmatprep.subr.bf16.mxu1 %v5224_v0 }
0x2416   :  { %4762 = vmatpush3.bf16.msra.mxu0 %v5956_v38  ;;  %4765 = vmatprep.mubr.msk.bf16.mxu0 %vm5225_vm0, %v5224_v0 }
0x2417   :  { %4763 = vmatprep.subr.bf16.mxu0 %v5224_v0 }
0x2418   :  { %4756 = vmatpush3.bf16.msra.mxu1 %v5963_v41 }
0x2419   :  { %4769 = vmatprep.subr.bf16.mxu1 %v5224_v0 }
0x241a   :  { %4764 = vmatpush3.bf16.msra.mxu0 %v5971_v40 }
0x241b   :  { %4777 = vmatprep.subr.bf16.mxu0 %v5224_v0 }
0x24e0   :  { %v2873_v30 = vpop.f32.mrb[88].mxu0 }
0x24e1   :  { %v4735_v53 = vpop.f32.mrb[89].mxu0 }
0x24e2   :  { %v2876_v54 = vpop.f32.mrb[90].mxu0 }
0x24e3   :  { %v4736_v55 = vpop.f32.mrb[91].mxu0 }
0x24e6   :  { %v2919_v28 = vpop.f32.mrb[88].mxu1 }
0x24e7   :  { %v2920_v57 = vadd.f32 %v2919_v28, %v2873_v30  ;;  %v4743_v58 = vpop.f32.mrb[89].mxu1 }
0x24e8   :  { %v2922_v46 = vpop.f32.mrb[90].mxu1  ;;  %v2993_v51 = vpop.f32.mrb[92].mxu0 }
0x24e9   :  { %v2925_v59 = vadd.f32 %v6016_v39, %v2920_v57  ;;  %v2999_v61 = vadd.f32 %v2993_v51, %v2303_v56  ;;  %v4744_v62 = vpop.f32.mrb[91].mxu1  ;;  %v4751_v1 = vpop.f32.mrb[93].mxu0 }
0x24ea   :  { %v2996_v13 = vpop.f32.mrb[94].mxu0 }
0x24eb   :  { %5107 = vtanh.f32 %v2925_v59  ;;  %v4752_v7 = vpop.f32.mrb[95].mxu0  ;;  %v4186_v49 = vmul.f32 -1.442695, %v2925_v59  ;;  %v4188_v19 = vmul.f32 -1.442695, %v2999_v61 }
0x24ec   :  { %5109 = vtanh.f32 %v2999_v61 }
0x24ed   :  { %5111 = vpow2.f32 %v4186_v49 }
0x24ee   :  { %5113 = vpow2.f32 %v4188_v19  ;;  %v2308_v19 = vadd.f32 %v5928_v48, %v5991_v34 }
0x24f5   :  { %v5108_v8 = vpop.eup %5107 }
0x24f6   :  { %v5110_v17 = vpop.eup %5109  ;;  %2935 = vrot.lane.b32.xlu0 %v5108_v8, %s5227_s24 }
0x24f7   :  { %3009 = vrot.lane.b32.xlu1 %v5110_v17, %s5227_s24  ;;  %v5112_v18 = vpop.eup %5111 }
0x24f8   :  { %v5114_v11 = vpop.eup %5113  ;;  %v2929_v60 = vadd.f32 1.0, %v5112_v18 }
0x24f9   :  { %v3003_v16 = vadd.f32 1.0, %v5114_v11 }
0x24fa   :  { %5115 = vrcp.f32 %v2929_v60 }
0x24fb   :  { %5117 = vrcp.f32 %v3003_v16 }
0x2504   :  { %v5116_v43 = vpop.eup %5115 }
0x2505   :  { %v5118_v27 = vpop.eup %5117  ;;  %v2933_v3 = vmul.f32 %v5116_v43, %v6067_v10 }
0x2506   :  { %v3007_v35 = vmul.f32 %v5118_v27, %v6071_v45 }
0x2568   :  { %v2936_v37 = vpop.permute.xlu0 %2935 }
0x2569   :  { %v2938_v2 = vmul.f32 %v5116_v43, %v2936_v37  ;;  %v3010_v5 = vpop.permute.xlu1 %3009 }
0x256a   :  { %v3012_v24 = vmul.f32 %v5118_v27, %v3010_v5 }
0x256b   :  { %2940 = vrot.lane.b32.xlu0 %v2938_v2, %s5228_s0 }
0x256c   :  { %3014 = vrot.lane.b32.xlu1 %v3012_v24, %s5228_s0 }
0x25dd   :  { %v2941_v29 = vpop.permute.xlu0 %2940 }
0x25de   :  { %v6112_v50 = vadd.f32 %v2941_v29, %v2933_v3  ;;  %v3015_v52 = vpop.permute.xlu1 %3014 }
0x25df   :  { %v6114_v30 = vadd.f32 %v3015_v52, %v3007_v35 }
0x25e0   :  { %5119 = vtanh.f32 %v6112_v50 }
0x25e1   :  { %5121 = vtanh.f32 %v6114_v30 }
0x25ea   :  { %v5120_v53 = vpop.eup %5119 }
0x25eb   :  { %v5122_v54 = vpop.eup %5121  ;;  %2946 = vrot.lane.b32.xlu0 %v5120_v53, %s5227_s24 }
0x25ec   :  { %3020 = vrot.lane.b32.xlu1 %v5122_v54, %s5227_s24 }
0x265d   :  { %v2947_v55 = vpop.permute.xlu0 %2946 }
0x265e   :  { %v6120_v10 = vmul.f32 %v5116_v43, %v2947_v55  ;;  %v3021_v28 = vpop.permute.xlu1 %3020 }
0x265f   :  { %v3023_v45 = vmul.f32 %v5118_v27, %v3021_v28 }
0x2660   :  { %v3025_v56 = vpack.c.bf16 %v6120_v10, %v6120_v10 }
0x2661   :  { %v3024_v57 = vpack.c.bf16 %v3023_v45, %v3023_v45 }
0x2662   :  { %3027 = vrot.lane.b32.xlu0 %v3025_v56, %s5228_s0 }
0x2663   :  { %3073 = vrot.lane.b32.xlu1 %v3024_v57, %s5228_s0 }
0x26d4   :  { %v3028_v58 = vpop.permute.xlu0 %3027 }
0x26d5   :  { %v3074_v46 = vpop.permute.xlu1 %3073  ;;  %4758 = vmatmul.mubr.msk.bf16.vlgmr.msra.gmra.mrb[92].mxu1 %vm238_vm2, %v3028_v58 }
0x26d6   :  { %4766 = vmatmul.mubr.msk.bf16.vlgmr.msra.gmra.mrb[96].mxu0 %vm238_vm2, %v3074_v46  ;;  %4770 = vmatpush3.bf16.msra.mxu1 %v5901_v22 }
0x26d7   :  { %4771 = vmatprep.subr.bf16.mxu1 %v5224_v0  ;;  %4773 = vmatprep.mubr.msk.bf16.mxu1 %vm5225_vm0, %v5224_v0 }
0x26d8   :  { %4778 = vmatpush3.bf16.msra.mxu0 %v5951_v44  ;;  %4781 = vmatprep.mubr.msk.bf16.mxu0 %vm5225_vm0, %v5224_v0 }
0x26d9   :  { %4779 = vmatprep.subr.bf16.mxu0 %v5224_v0 }
0x26da   :  { %4772 = vmatpush3.bf16.msra.mxu1 %v5912_v23 }
0x26db   :  { %4785 = vmatprep.subr.bf16.mxu1 %v5224_v0 }
0x26dc   :  { %4780 = vmatpush3.bf16.msra.mxu0 %v5963_v41 }
0x26dd   :  { %4774 = vmatmul.mubr.msk.bf16.vlgmr.msra.gmra.mrb[96].mxu1 %vm238_vm2, %v3074_v46  ;;  %4793 = vmatprep.subr.bf16.mxu0 %v5224_v0 }
0x26de   :  { %4786 = vmatpush3.bf16.msra.mxu1 %v5956_v38  ;;  %4789 = vmatprep.mubr.msk.bf16.mxu1 %vm5225_vm0, %v5224_v0 }
0x26df   :  { %4787 = vmatprep.subr.bf16.mxu1 %v5224_v0 }
0x26e2   :  { %4788 = vmatpush3.bf16.msra.mxu1 %v5971_v40 }
0x26e3   :  { %4801 = vmatprep.subr.bf16.mxu1 %v5224_v0 }
0x27a8   :  { %v3066_v51 = vpop.f32.mrb[92].mxu1 }
0x27a9   :  { %v3112_v59 = vpop.f32.mrb[96].mxu0  ;;  %v4759_v61 = vpop.f32.mrb[93].mxu1 }
0x27aa   :  { %v3113_v62 = vadd.f32 %v3112_v59, %v3066_v51  ;;  %v4767_v1 = vpop.f32.mrb[97].mxu0  ;;  %v3069_v13 = vpop.f32.mrb[94].mxu1 }
0x27ab   :  { %v3115_v7 = vpop.f32.mrb[98].mxu0  ;;  %v4760_v8 = vpop.f32.mrb[95].mxu1 }
0x27ac   :  { %v3118_v17 = vadd.f32 %v6016_v39, %v3113_v62  ;;  %v4768_v49 = vpop.f32.mrb[99].mxu0 }
0x27ae   :  { %5123 = vtanh.f32 %v3118_v17  ;;  %v4191_v2 = vmul.f32 -1.442695, %v3118_v17 }
0x27b0   :  { %v3186_v18 = vpop.f32.mrb[96].mxu1 }
0x27b1   :  { %v3192_v11 = vadd.f32 %v3186_v18, %v2308_v19  ;;  %v4775_v60 = vpop.f32.mrb[97].mxu1 }
0x27b2   :  { %v3189_v16 = vpop.f32.mrb[98].mxu1 }
0x27b3   :  { %5125 = vtanh.f32 %v3192_v11  ;;  %v4776_v43 = vpop.f32.mrb[99].mxu1  ;;  %v4193_v5 = vmul.f32 -1.442695, %v3192_v11 }
0x27b4   :  { %5127 = vpow2.f32 %v4191_v2 }
0x27b5   :  { %5129 = vpow2.f32 %v4193_v5 }
0x27b8   :  { %v5124_v37 = vpop.eup %5123 }
0x27b9   :  { %3128 = vrot.lane.b32.xlu0 %v5124_v37, %s5227_s24  ;;  %v2311_v37 = vadd.f32 %v5928_v48, %v5995_v12 }
0x27bd   :  { %v5126_v27 = vpop.eup %5125 }
0x27be   :  { %3202 = vrot.lane.b32.xlu1 %v5126_v27, %s5227_s24  ;;  %v5128_v24 = vpop.eup %5127 }
0x27bf   :  { %v3122_v3 = vadd.f32 1.0, %v5128_v24  ;;  %v5130_v29 = vpop.eup %5129 }
0x27c0   :  { %v3196_v34 = vadd.f32 1.0, %v5130_v29 }
0x27c1   :  { %5131 = vrcp.f32 %v3122_v3 }
0x27c2   :  { %5133 = vrcp.f32 %v3196_v34 }
0x27cb   :  { %v5132_v35 = vpop.eup %5131 }
0x27cc   :  { %v5134_v54 = vpop.eup %5133  ;;  %v3126_v45 = vmul.f32 %v5132_v35, %v6112_v50 }
0x27cd   :  { %v3200_v58 = vmul.f32 %v5134_v54, %v6114_v30 }
0x282b   :  { %v3129_v52 = vpop.permute.xlu0 %3128 }
0x282c   :  { %v3131_v53 = vmul.f32 %v5132_v35, %v3129_v52 }
0x282e   :  { %3133 = vrot.lane.b32.xlu0 %v3131_v53, %s5228_s0 }
0x2830   :  { %v3203_v55 = vpop.permute.xlu1 %3202 }
0x2831   :  { %v3205_v28 = vmul.f32 %v5134_v54, %v3203_v55 }
0x2833   :  { %3207 = vrot.lane.b32.xlu1 %v3205_v28, %s5228_s0 }
0x28a0   :  { %v3134_v56 = vpop.permute.xlu0 %3133 }
0x28a1   :  { %v6155_v57 = vadd.f32 %v3134_v56, %v3126_v45 }
0x28a3   :  { %5135 = vtanh.f32 %v6155_v57 }
0x28a5   :  { %v3208_v46 = vpop.permute.xlu1 %3207 }
0x28a6   :  { %v6159_v51 = vadd.f32 %v3208_v46, %v3200_v58 }
0x28a8   :  { %5137 = vtanh.f32 %v6159_v51 }
0x28ad   :  { %v5136_v59 = vpop.eup %5135 }
0x28ae   :  { %3139 = vrot.lane.b32.xlu0 %v5136_v59, %s5227_s24 }
0x28b2   :  { %v5138_v61 = vpop.eup %5137 }
0x28b3   :  { %3213 = vrot.lane.b32.xlu1 %v5138_v61, %s5227_s24 }
0x2920   :  { %v3140_v62 = vpop.permute.xlu0 %3139 }
0x2921   :  { %v6164_v50 = vmul.f32 %v5132_v35, %v3140_v62 }
0x2923   :  { %v3218_v1 = vpack.c.bf16 %v6164_v50, %v6164_v50 }
0x2925   :  { %3220 = vrot.lane.b32.xlu0 %v3218_v1, %s5228_s0  ;;  %v3214_v30 = vpop.permute.xlu1 %3213 }
0x2926   :  { %v3216_v13 = vmul.f32 %v5134_v54, %v3214_v30 }
0x2928   :  { %v3217_v7 = vpack.c.bf16 %v3216_v13, %v3216_v13 }
0x292a   :  { %3266 = vrot.lane.b32.xlu1 %v3217_v7, %s5228_s0 }
0x2997   :  { %v3221_v8 = vpop.permute.xlu0 %3220 }
0x2998   :  { %4782 = vmatmul.mubr.msk.bf16.vlgmr.msra.gmra.mrb[100].mxu0 %vm238_vm2, %v3221_v8 }
0x2999   :  { %4794 = vmatpush3.bf16.msra.mxu0 %v5901_v22  ;;  %4797 = vmatprep.mubr.msk.bf16.mxu0 %vm5225_vm0, %v5224_v0 }
0x299a   :  { %4795 = vmatprep.subr.bf16.mxu0 %v5224_v0 }
0x299c   :  { %v3267_v17 = vpop.permute.xlu1 %3266 }
0x299d   :  { %4796 = vmatpush3.bf16.msra.mxu0 %v5912_v23  ;;  %4790 = vmatmul.mubr.msk.bf16.vlgmr.msra.gmra.mrb[100].mxu1 %vm238_vm2, %v3267_v17 }
0x299e   :  { %4809 = vmatprep.subr.bf16.mxu0 %v5224_v0  ;;  %4802 = vmatpush3.bf16.msra.mxu1 %v5951_v44 }
0x299f   :  { %4803 = vmatprep.subr.bf16.mxu1 %v5224_v0  ;;  %4805 = vmatprep.mubr.msk.bf16.mxu1 %vm5225_vm0, %v5224_v0 }
0x29a0   :  { %4798 = vmatmul.mubr.msk.bf16.vlgmr.msra.gmra.mrb[104].mxu0 %vm238_vm2, %v3267_v17 }
0x29a1   :  { %4810 = vmatpush3.bf16.msra.mxu0 %v5956_v38  ;;  %4813 = vmatprep.mubr.msk.bf16.mxu0 %vm5225_vm0, %v5224_v0 }
0x29a2   :  { %4811 = vmatprep.subr.bf16.mxu0 %v5224_v0  ;;  %4804 = vmatpush3.bf16.msra.mxu1 %v5963_v41 }
0x29a3   :  { %4817 = vmatprep.subr.bf16.mxu1 %v5224_v0 }
0x29a5   :  { %4812 = vmatpush3.bf16.msra.mxu0 %v5971_v40 }
0x29a6   :  { %4825 = vmatprep.subr.bf16.mxu0 %v5224_v0 }
0x2a6b   :  { %v3259_v49 = vpop.f32.mrb[100].mxu0 }
0x2a6c   :  { %v4783_v19 = vpop.f32.mrb[101].mxu0 }
0x2a6d   :  { %v3262_v18 = vpop.f32.mrb[102].mxu0 }
0x2a6e   :  { %v4784_v11 = vpop.f32.mrb[103].mxu0 }
0x2a70   :  { %v3305_v60 = vpop.f32.mrb[100].mxu1 }
0x2a71   :  { %v3306_v16 = vadd.f32 %v3305_v60, %v3259_v49  ;;  %v4791_v43 = vpop.f32.mrb[101].mxu1 }
0x2a72   :  { %v3308_v27 = vpop.f32.mrb[102].mxu1 }
0x2a73   :  { %v3311_v2 = vadd.f32 %v6016_v39, %v3306_v16  ;;  %v3379_v5 = vpop.f32.mrb[104].mxu0  ;;  %v4792_v24 = vpop.f32.mrb[103].mxu1 }
0x2a74   :  { %v3385_v3 = vadd.f32 %v3379_v5, %v2311_v37  ;;  %v4799_v29 = vpop.f32.mrb[105].mxu0 }
0x2a75   :  { %5139 = vtanh.f32 %v3311_v2  ;;  %v3382_v34 = vpop.f32.mrb[106].mxu0  ;;  %v4196_v54 = vmul.f32 -1.442695, %v3311_v2 }
0x2a76   :  { %5141 = vtanh.f32 %v3385_v3  ;;  %v4800_v35 = vpop.f32.mrb[107].mxu0  ;;  %v4198_v55 = vmul.f32 -1.442695, %v3385_v3  ;;  %v2316_v34 = vadd.f32 %v5989_v9, %v5928_v48 }
0x2a77   :  { %5143 = vpow2.f32 %v4196_v54 }
0x2a78   :  { %5145 = vpow2.f32 %v4198_v55 }
0x2a7f   :  { %v5140_v52 = vpop.eup %5139 }
0x2a80   :  { %v5142_v53 = vpop.eup %5141  ;;  %3321 = vrot.lane.b32.xlu0 %v5140_v52, %s5227_s24 }
0x2a81   :  { %3395 = vrot.lane.b32.xlu1 %v5142_v53, %s5227_s24  ;;  %v5144_v12 = vpop.eup %5143 }
0x2a82   :  { %v5146_v28 = vpop.eup %5145  ;;  %v3315_v45 = vadd.f32 1.0, %v5144_v12 }
0x2a83   :  { %v3389_v56 = vadd.f32 1.0, %v5146_v28 }
0x2a84   :  { %5147 = vrcp.f32 %v3315_v45 }
0x2a85   :  { %5149 = vrcp.f32 %v3389_v56 }
0x2a8e   :  { %v5148_v58 = vpop.eup %5147 }
0x2a8f   :  { %v5150_v59 = vpop.eup %5149  ;;  %v3319_v30 = vmul.f32 %v5148_v58, %v6155_v57 }
0x2a90   :  { %v3393_v7 = vmul.f32 %v5150_v59, %v6159_v51 }
0x2af2   :  { %v3322_v46 = vpop.permute.xlu0 %3321 }
0x2af3   :  { %v3324_v61 = vmul.f32 %v5148_v58, %v3322_v46  ;;  %v3396_v62 = vpop.permute.xlu1 %3395 }
0x2af4   :  { %v3398_v1 = vmul.f32 %v5150_v59, %v3396_v62 }
0x2af5   :  { %3326 = vrot.lane.b32.xlu0 %v3324_v61, %s5228_s0 }
0x2af6   :  { %3400 = vrot.lane.b32.xlu1 %v3398_v1, %s5228_s0 }
0x2b67   :  { %v3327_v13 = vpop.permute.xlu0 %3326 }
0x2b68   :  { %v6200_v8 = vadd.f32 %v3327_v13, %v3319_v30  ;;  %v3401_v17 = vpop.permute.xlu1 %3400 }
0x2b69   :  { %v6202_v49 = vadd.f32 %v3401_v17, %v3393_v7 }
0x2b6a   :  { %5151 = vtanh.f32 %v6200_v8 }
0x2b6b   :  { %5153 = vtanh.f32 %v6202_v49 }
0x2b74   :  { %v5152_v19 = vpop.eup %5151 }
0x2b75   :  { %v5154_v18 = vpop.eup %5153  ;;  %3332 = vrot.lane.b32.xlu0 %v5152_v19, %s5227_s24 }
0x2b76   :  { %3406 = vrot.lane.b32.xlu1 %v5154_v18, %s5227_s24 }
0x2be7   :  { %v3333_v11 = vpop.permute.xlu0 %3332 }
0x2be8   :  { %v6208_v57 = vmul.f32 %v5148_v58, %v3333_v11  ;;  %v3407_v60 = vpop.permute.xlu1 %3406 }
0x2be9   :  { %v3409_v51 = vmul.f32 %v5150_v59, %v3407_v60 }
0x2bea   :  { %v3411_v16 = vpack.c.bf16 %v6208_v57, %v6208_v57 }
0x2beb   :  { %v3410_v43 = vpack.c.bf16 %v3409_v51, %v3409_v51 }
0x2bec   :  { %3413 = vrot.lane.b32.xlu0 %v3411_v16, %s5228_s0 }
0x2bed   :  { %3459 = vrot.lane.b32.xlu1 %v3410_v43, %s5228_s0 }
0x2c5e   :  { %v3414_v37 = vpop.permute.xlu0 %3413 }
0x2c5f   :  { %v3460_v27 = vpop.permute.xlu1 %3459  ;;  %4806 = vmatmul.mubr.msk.bf16.vlgmr.msra.gmra.mrb[104].mxu1 %vm238_vm2, %v3414_v37 }
0x2c60   :  { %4814 = vmatmul.mubr.msk.bf16.vlgmr.msra.gmra.mrb[108].mxu0 %vm238_vm2, %v3460_v27  ;;  %4818 = vmatpush3.bf16.msra.mxu1 %v5901_v22 }
0x2c61   :  { %4819 = vmatprep.subr.bf16.mxu1 %v5224_v0  ;;  %4821 = vmatprep.mubr.msk.bf16.mxu1 %vm5225_vm0, %v5224_v0 }
0x2c62   :  { %4826 = vmatpush3.bf16.msra.mxu0 %v5951_v44  ;;  %4829 = vmatprep.mubr.msk.bf16.mxu0 %vm5225_vm0, %v5224_v0 }
0x2c63   :  { %4827 = vmatprep.subr.bf16.mxu0 %v5224_v0 }
0x2c64   :  { %4820 = vmatpush3.bf16.msra.mxu1 %v5912_v23 }
0x2c65   :  { %4833 = vmatprep.subr.bf16.mxu1 %v5224_v0 }
0x2c66   :  { %4828 = vmatpush3.bf16.msra.mxu0 %v5963_v41 }
0x2c67   :  { %4822 = vmatmul.mubr.msk.bf16.vlgmr.msra.gmra.mrb[108].mxu1 %vm238_vm2, %v3460_v27  ;;  %4841 = vmatprep.subr.bf16.mxu0 %v5224_v0 }
0x2c68   :  { %4834 = vmatpush3.bf16.msra.mxu1 %v5956_v38  ;;  %4837 = vmatprep.mubr.msk.bf16.mxu1 %vm5225_vm0, %v5224_v0 }
0x2c69   :  { %4835 = vmatprep.subr.bf16.mxu1 %v5224_v0 }
0x2c6c   :  { %4836 = vmatpush3.bf16.msra.mxu1 %v5971_v40 }
0x2c6d   :  { %4849 = vmatprep.subr.bf16.mxu1 %v5224_v0 }
0x2d32   :  { %v3452_v22 = vpop.f32.mrb[104].mxu1 }
0x2d33   :  { %v3498_v23 = vpop.f32.mrb[108].mxu0  ;;  %v4807_v44 = vpop.f32.mrb[105].mxu1 }
0x2d34   :  { %v3499_v2 = vadd.f32 %v3498_v23, %v3452_v22  ;;  %v4815_v41 = vpop.f32.mrb[109].mxu0  ;;  %v3455_v5 = vpop.f32.mrb[106].mxu1  ;;  %v5215_v23 = vld [vmem:[%s6435_s11] sm:$0xff]  }
0x2d35   :  { %v3501_v24 = vpop.f32.mrb[110].mxu0  ;;  %v4808_v3 = vpop.f32.mrb[107].mxu1  ;;  %v5217_v41 = vld [vmem:[%s6438_s14] sm:$0xff]  }
0x2d36   :  { %v3504_v29 = vadd.f32 %v6016_v39, %v3499_v2  ;;  %v4816_v38 = vpop.f32.mrb[111].mxu0  ;;  %v5216_v2 = vld [vmem:[%s6435_s11 + $0x8] sm:$0xff]   ;;  %v5218_v5 = vld [vmem:[%s6439_s13] sm:$0xff]  }
0x2d37   :  { %v5219_v24 = vld [vmem:[%s6438_s14 + $0x8] sm:$0xff]  }
0x2d38   :  { %5155 = vtanh.f32 %v3504_v29  ;;  %v4201_v28 = vmul.f32 -1.442695, %v3504_v29  ;;  %v5220_v3 = vld [vmem:[%s6439_s13 + $0x8] sm:$0xff]  }
0x2d3a   :  { %v3572_v35 = vpop.f32.mrb[108].mxu1 }
0x2d3b   :  { %v3578_v52 = vadd.f32 %v3572_v35, %v2316_v34  ;;  %v4823_v40 = vpop.f32.mrb[109].mxu1 }
0x2d3c   :  { %v3575_v53 = vpop.f32.mrb[110].mxu1 }
0x2d3d   :  { %5157 = vtanh.f32 %v3578_v52  ;;  %v4824_v54 = vpop.f32.mrb[111].mxu1  ;;  %v4203_v45 = vmul.f32 -1.442695, %v3578_v52 }
0x2d3e   :  { %5159 = vpow2.f32 %v4201_v28  ;;  %v5221_v54 = vld [vmem:[%s6437_s12] ss:$0 sm:$0xff] }
0x2d3f   :  { %5161 = vpow2.f32 %v4203_v45 }
0x2d42   :  { %v5156_v55 = vpop.eup %5155 }
0x2d43   :  { %3514 = vrot.lane.b32.xlu0 %v5156_v55, %s5227_s24  ;;  %v2319_v55 = vadd.f32 %v5221_v54, %v5993_v36  ;;  %v6323_v54 = vld [vmem:[%s6441_s1] sm:$0xff] }
0x2d44   :  { %vm458_vm3 = vcmp.eq.s32.totalorder %v6323_v54, 1  ;;  %vm651_vm12 = vcmp.eq.s32.totalorder %v6323_v54, 2  ;;  %vm844_vm13 = vcmp.eq.s32.totalorder %v6323_v54, 3  ;;  %vm1037_vm14 = vcmp.eq.s32.totalorder %v6323_v54, 4 }
0x2d45   :  { %vm1230_vm15 = vcmp.eq.s32.totalorder %v6323_v54, 5  ;;  %vm1616_vm1 = vcmp.eq.s32.totalorder %v6323_v54, 7 }
0x2d47   :  { %v5158_v12 = vpop.eup %5157 }
0x2d48   :  { %3588 = vrot.lane.b32.xlu1 %v5158_v12, %s5227_s24  ;;  %v5160_v56 = vpop.eup %5159 }
0x2d49   :  { %v3508_v58 = vadd.f32 1.0, %v5160_v56  ;;  %v5162_v46 = vpop.eup %5161 }
0x2d4a   :  { %v3582_v48 = vadd.f32 1.0, %v5162_v46 }
0x2d4b   :  { %5163 = vrcp.f32 %v3508_v58 }
0x2d4c   :  { %5165 = vrcp.f32 %v3582_v48 }
0x2d55   :  { %v5164_v9 = vpop.eup %5163 }
0x2d56   :  { %v5166_v62 = vpop.eup %5165  ;;  %v3512_v13 = vmul.f32 %v5164_v9, %v6200_v8 }
0x2d57   :  { %v3586_v19 = vmul.f32 %v5166_v62, %v6202_v49 }
0x2db5   :  { %v3515_v59 = vpop.permute.xlu0 %3514 }
0x2db6   :  { %v3517_v61 = vmul.f32 %v5164_v9, %v3515_v59 }
0x2db8   :  { %3519 = vrot.lane.b32.xlu0 %v3517_v61, %s5228_s0 }
0x2dba   :  { %v3589_v1 = vpop.permute.xlu1 %3588 }
0x2dbb   :  { %v3591_v30 = vmul.f32 %v5166_v62, %v3589_v1 }
0x2dbd   :  { %3593 = vrot.lane.b32.xlu1 %v3591_v30, %s5228_s0 }
0x2e2a   :  { %v3520_v7 = vpop.permute.xlu0 %3519 }
0x2e2b   :  { %v6243_v17 = vadd.f32 %v3520_v7, %v3512_v13 }
0x2e2d   :  { %5167 = vtanh.f32 %v6243_v17 }
0x2e2f   :  { %v3594_v18 = vpop.permute.xlu1 %3593 }
0x2e30   :  { %v6247_v11 = vadd.f32 %v3594_v18, %v3586_v19 }
0x2e32   :  { %5169 = vtanh.f32 %v6247_v11 }
0x2e37   :  { %v5168_v60 = vpop.eup %5167 }
0x2e38   :  { %3525 = vrot.lane.b32.xlu0 %v5168_v60, %s5227_s24 }
0x2e3c   :  { %v5170_v51 = vpop.eup %5169 }
0x2e3d   :  { %3599 = vrot.lane.b32.xlu1 %v5170_v51, %s5227_s24 }
0x2eaa   :  { %v3526_v16 = vpop.permute.xlu0 %3525 }
0x2eab   :  { %v6252_v8 = vmul.f32 %v5164_v9, %v3526_v16 }
0x2ead   :  { %v3604_v43 = vpack.c.bf16 %v6252_v8, %v6252_v8 }
0x2eaf   :  { %3606 = vrot.lane.b32.xlu0 %v3604_v43, %s5228_s0  ;;  %v3600_v49 = vpop.permute.xlu1 %3599 }
0x2eb0   :  { %v3602_v37 = vmul.f32 %v5166_v62, %v3600_v49 }
0x2eb2   :  { %v3603_v27 = vpack.c.bf16 %v3602_v37, %v3602_v37 }
0x2eb4   :  { %3652 = vrot.lane.b32.xlu1 %v3603_v27, %s5228_s0 }
0x2f21   :  { %v3607_v22 = vpop.permute.xlu0 %3606 }
0x2f22   :  { %4830 = vmatmul.mubr.msk.bf16.vlgmr.msra.gmra.mrb[112].mxu0 %vm238_vm2, %v3607_v22 }
0x2f23   :  { %4842 = vmatpush3.bf16.msra.mxu0 %v5215_v23  ;;  %4845 = vmatprep.mubr.msk.bf16.mxu0 %vm5225_vm0, %v5224_v0 }
0x2f24   :  { %4843 = vmatprep.subr.bf16.mxu0 %v5224_v0 }
0x2f26   :  { %v3653_v44 = vpop.permute.xlu1 %3652 }
0x2f27   :  { %4844 = vmatpush3.bf16.msra.mxu0 %v5216_v2  ;;  %4838 = vmatmul.mubr.msk.bf16.vlgmr.msra.gmra.mrb[112].mxu1 %vm238_vm2, %v3653_v44 }
0x2f28   :  { %4857 = vmatprep.subr.bf16.mxu0 %v5224_v0  ;;  %4850 = vmatpush3.bf16.msra.mxu1 %v5217_v41 }
0x2f29   :  { %4851 = vmatprep.subr.bf16.mxu1 %v5224_v0  ;;  %4853 = vmatprep.mubr.msk.bf16.mxu1 %vm5225_vm0, %v5224_v0 }
0x2f2a   :  { %4846 = vmatmul.mubr.msk.bf16.vlgmr.msra.gmra.mrb[116].mxu0 %vm238_vm2, %v3653_v44 }
0x2f2b   :  { %4858 = vmatpush3.bf16.msra.mxu0 %v5218_v5  ;;  %4861 = vmatprep.mubr.msk.bf16.mxu0 %vm5225_vm0, %v5224_v0 }
0x2f2c   :  { %4859 = vmatprep.subr.bf16.mxu0 %v5224_v0  ;;  %4852 = vmatpush3.bf16.msra.mxu1 %v5219_v24 }
0x2f2d   :  { %4865 = vmatprep.subr.bf16.mxu1 %v5224_v0 }
0x2f2f   :  { %4860 = vmatpush3.bf16.msra.mxu0 %v5220_v3 }
0x2f30   :  { %4873 = vmatprep.subr.bf16.mxu0 %v5224_v0 }
0x2ff5   :  { %v3645_v29 = vpop.f32.mrb[112].mxu0 }
0x2ff6   :  { %v4831_v38 = vpop.f32.mrb[113].mxu0 }
0x2ff7   :  { %v3648_v34 = vpop.f32.mrb[114].mxu0 }
0x2ff8   :  { %v4832_v35 = vpop.f32.mrb[115].mxu0 }
0x2ffa   :  { %v3691_v52 = vpop.f32.mrb[112].mxu1 }
0x2ffb   :  { %v3692_v40 = vadd.f32 %v3691_v52, %v3645_v29  ;;  %v4839_v53 = vpop.f32.mrb[113].mxu1 }
0x2ffc   :  { %v3694_v12 = vpop.f32.mrb[114].mxu1 }
0x2ffd   :  { %v3697_v28 = vadd.f32 %v6016_v39, %v3692_v40  ;;  %v3765_v45 = vpop.f32.mrb[116].mxu0  ;;  %v4840_v56 = vpop.f32.mrb[115].mxu1 }
0x2ffe   :  { %v3771_v58 = vadd.f32 %v3765_v45, %v2319_v55  ;;  %v4847_v46 = vpop.f32.mrb[117].mxu0  ;;  %v2330_v45 = vld [vmem:[%s6442_s3] sm:$0xff]  ;;  %v459_v56 = vsel %vm458_vm3, 1, %v5226_v4  ;;  %vm1809_vm3 = vcmp.eq.s32.totalorder %v6323_v54, 8 }
0x2fff   :  { %5171 = vtanh.f32 %v3697_v28  ;;  %v3768_v48 = vpop.f32.mrb[118].mxu0  ;;  %v4206_v62 = vmul.f32 -1.442695, %v3697_v28  ;;  %vm2564_vm4 = vcmp.eq.s32.totalorder %v2330_v45, 1  ;;  %vm2757_vm5 = vcmp.eq.s32.totalorder %v2330_v45, 2 }
0x3000   :  { %5173 = vtanh.f32 %v3771_v58  ;;  %v4848_v9 = vpop.f32.mrb[119].mxu0  ;;  %v4208_v1 = vmul.f32 -1.442695, %v3771_v58  ;;  %v2565_v58 = vsel %vm2564_vm4, 1, %v5226_v4  ;;  %v2758_v46 = vsel %vm2757_vm5, 1, %v5226_v4 }
0x3001   :  { %5175 = vpow2.f32 %v4206_v62  ;;  %vm2950_vm6 = vcmp.eq.s32.totalorder %v2330_v45, 3  ;;  %vm3143_vm7 = vcmp.eq.s32.totalorder %v2330_v45, 4  ;;  %vm3336_vm8 = vcmp.eq.s32.totalorder %v2330_v45, 5 }
0x3002   :  { %5177 = vpow2.f32 %v4208_v1  ;;  %v2951_v48 = vsel %vm2950_vm6, 1, %v5226_v4  ;;  %v3144_v9 = vsel %vm3143_vm7, 1, %v5226_v4  ;;  %vm3529_vm9 = vcmp.eq.s32.totalorder %v2330_v45, 6 }
0x3003   :  { %vm3722_vm10 = vcmp.eq.s32.totalorder %v2330_v45, 7  ;;  %vm3915_vm11 = vcmp.eq.s32.totalorder %v2330_v45, 8  ;;  %vm2002_vm4 = vcmp.eq.s32.totalorder %v6323_v54, 9  ;;  %vm2195_vm5 = vcmp.eq.s32.totalorder %v6323_v54, 10 }
0x3004   :  { %v3723_v62 = vsel %vm3722_vm10, 1, %v5226_v4 }
0x3009   :  { %v5172_v59 = vpop.eup %5171 }
0x300a   :  { %v5174_v61 = vpop.eup %5173  ;;  %3707 = vrot.lane.b32.xlu0 %v5172_v59, %s5227_s24  ;;  %v3337_v59 = vsel %vm3336_vm8, 1, %v5226_v4 }
0x300b   :  { %3781 = vrot.lane.b32.xlu1 %v5174_v61, %s5227_s24  ;;  %v5176_v36 = vpop.eup %5175  ;;  %v3530_v61 = vsel %vm3529_vm9, 1, %v5226_v4 }
0x300c   :  { %v5178_v39 = vpop.eup %5177  ;;  %v3701_v30 = vadd.f32 1.0, %v5176_v36 }
0x300d   :  { %v3775_v13 = vadd.f32 1.0, %v5178_v39 }
0x300e   :  { %5179 = vrcp.f32 %v3701_v30 }
0x300f   :  { %5181 = vrcp.f32 %v3775_v13 }
0x3018   :  { %v5180_v7 = vpop.eup %5179 }
0x3019   :  { %v5182_v18 = vpop.eup %5181  ;;  %v3705_v43 = vmul.f32 %v5180_v7, %v6243_v17  ;;  %v5222_v17 = vld [vmem:[%s6433_s9] ss:$0 sm:$0xff] }
0x301a   :  { %v3779_v37 = vmul.f32 %v5182_v18, %v6247_v11  ;;  %v2170_v41 = vadd.f32 %v5222_v17, %v5923_v47 }
0x301c   :  { %v4156_v35 = vmul.f32 -1.442695, %v2170_v41 }
0x307c   :  { %v3708_v19 = vpop.permute.xlu0 %3707 }
0x307d   :  { %v3710_v60 = vmul.f32 %v5180_v7, %v3708_v19  ;;  %v3782_v51 = vpop.permute.xlu1 %3781 }
0x307e   :  { %v3784_v16 = vmul.f32 %v5182_v18, %v3782_v51 }
0x307f   :  { %3712 = vrot.lane.b32.xlu0 %v3710_v60, %s5228_s0  ;;  %v5223_v60 = vld [vmem:[%s6440_s15] ss:$0 sm:$0xff] }
0x3080   :  { %3786 = vrot.lane.b32.xlu1 %v3784_v16, %s5228_s0 }
0x30f1   :  { %v3713_v49 = vpop.permute.xlu0 %3712 }
0x30f2   :  { %v6302_v27 = vadd.f32 %v3713_v49, %v3705_v43  ;;  %v3787_v22 = vpop.permute.xlu1 %3786  ;;  %v3916_v49 = vsel %vm3915_vm11, 1, %v5226_v4 }
0x30f3   :  { %v3789_v23 = vadd.f32 %v3787_v22, %v3779_v37 }
0x30f4   :  { %5183 = vtanh.f32 %v6302_v27 }
0x30f5   :  { %5185 = vtanh.f32 %v3789_v23 }
0x30f6   :  { %5187 = vtanh.f32 %v2170_v41  ;;  %v652_v41 = vsel %vm651_vm12, 1, %v5226_v4 }
0x30f7   :  { %5189 = vpow2.f32 %v4156_v35 }
0x30fe   :  { %v5184_v44 = vpop.eup %5183 }
0x30ff   :  { %v5186_v2 = vpop.eup %5185  ;;  %3718 = vrot.lane.b32.xlu0 %v5184_v44, %s5227_s24 }
0x3100   :  { %3792 = vrot.lane.b32.xlu1 %v5186_v2, %s5227_s24  ;;  %v5188_v34 = vpop.eup %5187 }
0x3101   :  { %v5190_v47 = vpop.eup %5189 }
0x3102   :  { %v2174_v52 = vadd.f32 1.0, %v5190_v47 }
0x3104   :  { %5191 = vrcp.f32 %v2174_v52  ;;  %v1810_v52 = vsel %vm1809_vm3, 1, %v5226_v4 }
0x310e   :  { %v6329_v55 = vpop.eup %5191 }
0x310f   :  { %v2178_v35 = vmul.f32 %v6329_v55, %v5878_v63 }
0x3171   :  { %v3719_v11 = vpop.permute.xlu0 %3718 }
0x3172   :  { %v6311_v5 = vmul.f32 %v5180_v7, %v3719_v11  ;;  %v3793_v24 = vpop.permute.xlu1 %3792  ;;  %v845_v11 = vsel %vm844_vm13, 1, %v5226_v4 }
0x3173   :  { %v3795_v3 = vmul.f32 %v5182_v18, %v3793_v24  ;;  %v1038_v24 = vsel %vm1037_vm14, 1, %v5226_v4 }
0x3174   :  { %v3797_v29 = vpack.c.bf16 %v6311_v5, %v6311_v5 }
0x3175   :  { %v3796_v38 = vpack.c.bf16 %v3795_v3, %v3795_v3  ;;  %v1231_v3 = vsel %vm1230_vm15, 1, %v5226_v4 }
0x3176   :  { %3799 = vrot.lane.b32.xlu0 %v3797_v29, %s5228_s0 }
0x3177   :  { %3845 = vrot.lane.b32.xlu1 %v3796_v38, %s5228_s0  ;;  %v1617_v38 = vsel %vm1616_vm1, 1, %v5226_v4 }
0x317a   :  { %2180 = vrot.lane.b32.xlu0 %v5188_v34, %s5227_s24 }
0x31e8   :  { %v3800_v40 = vpop.permute.xlu0 %3799 }
0x31e9   :  { %v3846_v53 = vpop.permute.xlu1 %3845  ;;  %4854 = vmatmul.mubr.msk.bf16.vlgmr.msra.gmra.mrb[116].mxu1 %vm238_vm2, %v3800_v40  ;;  %v2003_v40 = vsel %vm2002_vm4, 1, %v5226_v4 }
0x31ea   :  { %4862 = vmatmul.mubr.msk.bf16.vlgmr.msra.gmra.mrb[120].mxu0 %vm238_vm2, %v3846_v53  ;;  %4869 = vmatprep.mubr.msk.bf16.mxu1 %vm5225_vm0, %v5224_v0  ;;  %v2196_v53 = vsel %vm2195_vm5, 1, %v5226_v4 }
0x31eb   :  { %4877 = vmatprep.mubr.msk.bf16.mxu0 %vm5225_vm0, %v5224_v0  ;;  %vm1423_vm0 = vcmp.eq.s32.totalorder %v6323_v54, 6  ;;  %v4912_v54 = vld [vmem:[%s6443_s16 + $0x8] sm:$0xff]  }
0x31ec   :  { %v2181_v12 = vpop.permute.xlu0 %2180  ;;  %v1424_v29 = vsel %vm1423_vm0, 1, %v5226_v4 }
0x31ed   :  { %v2183_v28 = vmul.f32 %v6329_v55, %v2181_v12 }
0x31ef   :  { %2185 = vrot.lane.b32.xlu0 %v2183_v28, %s5228_s0 }
0x31f3   :  { %461 = vperm.xlu0 %4886, %v459_v56   ;;  %v4911_v56 = vld [vmem:[%s6443_s16] sm:$0xff]  }
0x31f4   :  { %4874 = vmatpush3.bf16.msra.mxu0 %v4911_v56 }
0x31f5   :  { %4875 = vmatprep.subr.bf16.mxu0 %v5224_v0 }
0x31f7   :  { %2567 = vperm.xlu0 %4886, %v2565_v58  }
0x31f8   :  { %4876 = vmatpush3.bf16.msra.mxu0 %v4912_v54 }
0x31fb   :  { %2760 = vperm.xlu0 %4886, %v2758_v46  }
0x31ff   :  { %2953 = vperm.xlu0 %4886, %v2951_v48  }
0x3203   :  { %3146 = vperm.xlu0 %4886, %v3144_v9  }
0x3207   :  { %3339 = vperm.xlu0 %4886, %v3337_v59  }
0x320b   :  { %3532 = vperm.xlu0 %4886, %v3530_v61  }
0x320f   :  { %3725 = vperm.xlu0 %4886, %v3723_v62  }
0x3213   :  { %3918 = vperm.xlu0 %4886, %v3916_v49  }
0x3261   :  { %v2186_v34 = vpop.permute.xlu0 %2185 }
0x3262   :  { %v2188_v47 = vadd.f32 %v2186_v34, %v2178_v35  ;;  %v4218_v35 = vld [vmem:[%s6446_s18] ss:$0 sm:$0xff] }
0x3272   :  { %v462_v61 = vpop.permute.xlu0 %461 }
0x3273   :  { %vm463_vm6 = vcmp.eq.s32.totalorder %v462_v61, 1 }
0x32bc   :  { %v3838_v1 = vpop.f32.mrb[116].mxu1 }
0x32bd   :  { %v3884_v36 = vpop.f32.mrb[120].mxu0  ;;  %v4855_v39 = vpop.f32.mrb[117].mxu1 }
0x32be   :  { %v3885_v30 = vadd.f32 %v3884_v36, %v3838_v1  ;;  %v4863_v13 = vpop.f32.mrb[121].mxu0  ;;  %v3841_v7 = vpop.f32.mrb[118].mxu1  ;;  %v464_v36 = vsel %vm463_vm6, %v5483_v21, 0.0  ;;  %v4913_v39 = vld [vmem:[%s6444_s17] sm:$0xff]  }
0x32bf   :  { %v3887_v19 = vpop.f32.mrb[122].mxu0  ;;  %v4856_v18 = vpop.f32.mrb[119].mxu1  ;;  %4866 = vmatpush3.bf16.msra.mxu1 %v4913_v39 }
0x32c0   :  { %v3890_v51 = vadd.f32 %v5223_v60, %v3885_v30  ;;  %v4864_v16 = vpop.f32.mrb[123].mxu0  ;;  %v4914_v19 = vld [vmem:[%s6444_s17 + $0x8] sm:$0xff]   ;;  %4867 = vmatprep.subr.bf16.mxu1 %v5224_v0  ;;  %v2568_v0 = vpop.permute.xlu0 %2567 }
0x32c1   :  { %vm2569_vm0 = vcmp.eq.s32.totalorder %v2568_v0, 1 }
0x32c2   :  { %5193 = vtanh.f32 %v3890_v51  ;;  %v4211_v37 = vmul.f32 -1.442695, %v3890_v51 }
0x32c3   :  { %4868 = vmatpush3.bf16.msra.mxu1 %v4914_v19 }
0x32c4   :  { %5195 = vpow2.f32 %v4211_v37 }
0x32cc   :  { %v5194_v43 = vpop.eup %5193 }
0x32cd   :  { %3900 = vrot.lane.b32.xlu1 %v5194_v43, %s5227_s24 }
0x32ce   :  { %v5196_v22 = vpop.eup %5195 }
0x32cf   :  { %v3894_v23 = vadd.f32 1.0, %v5196_v22 }
0x32d1   :  { %5197 = vrcp.f32 %v3894_v23 }
0x32d2   :  { %5199 = vtanh.f32 %v2188_v47 }
0x32db   :  { %v6350_v44 = vpop.eup %5197 }
0x32dc   :  { %v5200_v12 = vpop.eup %5199  ;;  %v3898_v63 = vmul.f32 %v6350_v44, %v6302_v27 }
0x333f   :  { %v3901_v2 = vpop.permute.xlu1 %3900 }
0x3340   :  { %v3903_v17 = vmul.f32 %v6350_v44, %v3901_v2 }
0x3342   :  { %3905 = vrot.lane.b32.xlu1 %v3903_v17, %s5228_s0 }
0x3346   :  { %654 = vperm.xlu1 %4887, %v652_v41  }
0x334a   :  { %847 = vperm.xlu1 %4887, %v845_v11  }
0x334e   :  { %1040 = vperm.xlu1 %4887, %v1038_v24  }
0x3352   :  { %1233 = vperm.xlu1 %4887, %v1231_v3  }
0x3356   :  { %1426 = vperm.xlu1 %4887, %v1424_v29  }
0x335a   :  { %1619 = vperm.xlu1 %4887, %v1617_v38  }
0x335e   :  { %1812 = vperm.xlu1 %4887, %v1810_v52  }
0x3362   :  { %2005 = vperm.xlu1 %4887, %v2003_v40  }
0x3366   :  { %2198 = vperm.xlu1 %4887, %v2196_v53  }
0x336a   :  { %2191 = vrot.lane.b32.xlu1 %v5200_v12, %s5227_s24 }
0x33b4   :  { %v3906_v28 = vpop.permute.xlu1 %3905 }
0x33b5   :  { %v3908_v45 = vadd.f32 %v3906_v28, %v3898_v63  ;;  %v4219_v28 = vld [vmem:[%s6447_s19] ss:$0 sm:$0xff] }
0x33b7   :  { %5201 = vtanh.f32 %v3908_v45 }
0x33c1   :  { %v5202_v4 = vpop.eup %5201 }
0x33c2   :  { %3911 = vrot.lane.b32.xlu0 %v5202_v4, %s5227_s24 }
0x33c5   :  { %v655_v58 = vpop.permute.xlu1 %654 }
0x33c6   :  { %vm656_vm7 = vcmp.eq.s32.totalorder %v655_v58, 1 }
0x33c7   :  { %v657_v30 = vsel %vm656_vm7, %v5540_v42, %v464_v36 }
0x33c9   :  { %v848_v27 = vpop.permute.xlu1 %847 }
0x33ca   :  { %vm849_vm8 = vcmp.eq.s32.totalorder %v848_v27, 1 }
0x33cb   :  { %v850_v13 = vsel %vm849_vm8, %v5584_v31, %v657_v30 }
0x33cd   :  { %v1041_v46 = vpop.permute.xlu1 %1040 }
0x33ce   :  { %vm1042_vm9 = vcmp.eq.s32.totalorder %v1041_v46, 1 }
0x33cf   :  { %v1043_v21 = vsel %vm1042_vm9, %v5628_v33, %v850_v13 }
0x33d1   :  { %v1234_v48 = vpop.permute.xlu1 %1233 }
0x33d2   :  { %vm1235_vm10 = vcmp.eq.s32.totalorder %v1234_v48, 1 }
0x33d3   :  { %v1236_v18 = vsel %vm1235_vm10, %v5672_v26, %v1043_v21  ;;  %v2761_v26 = vpop.permute.xlu0 %2760  ;;  %vm4084_vm10 = vcmask 7168  }
0x33d4   :  { %vm2762_vm1 = vcmp.eq.s32.totalorder %v2761_v26, 1 }
0x33d5   :  { %v1427_v9 = vpop.permute.xlu1 %1426 }
0x33d6   :  { %vm1428_vm11 = vcmp.eq.s32.totalorder %v1427_v9, 1 }
0x33d7   :  { %v1429_v42 = vsel %vm1428_vm11, %v5731_v20, %v1236_v18  ;;  %v2954_v37 = vpop.permute.xlu0 %2953 }
0x33d8   :  { %vm2955_vm3 = vcmp.eq.s32.totalorder %v2954_v37, 1 }
0x33d9   :  { %v1620_v59 = vpop.permute.xlu1 %1619 }
0x33da   :  { %vm1621_vm12 = vcmp.eq.s32.totalorder %v1620_v59, 1 }
0x33db   :  { %v1622_v31 = vsel %vm1621_vm12, %v5800_v32, %v1429_v42  ;;  %v3147_v20 = vpop.permute.xlu0 %3146 }
0x33dc   :  { %vm3148_vm4 = vcmp.eq.s32.totalorder %v3147_v20, 1 }
0x33dd   :  { %v1813_v62 = vpop.permute.xlu1 %1812 }
0x33de   :  { %vm1814_vm13 = vcmp.eq.s32.totalorder %v1813_v62, 1 }
0x33df   :  { %v1815_v51 = vsel %vm1814_vm13, %v5844_v15, %v1622_v31  ;;  %v3340_v22 = vpop.permute.xlu0 %3339  ;;  %v2570_v15 = vsel %vm2569_vm0, %v6032_v25, 0.0 }
0x33e0   :  { %vm3341_vm5 = vcmp.eq.s32.totalorder %v3340_v22, 1 }
0x33e1   :  { %v2006_v1 = vpop.permute.xlu1 %2005 }
0x33e2   :  { %vm2007_vm14 = vcmp.eq.s32.totalorder %v2006_v1, 1 }
0x33e3   :  { %v2008_v33 = vsel %vm2007_vm14, %v5887_v6, %v1815_v51  ;;  %v3533_v23 = vpop.permute.xlu0 %3532  ;;  %v2763_v6 = vsel %vm2762_vm1, %v6076_v14, %v2570_v15 }
0x33e4   :  { %v2956_v2 = vsel %vm2955_vm3, %v6120_v10, %v2763_v6  ;;  %vm3534_vm6 = vcmp.eq.s32.totalorder %v3533_v23, 1 }
0x33e5   :  { %v2199_v7 = vpop.permute.xlu1 %2198  ;;  %v3149_v17 = vsel %vm3148_vm4, %v6164_v50, %v2956_v2  ;;  %v26_v50 = vstv %s6445_s20 }
0x33e6   :  { %vm2200_vm15 = vcmp.eq.s32.totalorder %v2199_v7, 1  ;;  %v3342_v41 = vsel %vm3341_vm5, %v6208_v57, %v3149_v17  ;;  %27 = vst [vmem:[#allocation4] sm:$0x1] %v26_v50 }
0x33e7   :  { %v3726_v32 = vpop.permute.xlu0 %3725  ;;  %v3535_v24 = vsel %vm3534_vm6, %v6252_v8, %v3342_v41 }
0x33e8   :  { %vm3727_vm7 = vcmp.eq.s32.totalorder %v3726_v32, 1 }
0x33e9   :  { %v2192_v60 = vpop.permute.xlu1 %2191  ;;  %v3728_v25 = vsel %vm3727_vm7, %v6311_v5, %v3535_v24 }
0x33ea   :  { %v2194_v16 = vmul.f32 %v6329_v55, %v2192_v60 }
0x33eb   :  { %v3919_v55 = vpop.permute.xlu0 %3918 }
0x33ec   :  { %v2201_v43 = vsel %vm2200_vm15, %v2194_v16, %v2008_v33  ;;  %vm3920_vm8 = vcmp.eq.s32.totalorder %v3919_v55, 1 }
0x33ed   :  { %v3922_v49 = vpack.c.bf16 %v2201_v43, %v2201_v43  ;;  %v4220_v4 = vld [vmem:[#allocation4] ss:$0 sm:$0xff] }
0x33ef   :  { %3991 = vrot.lane.b32.xlu0 %v3922_v49, %s5228_s0 }
0x3434   :  { %v3912_v11 = vpop.permute.xlu0 %3911 }
0x3435   :  { %v3914_v3 = vmul.f32 %v6350_v44, %v3912_v11 }
0x3437   :  { %v3921_v29 = vsel %vm3920_vm8, %v3914_v3, %v3728_v25 }
0x3438   :  { %v3927_v38 = vpack.c.bf16 %v3921_v29, %v3921_v29 }
0x343a   :  { %3933 = vrot.lane.b32.xlu1 %v3927_v38, %s5228_s0 }
0x3461   :  { %v3992_v14 = vpop.permute.xlu0 %3991 }
0x3462   :  { %4878 = vmatmul.mubr.msk.bf16.vlgmr.msra.gmra.mrb[124].mxu0 %vm238_vm2, %v3992_v14 }
0x34ac   :  { %v3934_v10 = vpop.permute.xlu1 %3933 }
0x34ad   :  { %4870 = vmatmul.mubr.msk.bf16.vlgmr.msra.gmra.mrb[120].mxu1 %vm238_vm2, %v3934_v10 }
0x3535   :  { %v4042_v57 = vpop.f32.mrb[124].mxu0 }
0x3536   :  { %v4879_v8 = vpop.f32.mrb[125].mxu0 }
0x3537   :  { %v4045_v44 = vpop.f32.mrb[126].mxu0 }
0x3538   :  { %v4880_v5 = vpop.f32.mrb[127].mxu0 }
0x3580   :  { %v3984_v34 = vpop.f32.mrb[120].mxu1 }
0x3581   :  { %v4043_v47 = vadd.f32 %v4042_v57, %v3984_v34  ;;  %v4871_v52 = vpop.f32.mrb[121].mxu1 }
0x3582   :  { %v3987_v40 = vpop.f32.mrb[122].mxu1 }
0x3583   :  { %v4055_v53 = vadd.f32 %v4218_v35, %v4043_v47  ;;  %v4872_v12 = vpop.f32.mrb[123].mxu1 }
0x3585   :  { %v4057_v63 = vmul.f32 0.01, %v4055_v53  ;;  %vm4056_vm9 = vcmp.ge.f32.partialorder %v4055_v53, 0.0 }
0x3587   :  { %v4058_v45 = vsel %vm4056_vm9, %v4055_v53, %v4057_v63 }
0x3588   :  { %v4066_v56 = vmul.f32 %v4219_v28, %v4058_v45 }
0x358a   :  { %v4067_v54 = vsel %vm238_vm2, %v4066_v56, 0.0 }
0x358b   :  { %4068 = vadd.xlane.f32.xlu1 %v4067_v54 }
0x3618   :  { %v4069_v58 = vpop.xlane.xlu1 %4068 }
0x3619   :  { %v4077_v27 = vadd.f32 %v4220_v4, %v4069_v58 }
0x361b   :  { %v4221_v46 = vmul.f32 -1.442695, %v4077_v27 }
0x361d   :  { %5203 = vpow2.f32 %v4221_v46 }
0x3627   :  { %v5204_v48 = vpop.eup %5203 }
0x3628   :  { %v4081_v9 = vadd.f32 1.0, %v5204_v48 }
0x362a   :  { %5205 = vrcp.f32 %v4081_v9 }
0x3634   :  { %v5206_v59 = vpop.eup %5205 }
0x3635   :  { %4085 = vst.msk [vmem:[%s6448_s21] sm:$0xff] %vm4084_vm10, %v5206_v59 }

</bundles_post_ra>
